<compile_context>
chip_gen: v7x
topology: tpu7x:2x2x1
jax: 0.10.0
libtpu: 0.0.40
codegen_flags: <defaults>
</compile_context>

<pallas_src>
import functools

import jax
import jax.numpy as jnp
from jax.experimental import pallas as pl
from jax.experimental.pallas import tpu as pltpu

EPS = 1e-5


def _pad8(c):
    return -(-c // 8) * 8


def lowrank_bottleneck_kernel(
    x_ref,      # (Cin,  NHW)  f32  activations, pixels on lanes
    m_ref,      # (8,    NHW)  f32  per-tap 3x3 edge masks (non-center taps)
    wg_ref,     # (R,  LANES)  f32  packed weights + BN gamma/beta table
    o_ref,      # (cout, NHW)  f32
    *, H, W, low, width, cout, offs,
):
    Cin, NHW = x_ref.shape
    inv_n = 1.0 / NHW
    bf16 = jnp.bfloat16

    # Ones column: turns per-channel BN reductions into tiny MXU matmuls
    # ((c, NHW) @ (NHW, 1)) so the XLU (busy with the 3x3 rolls) stays free.
    ones_col = jnp.ones((NHW, 1), jnp.float32)

    def mm(a, b):
        return jnp.dot(a, b, preferred_element_type=jnp.float32)

    def wslice(off, r, c):
        return wg_ref[off:off + r, 0:c]

    def bn(z, goff, c):
        # Training-mode BatchNorm over the NHW (lane) axis, one-pass stats.
        g = wg_ref[goff:goff + c, 0:1]
        b = wg_ref[goff:goff + c, 1:2]
        mean = mm(z, ones_col) * inv_n                     # (c, 1)  on MXU
        ex2 = mm(z * z, ones_col) * inv_n                  # (c, 1)  on MXU
        var = jnp.maximum(ex2 - mean * mean, 0.0)          # guard cancellation
        scale = g * jax.lax.rsqrt(var + EPS)
        return z * scale + (b - mean * scale)

    # ---- stage 1: relu(bn1_v(conv1_v(bn1_u(conv1_u(x))))) -------------------
    t = mm(wslice(offs["w1u"], low, Cin).astype(bf16), x_ref[...].astype(bf16))
    t = bn(t, offs["g1u"], low)
    t = mm(wslice(offs["w1v"], width, low).astype(bf16), t.astype(bf16))
    t = jnp.maximum(bn(t, offs["g1v"], width), 0.0)

    # ---- stage 2: 3x3 conv (stride 1, pad 1) as 9 per-tap matmuls -----------
    # Per tap: (low, width) @ (width, NHW) on the MXU, then roll the SMALL
    # (low, NHW) partial on the lane axis, multiply by the precomputed edge
    # mask, and accumulate in f32.  No im2col concat, minimal XLU/VPU work.
    t_bf = t.astype(bf16)
    tap_stride = _pad8(low)
    taps = [(dy, dx) for dy in (-1, 0, 1) for dx in (-1, 0, 1)]
    acc = None
    mrow = 0
    for tap, (dy, dx) in enumerate(taps):
        w_tap = wslice(offs["w2u"] + tap * tap_stride, low, width).astype(bf16)
        u = mm(w_tap, t_bf)                                # (low, NHW) f32
        if dy == 0 and dx == 0:
            part = u
        else:
            # part[f] = u[f + dy*W + dx], zeroed where the 3x3 source pixel
            # falls outside the image (mask is a function of the output pos,
            # so shifting after the channel matmul is exact).
            u = pltpu.roll(u, (-(dy * W + dx)) % NHW, 1)
            part = u * m_ref[mrow:mrow + 1, :]
            mrow += 1
        acc = part if acc is None else acc + part

    t = bn(acc, offs["g2u"], low)
    t = mm(wslice(offs["w2v"], width, low).astype(bf16), t.astype(bf16))
    t = jnp.maximum(bn(t, offs["g2v"], width), 0.0)

    # ---- stage 3 + identity residual + relu ---------------------------------
    t = mm(wslice(offs["w3u"], low, width).astype(bf16), t.astype(bf16))
    t = bn(t, offs["g3u"], low)
    t = mm(wslice(offs["w3v"], cout, low).astype(bf16), t.astype(bf16))
    t = bn(t, offs["g3v"], cout)
    o_ref[...] = jnp.maximum(t + x_ref[...], 0.0)


def lowrank_bottleneck_pallas(x_nchw, P):
    N, Cin, H, W = x_nchw.shape
    low = P["w1u"].shape[0]
    width = P["w1v"].shape[0]
    cout = P["w3v"].shape[0]
    assert cout == Cin, "identity residual (downsample=None) needs Cin == Cout"
    NHW = N * H * W
    assert NHW % 128 == 0

    f32 = lambda a: a.astype(jnp.float32)

    # Pixels-on-lanes activations: (Cin, N*H*W), flat index = n*H*W + y*W + x.
    x2d = f32(jnp.transpose(x_nchw, (1, 0, 2, 3)).reshape(Cin, NHW))

    # Eight per-tap edge masks (center tap needs none): mask[t, f] = 1 iff the
    # 3x3 source pixel for output pixel f and tap t lies inside the image.
    fidx = jnp.arange(NHW, dtype=jnp.int32)
    xp = fidx % W
    yp = (fidx // W) % H
    rows = []
    for dy in (-1, 0, 1):
        for dx in (-1, 0, 1):
            if dy == 0 and dx == 0:
                continue
            ok = jnp.ones((NHW,), jnp.bool_)
            if dy == -1:
                ok = ok & (yp >= 1)
            if dy == 1:
                ok = ok & (yp <= H - 2)
            if dx == -1:
                ok = ok & (xp >= 1)
            if dx == 1:
                ok = ok & (xp <= W - 2)
            rows.append(ok)
    masks = jnp.stack(rows, axis=0).astype(jnp.float32)          # (8, NHW)

    # Pack all weight matrices + the 12 BN gamma/beta vectors into ONE
    # lane-aligned (R, LANES) buffer (one DMA); every block starts on an
    # 8-row boundary so in-kernel slices stay sublane-tile aligned.
    lanes = 128 * pl.cdiv(max(Cin, width, low, 2), 128)
    w2u = f32(P["w2u"])                                          # (low, width, 3, 3)

    def gb(g, b):
        return jnp.stack([f32(g), f32(b)], axis=1)               # (c, 2)

    named = [("w1u", f32(P["w1u"][:, :, 0, 0])),                 # (low, Cin)
             ("w1v", f32(P["w1v"][:, :, 0, 0]))]                 # (width, low)
    named += [("w2u" if t == 0 else f"_w2u{t}", w2u[:, :, t // 3, t % 3])
              for t in range(9)]                                 # 9 x (low, width)
    named += [("w2v", f32(P["w2v"][:, :, 0, 0])),
              ("w3u", f32(P["w3u"][:, :, 0, 0])),
              ("w3v", f32(P["w3v"][:, :, 0, 0])),
              ("g1u", gb(P["g1u"], P["b1u"])),
              ("g1v", gb(P["g1v"], P["b1v"])),
              ("g2u", gb(P["g2u"], P["b2u"])),
              ("g2v", gb(P["g2v"], P["b2v"])),
              ("g3u", gb(P["g3u"], P["b3u"])),
              ("g3v", gb(P["g3v"], P["b3v"]))]

    offs, pieces, row = {}, [], 0
    for name, mat in named:
        offs[name] = row
        r, c = mat.shape
        pieces.append(jnp.pad(mat, ((0, _pad8(r) - r), (0, lanes - c))))
        row += _pad8(r)
    wg = jnp.concatenate(pieces, axis=0)                          # (R, lanes) f32

    mm_flops = 2 * NHW * (Cin * low + low * width + 9 * width * low
                          + low * width + width * low + low * cout)
    bn_flops = 4 * NHW * (3 * low + 2 * width + cout)             # stats matmuls
    bytes_accessed = 4 * (x2d.size + masks.size + wg.size + cout * NHW)
    transcendentals = 3 * low + 2 * width + cout                  # rsqrt lanes

    kernel = functools.partial(
        lowrank_bottleneck_kernel,
        H=H, W=W, low=low, width=width, cout=cout, offs=offs)

    out2d = pl.pallas_call(
        kernel,
        out_shape=jax.ShapeDtypeStruct((cout, NHW), jnp.float32),
        in_specs=[pl.BlockSpec(memory_space=pltpu.MemorySpace.VMEM)] * 3,
        out_specs=pl.BlockSpec(memory_space=pltpu.MemorySpace.VMEM),
        cost_estimate=pl.CostEstimate(
            flops=mm_flops + bn_flops,
            transcendentals=transcendentals,
            bytes_accessed=bytes_accessed),
    )(x2d, masks, wg)

    return jnp.transpose(out2d.reshape(cout, N, H, W), (1, 0, 2, 3))


# ------------------------- pure-JAX reference (NCHW) -------------------------
def ref_forward(x, P):
    prec = jax.lax.Precision.HIGHEST

    def c1(x, w):
        return jax.lax.conv_general_dilated(
            x, w, (1, 1), "VALID",
            dimension_numbers=("NCHW", "OIHW", "NCHW"), precision=prec)

    def c3(x, w):
        return jax.lax.conv_general_dilated(
            x, w, (1, 1), ((1, 1), (1, 1)),
            dimension_numbers=("NCHW", "OIHW", "NCHW"), precision=prec)

    def bn(x, g, b):
        m = jnp.mean(x, axis=(0, 2, 3), keepdims=True)
        v = jnp.mean(jnp.square(x - m), axis=(0, 2, 3), keepdims=True)
        return (x - m) * jax.lax.rsqrt(v + EPS) * g.reshape(1, -1, 1, 1) \
            + b.reshape(1, -1, 1, 1)

    relu = lambda t: jnp.maximum(t, 0.0)
    out = relu(bn(c1(bn(c1(x, P["w1u"]), P["g1u"], P["b1u"]), P["w1v"]),
                  P["g1v"], P["b1v"]))
    out = relu(bn(c1(bn(c3(out, P["w2u"]), P["g2u"], P["b2u"]), P["w2v"]),
                  P["g2v"], P["b2v"]))
    out = bn(c1(bn(c1(out, P["w3u"]), P["g3u"], P["b3u"]), P["w3v"]),
             P["g3v"], P["b3v"])
    return relu(out + x)  # downsample=None -> identity is x


def make_params(key, inplanes, planes, rank_factor=4, base_width=64, groups=1):
    width = int(planes * (base_width / 64.0)) * groups
    low = int(width / rank_factor)
    cout = planes * 4
    ks = jax.random.split(key, 18)
    w = lambda k, s: 0.1 * jax.random.normal(k, s, jnp.float32)
    g = lambda k, c: 1.0 + 0.1 * jax.random.normal(k, (c,), jnp.float32)
    b = lambda k, c: 0.1 * jax.random.normal(k, (c,), jnp.float32)
    return dict(
        w1u=w(ks[0], (low, inplanes, 1, 1)),
        w1v=w(ks[1], (width, low, 1, 1)),
        w2u=w(ks[2], (low, width, 3, 3)),
        w2v=w(ks[3], (width, low, 1, 1)),
        w3u=w(ks[4], (low, width, 1, 1)),
        w3v=w(ks[5], (cout, low, 1, 1)),
        g1u=g(ks[6], low),  b1u=b(ks[7], low),
        g1v=g(ks[8], width), b1v=b(ks[9], width),
        g2u=g(ks[10], low), b2u=b(ks[11], low),
        g2v=g(ks[12], width), b2v=b(ks[13], width),
        g3u=g(ks[14], low), b3u=b(ks[15], low),
        g3v=g(ks[16], cout), b3v=b(ks[17], cout),
    )


if __name__ == "__main__":
    # Module config: inplanes=64, planes=16, rank_factor=4 -> width=16, low=4,
    # expansion output = 64 (= inplanes so the identity residual is valid with
    # downsample=None, stride=1).
    N, inplanes, H, W = 2, 64, 16, 16
    planes = 16

    key = jax.random.PRNGKey(0)
    kx, kp = jax.random.split(key)
    x = jax.random.normal(kx, (N, inplanes, H, W), jnp.float32)
    P = make_params(kp, inplanes, planes)

    out = jax.jit(lowrank_bottleneck_pallas)(x, P)
    out = jax.block_until_ready(out)

    ref = ref_forward(x, P)
    assert out.shape == ref.shape == (N, planes * 4, H, W)
    err = float(jnp.max(jnp.abs(out - ref)))
    # Reference runs at HIGHEST f32 precision; the kernel feeds the MXU bf16
    # operands (per perf review) with f32 accumulation, so allow bf16-roundoff
    # level deviation (~2^-9 relative per matmul across 6 matmuls; BN
    # re-normalizes each stage, keeping it at the percent level).
    if not jnp.allclose(out, ref, atol=5e-2, rtol=5e-2):
        raise AssertionError(f"mismatch vs reference, max abs err = {err}")
    print("KERNEL_OK")
</pallas_src>

<mosaic_0001>
module attributes {stable_mosaic.version = 11 : i64} {
  func.func @lowrank_bottleneck_kernel(%arg0: memref<64x512xf32, #tpu.memory_space<vmem>>, %arg1: memref<8x512xf32, #tpu.memory_space<vmem>>, %arg2: memref<304x128xf32, #tpu.memory_space<vmem>>, %arg3: memref<64x512xf32, #tpu.memory_space<vmem>>) attributes {dimension_semantics = [], scalar_prefetch = 0 : i64, scratch_operands = 0 : i64, tpu.core_type = #tpu.core_type<tc>} {
    %cst = arith.constant 1.000000e+00 : f32
    %0 = vector.broadcast %cst : f32 to vector<512x1xf32>
    %c0 = arith.constant 0 : index
    %c0_0 = arith.constant 0 : index
    %1 = vector.load %arg2[%c0, %c0_0] : memref<304x128xf32, #tpu.memory_space<vmem>>, vector<4x64xf32>
    %2 = arith.truncf %1 : vector<4x64xf32> to vector<4x64xbf16>
    %c0_1 = arith.constant 0 : index
    %c0_2 = arith.constant 0 : index
    %3 = vector.load %arg0[%c0_1, %c0_2] : memref<64x512xf32, #tpu.memory_space<vmem>>, vector<64x512xf32>
    %4 = arith.truncf %3 : vector<64x512xf32> to vector<64x512xbf16>
    %cst_3 = arith.constant dense<0.000000e+00> : vector<4x512xf32>
    %5 = tpu.matmul %2, %4, %cst_3 {dimension_numbers = #tpu.dot_dimension_numbers<[1], [0], [0], [1], [0, 0, 1, 1], [], []>} : vector<4x64xbf16>, vector<64x512xbf16>, vector<4x512xf32> -> vector<4x512xf32>
    %c184 = arith.constant 184 : index
    %c0_4 = arith.constant 0 : index
    %6 = vector.load %arg2[%c184, %c0_4] : memref<304x128xf32, #tpu.memory_space<vmem>>, vector<4x1xf32>
    %c184_5 = arith.constant 184 : index
    %c1 = arith.constant 1 : index
    %7 = vector.load %arg2[%c184_5, %c1] : memref<304x128xf32, #tpu.memory_space<vmem>>, vector<4x1xf32>
    %cst_6 = arith.constant dense<0.000000e+00> : vector<4x1xf32>
    %8 = tpu.matmul %5, %0, %cst_6 {dimension_numbers = #tpu.dot_dimension_numbers<[1], [0], [0], [1], [0, 0, 1, 1], [], []>} : vector<4x512xf32>, vector<512x1xf32>, vector<4x1xf32> -> vector<4x1xf32>
    %cst_7 = arith.constant 0.001953125 : f32
    %9 = vector.broadcast %cst_7 : f32 to vector<4x1xf32>
    %10 = arith.mulf %8, %9 : vector<4x1xf32>
    %11 = arith.mulf %5, %5 : vector<4x512xf32>
    %cst_8 = arith.constant dense<0.000000e+00> : vector<4x1xf32>
    %12 = tpu.matmul %11, %0, %cst_8 {dimension_numbers = #tpu.dot_dimension_numbers<[1], [0], [0], [1], [0, 0, 1, 1], [], []>} : vector<4x512xf32>, vector<512x1xf32>, vector<4x1xf32> -> vector<4x1xf32>
    %cst_9 = arith.constant 0.001953125 : f32
    %13 = vector.broadcast %cst_9 : f32 to vector<4x1xf32>
    %14 = arith.mulf %12, %13 : vector<4x1xf32>
    %15 = arith.mulf %10, %10 : vector<4x1xf32>
    %16 = arith.subf %14, %15 : vector<4x1xf32>
    %cst_10 = arith.constant 0.000000e+00 : f32
    %17 = vector.broadcast %cst_10 : f32 to vector<4x1xf32>
    %18 = arith.maximumf %16, %17 : vector<4x1xf32>
    %cst_11 = arith.constant 9.99999974E-6 : f32
    %19 = vector.broadcast %cst_11 : f32 to vector<4x1xf32>
    %20 = arith.addf %18, %19 : vector<4x1xf32>
    %21 = math.rsqrt %20 : vector<4x1xf32>
    %22 = arith.mulf %6, %21 : vector<4x1xf32>
    %23 = vector.broadcast %22 : vector<4x1xf32> to vector<4x512xf32>
    %24 = arith.mulf %5, %23 : vector<4x512xf32>
    %25 = arith.mulf %10, %22 : vector<4x1xf32>
    %26 = arith.subf %7, %25 : vector<4x1xf32>
    %27 = vector.broadcast %26 : vector<4x1xf32> to vector<4x512xf32>
    %28 = arith.addf %24, %27 : vector<4x512xf32>
    %c8 = arith.constant 8 : index
    %c0_12 = arith.constant 0 : index
    %29 = vector.load %arg2[%c8, %c0_12] : memref<304x128xf32, #tpu.memory_space<vmem>>, vector<16x4xf32>
    %30 = arith.truncf %29 : vector<16x4xf32> to vector<16x4xbf16>
    %31 = arith.truncf %28 : vector<4x512xf32> to vector<4x512xbf16>
    %cst_13 = arith.constant dense<0.000000e+00> : vector<16x512xf32>
    %32 = tpu.matmul %30, %31, %cst_13 {dimension_numbers = #tpu.dot_dimension_numbers<[1], [0], [0], [1], [0, 0, 1, 1], [], []>} : vector<16x4xbf16>, vector<4x512xbf16>, vector<16x512xf32> -> vector<16x512xf32>
    %c192 = arith.constant 192 : index
    %c0_14 = arith.constant 0 : index
    %33 = vector.load %arg2[%c192, %c0_14] : memref<304x128xf32, #tpu.memory_space<vmem>>, vector<16x1xf32>
    %c192_15 = arith.constant 192 : index
    %c1_16 = arith.constant 1 : index
    %34 = vector.load %arg2[%c192_15, %c1_16] : memref<304x128xf32, #tpu.memory_space<vmem>>, vector<16x1xf32>
    %cst_17 = arith.constant dense<0.000000e+00> : vector<16x1xf32>
    %35 = tpu.matmul %32, %0, %cst_17 {dimension_numbers = #tpu.dot_dimension_numbers<[1], [0], [0], [1], [0, 0, 1, 1], [], []>} : vector<16x512xf32>, vector<512x1xf32>, vector<16x1xf32> -> vector<16x1xf32>
    %cst_18 = arith.constant 0.001953125 : f32
    %36 = vector.broadcast %cst_18 : f32 to vector<16x1xf32>
    %37 = arith.mulf %35, %36 : vector<16x1xf32>
    %38 = arith.mulf %32, %32 : vector<16x512xf32>
    %cst_19 = arith.constant dense<0.000000e+00> : vector<16x1xf32>
    %39 = tpu.matmul %38, %0, %cst_19 {dimension_numbers = #tpu.dot_dimension_numbers<[1], [0], [0], [1], [0, 0, 1, 1], [], []>} : vector<16x512xf32>, vector<512x1xf32>, vector<16x1xf32> -> vector<16x1xf32>
    %cst_20 = arith.constant 0.001953125 : f32
    %40 = vector.broadcast %cst_20 : f32 to vector<16x1xf32>
    %41 = arith.mulf %39, %40 : vector<16x1xf32>
    %42 = arith.mulf %37, %37 : vector<16x1xf32>
    %43 = arith.subf %41, %42 : vector<16x1xf32>
    %cst_21 = arith.constant 0.000000e+00 : f32
    %44 = vector.broadcast %cst_21 : f32 to vector<16x1xf32>
    %45 = arith.maximumf %43, %44 : vector<16x1xf32>
    %cst_22 = arith.constant 9.99999974E-6 : f32
    %46 = vector.broadcast %cst_22 : f32 to vector<16x1xf32>
    %47 = arith.addf %45, %46 : vector<16x1xf32>
    %48 = math.rsqrt %47 : vector<16x1xf32>
    %49 = arith.mulf %33, %48 : vector<16x1xf32>
    %50 = vector.broadcast %49 : vector<16x1xf32> to vector<16x512xf32>
    %51 = arith.mulf %32, %50 : vector<16x512xf32>
    %52 = arith.mulf %37, %49 : vector<16x1xf32>
    %53 = arith.subf %34, %52 : vector<16x1xf32>
    %54 = vector.broadcast %53 : vector<16x1xf32> to vector<16x512xf32>
    %55 = arith.addf %51, %54 : vector<16x512xf32>
    %cst_23 = arith.constant 0.000000e+00 : f32
    %56 = vector.broadcast %cst_23 : f32 to vector<16x512xf32>
    %57 = arith.maximumf %55, %56 : vector<16x512xf32>
    %58 = arith.truncf %57 : vector<16x512xf32> to vector<16x512xbf16>
    %c24 = arith.constant 24 : index
    %c0_24 = arith.constant 0 : index
    %59 = vector.load %arg2[%c24, %c0_24] : memref<304x128xf32, #tpu.memory_space<vmem>>, vector<4x16xf32>
    %60 = arith.truncf %59 : vector<4x16xf32> to vector<4x16xbf16>
    %cst_25 = arith.constant dense<0.000000e+00> : vector<4x512xf32>
    %61 = tpu.matmul %60, %58, %cst_25 {dimension_numbers = #tpu.dot_dimension_numbers<[1], [0], [0], [1], [0, 0, 1, 1], [], []>} : vector<4x16xbf16>, vector<16x512xbf16>, vector<4x512xf32> -> vector<4x512xf32>
    %c17_i32 = arith.constant 17 : i32
    %62 = tpu.dynamic_rotate %61 by %c17_i32 dim 1 : vector<4x512xf32>, i32 -> vector<4x512xf32>
    %c0_26 = arith.constant 0 : index
    %c0_27 = arith.constant 0 : index
    %63 = vector.load %arg1[%c0_26, %c0_27] : memref<8x512xf32, #tpu.memory_space<vmem>>, vector<1x512xf32>
    %64 = vector.broadcast %63 : vector<1x512xf32> to vector<4x512xf32>
    %65 = arith.mulf %62, %64 : vector<4x512xf32>
    %c32 = arith.constant 32 : index
    %c0_28 = arith.constant 0 : index
    %66 = vector.load %arg2[%c32, %c0_28] : memref<304x128xf32, #tpu.memory_space<vmem>>, vector<4x16xf32>
    %67 = arith.truncf %66 : vector<4x16xf32> to vector<4x16xbf16>
    %cst_29 = arith.constant dense<0.000000e+00> : vector<4x512xf32>
    %68 = tpu.matmul %67, %58, %cst_29 {dimension_numbers = #tpu.dot_dimension_numbers<[1], [0], [0], [1], [0, 0, 1, 1], [], []>} : vector<4x16xbf16>, vector<16x512xbf16>, vector<4x512xf32> -> vector<4x512xf32>
    %c16_i32 = arith.constant 16 : i32
    %69 = tpu.dynamic_rotate %68 by %c16_i32 dim 1 : vector<4x512xf32>, i32 -> vector<4x512xf32>
    %c1_30 = arith.constant 1 : index
    %c0_31 = arith.constant 0 : index
    %70 = vector.load %arg1[%c1_30, %c0_31] : memref<8x512xf32, #tpu.memory_space<vmem>>, vector<1x512xf32>
    %71 = vector.broadcast %70 : vector<1x512xf32> to vector<4x512xf32>
    %72 = arith.mulf %69, %71 : vector<4x512xf32>
    %73 = arith.addf %65, %72 : vector<4x512xf32>
    %c40 = arith.constant 40 : index
    %c0_32 = arith.constant 0 : index
    %74 = vector.load %arg2[%c40, %c0_32] : memref<304x128xf32, #tpu.memory_space<vmem>>, vector<4x16xf32>
    %75 = arith.truncf %74 : vector<4x16xf32> to vector<4x16xbf16>
    %cst_33 = arith.constant dense<0.000000e+00> : vector<4x512xf32>
    %76 = tpu.matmul %75, %58, %cst_33 {dimension_numbers = #tpu.dot_dimension_numbers<[1], [0], [0], [1], [0, 0, 1, 1], [], []>} : vector<4x16xbf16>, vector<16x512xbf16>, vector<4x512xf32> -> vector<4x512xf32>
    %c15_i32 = arith.constant 15 : i32
    %77 = tpu.dynamic_rotate %76 by %c15_i32 dim 1 : vector<4x512xf32>, i32 -> vector<4x512xf32>
    %c2 = arith.constant 2 : index
    %c0_34 = arith.constant 0 : index
    %78 = vector.load %arg1[%c2, %c0_34] : memref<8x512xf32, #tpu.memory_space<vmem>>, vector<1x512xf32>
    %79 = vector.broadcast %78 : vector<1x512xf32> to vector<4x512xf32>
    %80 = arith.mulf %77, %79 : vector<4x512xf32>
    %81 = arith.addf %73, %80 : vector<4x512xf32>
    %c48 = arith.constant 48 : index
    %c0_35 = arith.constant 0 : index
    %82 = vector.load %arg2[%c48, %c0_35] : memref<304x128xf32, #tpu.memory_space<vmem>>, vector<4x16xf32>
    %83 = arith.truncf %82 : vector<4x16xf32> to vector<4x16xbf16>
    %cst_36 = arith.constant dense<0.000000e+00> : vector<4x512xf32>
    %84 = tpu.matmul %83, %58, %cst_36 {dimension_numbers = #tpu.dot_dimension_numbers<[1], [0], [0], [1], [0, 0, 1, 1], [], []>} : vector<4x16xbf16>, vector<16x512xbf16>, vector<4x512xf32> -> vector<4x512xf32>
    %c1_i32 = arith.constant 1 : i32
    %85 = tpu.dynamic_rotate %84 by %c1_i32 dim 1 : vector<4x512xf32>, i32 -> vector<4x512xf32>
    %c3 = arith.constant 3 : index
    %c0_37 = arith.constant 0 : index
    %86 = vector.load %arg1[%c3, %c0_37] : memref<8x512xf32, #tpu.memory_space<vmem>>, vector<1x512xf32>
    %87 = vector.broadcast %86 : vector<1x512xf32> to vector<4x512xf32>
    %88 = arith.mulf %85, %87 : vector<4x512xf32>
    %89 = arith.addf %81, %88 : vector<4x512xf32>
    %c56 = arith.constant 56 : index
    %c0_38 = arith.constant 0 : index
    %90 = vector.load %arg2[%c56, %c0_38] : memref<304x128xf32, #tpu.memory_space<vmem>>, vector<4x16xf32>
    %91 = arith.truncf %90 : vector<4x16xf32> to vector<4x16xbf16>
    %cst_39 = arith.constant dense<0.000000e+00> : vector<4x512xf32>
    %92 = tpu.matmul %91, %58, %cst_39 {dimension_numbers = #tpu.dot_dimension_numbers<[1], [0], [0], [1], [0, 0, 1, 1], [], []>} : vector<4x16xbf16>, vector<16x512xbf16>, vector<4x512xf32> -> vector<4x512xf32>
    %93 = arith.addf %89, %92 : vector<4x512xf32>
    %c64 = arith.constant 64 : index
    %c0_40 = arith.constant 0 : index
    %94 = vector.load %arg2[%c64, %c0_40] : memref<304x128xf32, #tpu.memory_space<vmem>>, vector<4x16xf32>
    %95 = arith.truncf %94 : vector<4x16xf32> to vector<4x16xbf16>
    %cst_41 = arith.constant dense<0.000000e+00> : vector<4x512xf32>
    %96 = tpu.matmul %95, %58, %cst_41 {dimension_numbers = #tpu.dot_dimension_numbers<[1], [0], [0], [1], [0, 0, 1, 1], [], []>} : vector<4x16xbf16>, vector<16x512xbf16>, vector<4x512xf32> -> vector<4x512xf32>
    %c511_i32 = arith.constant 511 : i32
    %97 = tpu.dynamic_rotate %96 by %c511_i32 dim 1 : vector<4x512xf32>, i32 -> vector<4x512xf32>
    %c4 = arith.constant 4 : index
    %c0_42 = arith.constant 0 : index
    %98 = vector.load %arg1[%c4, %c0_42] : memref<8x512xf32, #tpu.memory_space<vmem>>, vector<1x512xf32>
    %99 = vector.broadcast %98 : vector<1x512xf32> to vector<4x512xf32>
    %100 = arith.mulf %97, %99 : vector<4x512xf32>
    %101 = arith.addf %93, %100 : vector<4x512xf32>
    %c72 = arith.constant 72 : index
    %c0_43 = arith.constant 0 : index
    %102 = vector.load %arg2[%c72, %c0_43] : memref<304x128xf32, #tpu.memory_space<vmem>>, vector<4x16xf32>
    %103 = arith.truncf %102 : vector<4x16xf32> to vector<4x16xbf16>
    %cst_44 = arith.constant dense<0.000000e+00> : vector<4x512xf32>
    %104 = tpu.matmul %103, %58, %cst_44 {dimension_numbers = #tpu.dot_dimension_numbers<[1], [0], [0], [1], [0, 0, 1, 1], [], []>} : vector<4x16xbf16>, vector<16x512xbf16>, vector<4x512xf32> -> vector<4x512xf32>
    %c497_i32 = arith.constant 497 : i32
    %105 = tpu.dynamic_rotate %104 by %c497_i32 dim 1 : vector<4x512xf32>, i32 -> vector<4x512xf32>
    %c5 = arith.constant 5 : index
    %c0_45 = arith.constant 0 : index
    %106 = vector.load %arg1[%c5, %c0_45] : memref<8x512xf32, #tpu.memory_space<vmem>>, vector<1x512xf32>
    %107 = vector.broadcast %106 : vector<1x512xf32> to vector<4x512xf32>
    %108 = arith.mulf %105, %107 : vector<4x512xf32>
    %109 = arith.addf %101, %108 : vector<4x512xf32>
    %c80 = arith.constant 80 : index
    %c0_46 = arith.constant 0 : index
    %110 = vector.load %arg2[%c80, %c0_46] : memref<304x128xf32, #tpu.memory_space<vmem>>, vector<4x16xf32>
    %111 = arith.truncf %110 : vector<4x16xf32> to vector<4x16xbf16>
    %cst_47 = arith.constant dense<0.000000e+00> : vector<4x512xf32>
    %112 = tpu.matmul %111, %58, %cst_47 {dimension_numbers = #tpu.dot_dimension_numbers<[1], [0], [0], [1], [0, 0, 1, 1], [], []>} : vector<4x16xbf16>, vector<16x512xbf16>, vector<4x512xf32> -> vector<4x512xf32>
    %c496_i32 = arith.constant 496 : i32
    %113 = tpu.dynamic_rotate %112 by %c496_i32 dim 1 : vector<4x512xf32>, i32 -> vector<4x512xf32>
    %c6 = arith.constant 6 : index
    %c0_48 = arith.constant 0 : index
    %114 = vector.load %arg1[%c6, %c0_48] : memref<8x512xf32, #tpu.memory_space<vmem>>, vector<1x512xf32>
    %115 = vector.broadcast %114 : vector<1x512xf32> to vector<4x512xf32>
    %116 = arith.mulf %113, %115 : vector<4x512xf32>
    %117 = arith.addf %109, %116 : vector<4x512xf32>
    %c88 = arith.constant 88 : index
    %c0_49 = arith.constant 0 : index
    %118 = vector.load %arg2[%c88, %c0_49] : memref<304x128xf32, #tpu.memory_space<vmem>>, vector<4x16xf32>
    %119 = arith.truncf %118 : vector<4x16xf32> to vector<4x16xbf16>
    %cst_50 = arith.constant dense<0.000000e+00> : vector<4x512xf32>
    %120 = tpu.matmul %119, %58, %cst_50 {dimension_numbers = #tpu.dot_dimension_numbers<[1], [0], [0], [1], [0, 0, 1, 1], [], []>} : vector<4x16xbf16>, vector<16x512xbf16>, vector<4x512xf32> -> vector<4x512xf32>
    %c495_i32 = arith.constant 495 : i32
    %121 = tpu.dynamic_rotate %120 by %c495_i32 dim 1 : vector<4x512xf32>, i32 -> vector<4x512xf32>
    %c7 = arith.constant 7 : index
    %c0_51 = arith.constant 0 : index
    %122 = vector.load %arg1[%c7, %c0_51] : memref<8x512xf32, #tpu.memory_space<vmem>>, vector<1x512xf32>
    %123 = vector.broadcast %122 : vector<1x512xf32> to vector<4x512xf32>
    %124 = arith.mulf %121, %123 : vector<4x512xf32>
    %125 = arith.addf %117, %124 : vector<4x512xf32>
    %c208 = arith.constant 208 : index
    %c0_52 = arith.constant 0 : index
    %126 = vector.load %arg2[%c208, %c0_52] : memref<304x128xf32, #tpu.memory_space<vmem>>, vector<4x1xf32>
    %c208_53 = arith.constant 208 : index
    %c1_54 = arith.constant 1 : index
    %127 = vector.load %arg2[%c208_53, %c1_54] : memref<304x128xf32, #tpu.memory_space<vmem>>, vector<4x1xf32>
    %cst_55 = arith.constant dense<0.000000e+00> : vector<4x1xf32>
    %128 = tpu.matmul %125, %0, %cst_55 {dimension_numbers = #tpu.dot_dimension_numbers<[1], [0], [0], [1], [0, 0, 1, 1], [], []>} : vector<4x512xf32>, vector<512x1xf32>, vector<4x1xf32> -> vector<4x1xf32>
    %cst_56 = arith.constant 0.001953125 : f32
    %129 = vector.broadcast %cst_56 : f32 to vector<4x1xf32>
    %130 = arith.mulf %128, %129 : vector<4x1xf32>
    %131 = arith.mulf %125, %125 : vector<4x512xf32>
    %cst_57 = arith.constant dense<0.000000e+00> : vector<4x1xf32>
    %132 = tpu.matmul %131, %0, %cst_57 {dimension_numbers = #tpu.dot_dimension_numbers<[1], [0], [0], [1], [0, 0, 1, 1], [], []>} : vector<4x512xf32>, vector<512x1xf32>, vector<4x1xf32> -> vector<4x1xf32>
    %cst_58 = arith.constant 0.001953125 : f32
    %133 = vector.broadcast %cst_58 : f32 to vector<4x1xf32>
    %134 = arith.mulf %132, %133 : vector<4x1xf32>
    %135 = arith.mulf %130, %130 : vector<4x1xf32>
    %136 = arith.subf %134, %135 : vector<4x1xf32>
    %cst_59 = arith.constant 0.000000e+00 : f32
    %137 = vector.broadcast %cst_59 : f32 to vector<4x1xf32>
    %138 = arith.maximumf %136, %137 : vector<4x1xf32>
    %cst_60 = arith.constant 9.99999974E-6 : f32
    %139 = vector.broadcast %cst_60 : f32 to vector<4x1xf32>
    %140 = arith.addf %138, %139 : vector<4x1xf32>
    %141 = math.rsqrt %140 : vector<4x1xf32>
    %142 = arith.mulf %126, %141 : vector<4x1xf32>
    %143 = vector.broadcast %142 : vector<4x1xf32> to vector<4x512xf32>
    %144 = arith.mulf %125, %143 : vector<4x512xf32>
    %145 = arith.mulf %130, %142 : vector<4x1xf32>
    %146 = arith.subf %127, %145 : vector<4x1xf32>
    %147 = vector.broadcast %146 : vector<4x1xf32> to vector<4x512xf32>
    %148 = arith.addf %144, %147 : vector<4x512xf32>
    %c96 = arith.constant 96 : index
    %c0_61 = arith.constant 0 : index
    %149 = vector.load %arg2[%c96, %c0_61] : memref<304x128xf32, #tpu.memory_space<vmem>>, vector<16x4xf32>
    %150 = arith.truncf %149 : vector<16x4xf32> to vector<16x4xbf16>
    %151 = arith.truncf %148 : vector<4x512xf32> to vector<4x512xbf16>
    %cst_62 = arith.constant dense<0.000000e+00> : vector<16x512xf32>
    %152 = tpu.matmul %150, %151, %cst_62 {dimension_numbers = #tpu.dot_dimension_numbers<[1], [0], [0], [1], [0, 0, 1, 1], [], []>} : vector<16x4xbf16>, vector<4x512xbf16>, vector<16x512xf32> -> vector<16x512xf32>
    %c216 = arith.constant 216 : index
    %c0_63 = arith.constant 0 : index
    %153 = vector.load %arg2[%c216, %c0_63] : memref<304x128xf32, #tpu.memory_space<vmem>>, vector<16x1xf32>
    %c216_64 = arith.constant 216 : index
    %c1_65 = arith.constant 1 : index
    %154 = vector.load %arg2[%c216_64, %c1_65] : memref<304x128xf32, #tpu.memory_space<vmem>>, vector<16x1xf32>
    %cst_66 = arith.constant dense<0.000000e+00> : vector<16x1xf32>
    %155 = tpu.matmul %152, %0, %cst_66 {dimension_numbers = #tpu.dot_dimension_numbers<[1], [0], [0], [1], [0, 0, 1, 1], [], []>} : vector<16x512xf32>, vector<512x1xf32>, vector<16x1xf32> -> vector<16x1xf32>
    %cst_67 = arith.constant 0.001953125 : f32
    %156 = vector.broadcast %cst_67 : f32 to vector<16x1xf32>
    %157 = arith.mulf %155, %156 : vector<16x1xf32>
    %158 = arith.mulf %152, %152 : vector<16x512xf32>
    %cst_68 = arith.constant dense<0.000000e+00> : vector<16x1xf32>
    %159 = tpu.matmul %158, %0, %cst_68 {dimension_numbers = #tpu.dot_dimension_numbers<[1], [0], [0], [1], [0, 0, 1, 1], [], []>} : vector<16x512xf32>, vector<512x1xf32>, vector<16x1xf32> -> vector<16x1xf32>
    %cst_69 = arith.constant 0.001953125 : f32
    %160 = vector.broadcast %cst_69 : f32 to vector<16x1xf32>
    %161 = arith.mulf %159, %160 : vector<16x1xf32>
    %162 = arith.mulf %157, %157 : vector<16x1xf32>
    %163 = arith.subf %161, %162 : vector<16x1xf32>
    %cst_70 = arith.constant 0.000000e+00 : f32
    %164 = vector.broadcast %cst_70 : f32 to vector<16x1xf32>
    %165 = arith.maximumf %163, %164 : vector<16x1xf32>
    %cst_71 = arith.constant 9.99999974E-6 : f32
    %166 = vector.broadcast %cst_71 : f32 to vector<16x1xf32>
    %167 = arith.addf %165, %166 : vector<16x1xf32>
    %168 = math.rsqrt %167 : vector<16x1xf32>
    %169 = arith.mulf %153, %168 : vector<16x1xf32>
    %170 = vector.broadcast %169 : vector<16x1xf32> to vector<16x512xf32>
    %171 = arith.mulf %152, %170 : vector<16x512xf32>
    %172 = arith.mulf %157, %169 : vector<16x1xf32>
    %173 = arith.subf %154, %172 : vector<16x1xf32>
    %174 = vector.broadcast %173 : vector<16x1xf32> to vector<16x512xf32>
    %175 = arith.addf %171, %174 : vector<16x512xf32>
    %cst_72 = arith.constant 0.000000e+00 : f32
    %176 = vector.broadcast %cst_72 : f32 to vector<16x512xf32>
    %177 = arith.maximumf %175, %176 : vector<16x512xf32>
    %c112 = arith.constant 112 : index
    %c0_73 = arith.constant 0 : index
    %178 = vector.load %arg2[%c112, %c0_73] : memref<304x128xf32, #tpu.memory_space<vmem>>, vector<4x16xf32>
    %179 = arith.truncf %178 : vector<4x16xf32> to vector<4x16xbf16>
    %180 = arith.truncf %177 : vector<16x512xf32> to vector<16x512xbf16>
    %cst_74 = arith.constant dense<0.000000e+00> : vector<4x512xf32>
    %181 = tpu.matmul %179, %180, %cst_74 {dimension_numbers = #tpu.dot_dimension_numbers<[1], [0], [0], [1], [0, 0, 1, 1], [], []>} : vector<4x16xbf16>, vector<16x512xbf16>, vector<4x512xf32> -> vector<4x512xf32>
    %c232 = arith.constant 232 : index
    %c0_75 = arith.constant 0 : index
    %182 = vector.load %arg2[%c232, %c0_75] : memref<304x128xf32, #tpu.memory_space<vmem>>, vector<4x1xf32>
    %c232_76 = arith.constant 232 : index
    %c1_77 = arith.constant 1 : index
    %183 = vector.load %arg2[%c232_76, %c1_77] : memref<304x128xf32, #tpu.memory_space<vmem>>, vector<4x1xf32>
    %cst_78 = arith.constant dense<0.000000e+00> : vector<4x1xf32>
    %184 = tpu.matmul %181, %0, %cst_78 {dimension_numbers = #tpu.dot_dimension_numbers<[1], [0], [0], [1], [0, 0, 1, 1], [], []>} : vector<4x512xf32>, vector<512x1xf32>, vector<4x1xf32> -> vector<4x1xf32>
    %cst_79 = arith.constant 0.001953125 : f32
    %185 = vector.broadcast %cst_79 : f32 to vector<4x1xf32>
    %186 = arith.mulf %184, %185 : vector<4x1xf32>
    %187 = arith.mulf %181, %181 : vector<4x512xf32>
    %cst_80 = arith.constant dense<0.000000e+00> : vector<4x1xf32>
    %188 = tpu.matmul %187, %0, %cst_80 {dimension_numbers = #tpu.dot_dimension_numbers<[1], [0], [0], [1], [0, 0, 1, 1], [], []>} : vector<4x512xf32>, vector<512x1xf32>, vector<4x1xf32> -> vector<4x1xf32>
    %cst_81 = arith.constant 0.001953125 : f32
    %189 = vector.broadcast %cst_81 : f32 to vector<4x1xf32>
    %190 = arith.mulf %188, %189 : vector<4x1xf32>
    %191 = arith.mulf %186, %186 : vector<4x1xf32>
    %192 = arith.subf %190, %191 : vector<4x1xf32>
    %cst_82 = arith.constant 0.000000e+00 : f32
    %193 = vector.broadcast %cst_82 : f32 to vector<4x1xf32>
    %194 = arith.maximumf %192, %193 : vector<4x1xf32>
    %cst_83 = arith.constant 9.99999974E-6 : f32
    %195 = vector.broadcast %cst_83 : f32 to vector<4x1xf32>
    %196 = arith.addf %194, %195 : vector<4x1xf32>
    %197 = math.rsqrt %196 : vector<4x1xf32>
    %198 = arith.mulf %182, %197 : vector<4x1xf32>
    %199 = vector.broadcast %198 : vector<4x1xf32> to vector<4x512xf32>
    %200 = arith.mulf %181, %199 : vector<4x512xf32>
    %201 = arith.mulf %186, %198 : vector<4x1xf32>
    %202 = arith.subf %183, %201 : vector<4x1xf32>
    %203 = vector.broadcast %202 : vector<4x1xf32> to vector<4x512xf32>
    %204 = arith.addf %200, %203 : vector<4x512xf32>
    %c120 = arith.constant 120 : index
    %c0_84 = arith.constant 0 : index
    %205 = vector.load %arg2[%c120, %c0_84] : memref<304x128xf32, #tpu.memory_space<vmem>>, vector<64x4xf32>
    %206 = arith.truncf %205 : vector<64x4xf32> to vector<64x4xbf16>
    %207 = arith.truncf %204 : vector<4x512xf32> to vector<4x512xbf16>
    %cst_85 = arith.constant dense<0.000000e+00> : vector<64x512xf32>
    %208 = tpu.matmul %206, %207, %cst_85 {dimension_numbers = #tpu.dot_dimension_numbers<[1], [0], [0], [1], [0, 0, 1, 1], [], []>} : vector<64x4xbf16>, vector<4x512xbf16>, vector<64x512xf32> -> vector<64x512xf32>
    %c240 = arith.constant 240 : index
    %c0_86 = arith.constant 0 : index
    %209 = vector.load %arg2[%c240, %c0_86] : memref<304x128xf32, #tpu.memory_space<vmem>>, vector<64x1xf32>
    %c240_87 = arith.constant 240 : index
    %c1_88 = arith.constant 1 : index
    %210 = vector.load %arg2[%c240_87, %c1_88] : memref<304x128xf32, #tpu.memory_space<vmem>>, vector<64x1xf32>
    %cst_89 = arith.constant dense<0.000000e+00> : vector<64x1xf32>
    %211 = tpu.matmul %208, %0, %cst_89 {dimension_numbers = #tpu.dot_dimension_numbers<[1], [0], [0], [1], [0, 0, 1, 1], [], []>} : vector<64x512xf32>, vector<512x1xf32>, vector<64x1xf32> -> vector<64x1xf32>
    %cst_90 = arith.constant 0.001953125 : f32
    %212 = vector.broadcast %cst_90 : f32 to vector<64x1xf32>
    %213 = arith.mulf %211, %212 : vector<64x1xf32>
    %214 = arith.mulf %208, %208 : vector<64x512xf32>
    %cst_91 = arith.constant dense<0.000000e+00> : vector<64x1xf32>
    %215 = tpu.matmul %214, %0, %cst_91 {dimension_numbers = #tpu.dot_dimension_numbers<[1], [0], [0], [1], [0, 0, 1, 1], [], []>} : vector<64x512xf32>, vector<512x1xf32>, vector<64x1xf32> -> vector<64x1xf32>
    %cst_92 = arith.constant 0.001953125 : f32
    %216 = vector.broadcast %cst_92 : f32 to vector<64x1xf32>
    %217 = arith.mulf %215, %216 : vector<64x1xf32>
    %218 = arith.mulf %213, %213 : vector<64x1xf32>
    %219 = arith.subf %217, %218 : vector<64x1xf32>
    %cst_93 = arith.constant 0.000000e+00 : f32
    %220 = vector.broadcast %cst_93 : f32 to vector<64x1xf32>
    %221 = arith.maximumf %219, %220 : vector<64x1xf32>
    %cst_94 = arith.constant 9.99999974E-6 : f32
    %222 = vector.broadcast %cst_94 : f32 to vector<64x1xf32>
    %223 = arith.addf %221, %222 : vector<64x1xf32>
    %224 = math.rsqrt %223 : vector<64x1xf32>
    %225 = arith.mulf %209, %224 : vector<64x1xf32>
    %226 = vector.broadcast %225 : vector<64x1xf32> to vector<64x512xf32>
    %227 = arith.mulf %208, %226 : vector<64x512xf32>
    %228 = arith.mulf %213, %225 : vector<64x1xf32>
    %229 = arith.subf %210, %228 : vector<64x1xf32>
    %230 = vector.broadcast %229 : vector<64x1xf32> to vector<64x512xf32>
    %231 = arith.addf %227, %230 : vector<64x512xf32>
    %c0_95 = arith.constant 0 : index
    %c0_96 = arith.constant 0 : index
    %232 = vector.load %arg0[%c0_95, %c0_96] : memref<64x512xf32, #tpu.memory_space<vmem>>, vector<64x512xf32>
    %233 = arith.addf %231, %232 : vector<64x512xf32>
    %cst_97 = arith.constant 0.000000e+00 : f32
    %234 = vector.broadcast %cst_97 : f32 to vector<64x512xf32>
    %235 = arith.maximumf %233, %234 : vector<64x512xf32>
    %c0_98 = arith.constant 0 : index
    %c0_99 = arith.constant 0 : index
    %236 = vector.load %arg3[%c0_98, %c0_99] : memref<64x512xf32, #tpu.memory_space<vmem>>, vector<64x512xf32>
    tpu.vector_store %arg3[%c0_98, %c0_99], %235 {strides = array<i32>} : memref<64x512xf32, #tpu.memory_space<vmem>>, vector<64x512xf32>,
    return
  }
}

</mosaic_0001>

<bundles_post_ra>
// kernel: lowrank_bottleneck_pallas.1
= control target key start
LH: loop header
LB: loop body
LE: loop exit
PB: predicated region body
PF: predicated region fallthrough
CT: control target
= control target key end

     0   :  { %v7520_v3 = vmov 0   ;;  %vm65_vm0 = vcmask 523264   ;;  %v7522_v51 = vmov 1.0|1.0   ;;  %s5786_s26 = smov 1   ;;  %vm479_vm1 = vcmask 1041408   ;;  %s7514_s0 = inlined_call_operand.vmem [shape: f32[64,512], index: 0, kind: input, shape index: {}]   ;;  %s7515_s2 = inlined_call_operand.vmem [shape: f32[304,128], index: 2, kind: input, shape index: {}]   ;;  %s7516_s1 = inlined_call_operand.vmem [shape: f32[8,512], index: 1, kind: input, shape index: {}]   ;;  %s7517_s3 = inlined_call_operand.vmem [shape: f32[64,512], index: 3, kind: output, shape index: {}]  }
   0x1   :  { %v18_v0 = vld [vmem:[%s7514_s0 + $0x8] sm:$0xff]  ;;  %v20_v2 = vld [vmem:[%s7514_s0 + $0x18] sm:$0xff]  ;;  %101 = vmatprep.mubr.bf16.mxu0 %v7520_v3  ;;  %142 = vmatprep.mubr.bf16.mxu1 %v7520_v3  ;;  %v17_v6 = vld [vmem:[%s7514_s0] sm:$0xff]  ;;  %vm475_vm2 = vcmask 31744   ;;  %vm966_vm3 = vcmask 130048   ;;  %s5787_s27 = smov 17  }
   0x2   :  { %v22_v1 = vld [vmem:[%s7514_s0 + $0x28] sm:$0xff]  ;;  %v24_v5 = vld [vmem:[%s7514_s0 + $0x38] sm:$0xff]  ;;  %v21_v7 = vld [vmem:[%s7514_s0 + $0x20] sm:$0xff]  ;;  %5708 = vset.pattern.permute.xlu0 %v7520_v3  ;;  %s5788_s28 = smov 16   ;;  %s5789_s29 = smov 15  }
   0x3   :  { %v50_v4 = vpack.c.bf16 %v22_v1, %v18_v0  ;;  %v52_v8 = vpack.c.bf16 %v24_v5, %v20_v2  ;;  %v49_v9 = vpack.c.bf16 %v21_v7, %v17_v6  ;;  %v19_v10 = vld [vmem:[%s7514_s0 + $0x10] sm:$0xff]  ;;  %v26_v12 = vld [vmem:[%s7514_s0 + $0x48] sm:$0xff]  ;;  %v28_v15 = vld [vmem:[%s7514_s0 + $0x58] sm:$0xff]  ;;  %s5790_s30 = smov 127   ;;  %s5791_s4 = smov 113  }
   0x4   :  { %v23_v11 = vld [vmem:[%s7514_s0 + $0x30] sm:$0xff]  ;;  %v30_v14 = vld [vmem:[%s7514_s0 + $0x68] sm:$0xff]  ;;  %v32_v16 = vld [vmem:[%s7514_s0 + $0x78] sm:$0xff]  ;;  %s5792_s5 = smov 112   ;;  %s5793_s6 = smov 111  }
   0x5   :  { %69 = vmatprep.subr.bf16.mxu0 %v50_v4  ;;  %v51_v13 = vpack.c.bf16 %v23_v11, %v19_v10  ;;  %110 = vmatprep.subr.bf16.mxu1 %v52_v8  ;;  %v54_v17 = vpack.c.bf16 %v30_v14, %v26_v12  ;;  %v56_v18 = vpack.c.bf16 %v32_v16, %v28_v15  ;;  %v25_v19 = vld [vmem:[%s7514_s0 + $0x40] sm:$0xff]  ;;  %v27_v21 = vld [vmem:[%s7514_s0 + $0x50] sm:$0xff]  ;;  %v34_v24 = vld [vmem:[%s7514_s0 + $0x88] sm:$0xff] }
   0x6   :  { %70 = vmatpush1.bf16.msra.mxu0 %v49_v9  ;;  %v29_v20 = vld [vmem:[%s7514_s0 + $0x60] sm:$0xff]  ;;  %v31_v23 = vld [vmem:[%s7514_s0 + $0x70] sm:$0xff]  ;;  %v38_v25 = vld [vmem:[%s7514_s0 + $0xa8] sm:$0xff] }
   0x7   :  { %111 = vmatpush1.bf16.msra.mxu1 %v51_v13  ;;  %v53_v22 = vpack.c.bf16 %v29_v20, %v25_v19  ;;  %71 = vmatprep.subr.bf16.mxu0 %v54_v17  ;;  %v55_v26 = vpack.c.bf16 %v31_v23, %v27_v21  ;;  %v58_v27 = vpack.c.bf16 %v38_v25, %v34_v24  ;;  %v36_v28 = vld [vmem:[%s7514_s0 + $0x98] sm:$0xff]  ;;  %v33_v30 = vld [vmem:[%s7514_s0 + $0x80] sm:$0xff]  ;;  %v35_v33 = vld [vmem:[%s7514_s0 + $0x90] sm:$0xff]  ;;  %v7518_v21 = vmov 1  }
   0x8   :  { %112 = vmatprep.subr.bf16.mxu1 %v56_v18  ;;  %v40_v29 = vld [vmem:[%s7514_s0 + $0xb8] sm:$0xff]  ;;  %v37_v32 = vld [vmem:[%s7514_s0 + $0xa0] sm:$0xff]  ;;  %v39_v34 = vld [vmem:[%s7514_s0 + $0xb0] sm:$0xff]  ;;  %5709 = vset.pattern.permute.xlu1 %v7518_v21 }
   0x9   :  { %v60_v31 = vpack.c.bf16 %v40_v29, %v36_v28  ;;  %v57_v35 = vpack.c.bf16 %v37_v32, %v33_v30  ;;  %v42_v36 = vld [vmem:[%s7514_s0 + $0xc8] sm:$0xff]  ;;  %v44_v38 = vld [vmem:[%s7514_s0 + $0xd8] sm:$0xff]  ;;  %v59_v39 = vpack.c.bf16 %v39_v34, %v35_v33  ;;  %v41_v42 = vld [vmem:[%s7514_s0 + $0xc0] sm:$0xff] }
   0xa   :  { %72 = vmatpush1.bf16.msra.mxu0 %v53_v22  ;;  %v46_v37 = vld [vmem:[%s7514_s0 + $0xe8] sm:$0xff]  ;;  %v48_v41 = vld [vmem:[%s7514_s0 + $0xf8] sm:$0xff]  ;;  %v45_v43 = vld [vmem:[%s7514_s0 + $0xe0] sm:$0xff] }
   0xb   :  { %113 = vmatpush1.bf16.msra.mxu1 %v55_v26  ;;  %73 = vmatprep.subr.bf16.mxu0 %v58_v27  ;;  %v62_v40 = vpack.c.bf16 %v46_v37, %v42_v36  ;;  %v64_v44 = vpack.c.bf16 %v48_v41, %v44_v38  ;;  %v43_v45 = vld [vmem:[%s7514_s0 + $0xd0] sm:$0xff]  ;;  %v61_v47 = vpack.c.bf16 %v45_v43, %v41_v42  ;;  %v15_v48 = vld [vmem:[%s7515_s2] sm:$0xf]  ;;  %v151_v22 = vld [vmem:[%s7515_s2 + $0xb8] sm:$0xf] }
   0xc   :  { %114 = vmatprep.subr.bf16.mxu1 %v60_v31  ;;  %v47_v46 = vld [vmem:[%s7514_s0 + $0xf0] sm:$0xff]  ;;  %v16_v50 = vpack.c.bf16 %v15_v48, %v15_v48  ;;  %v468_v38 = vld [vmem:[%s7515_s2 + $0x8] sm:$0xff] }
   0xd   :  { %v63_v49 = vpack.c.bf16 %v47_v46, %v43_v45 }
   0xe   :  { %74 = vmatpush1.bf16.msra.mxu0 %v57_v35 }
   0xf   :  { %115 = vmatpush1.bf16.msra.mxu1 %v59_v39  ;;  %75 = vmatprep.subr.bf16.mxu0 %v62_v40  ;;  %v469_v39 = vld [vmem:[%s7515_s2 + $0x10] sm:$0xff] }
  0x10   :  { %116 = vmatprep.subr.bf16.mxu1 %v64_v44  ;;  %v470_v46 = vpack.c.bf16 %v469_v39, %v468_v38 }
  0x12   :  { %76 = vmatpush1.bf16.msra.mxu0 %v61_v47 }
  0x13   :  { %117 = vmatpush1.bf16.msra.mxu1 %v63_v49  ;;  %5313 = vmatprep.subr.bf16.mxu0 %v7522_v51 }
  0x14   :  { %5329 = vmatprep.subr.bf16.mxu1 %v7522_v51 }
  0x15   :  { %4318 = vmatmul.mubr.msk.bf16.vlgmr.msra.gmra.mrb[0].mxu0 %vm65_vm0, %v16_v50 }
  0x16   :  { %4319 = vmatmul.mubr.msk.bf16.vlgmr.msra.gmra.mrb[0].mxu1 %vm65_vm0, %v16_v50  ;;  %5314 = vmatpush3.bf16.msra.mxu0 %v7522_v51 }
  0x17   :  { %5330 = vmatpush3.bf16.msra.mxu1 %v7522_v51  ;;  %5315 = vmatprep.subr.bf16.mxu0 %v7522_v51 }
  0x18   :  { %5331 = vmatprep.subr.bf16.mxu1 %v7522_v51 }
  0x1a   :  { %5316 = vmatpush3.bf16.msra.mxu0 %v7522_v51 }
  0x1b   :  { %5332 = vmatpush3.bf16.msra.mxu1 %v7522_v51  ;;  %5317 = vmatprep.subr.bf16.mxu0 %v7522_v51 }
  0x1c   :  { %5333 = vmatprep.subr.bf16.mxu1 %v7522_v51 }
  0x1e   :  { %5318 = vmatpush3.bf16.msra.mxu0 %v7522_v51 }
  0x1f   :  { %5334 = vmatpush3.bf16.msra.mxu1 %v7522_v51  ;;  %5319 = vmatprep.subr.bf16.mxu0 %v7522_v51 }
  0x20   :  { %5335 = vmatprep.subr.bf16.mxu1 %v7522_v51 }
  0x22   :  { %5320 = vmatpush3.bf16.msra.mxu0 %v7522_v51 }
  0x23   :  { %5336 = vmatpush3.bf16.msra.mxu1 %v7522_v51  ;;  %5321 = vmatprep.subr.bf16.mxu0 %v7522_v51 }
  0x24   :  { %5337 = vmatprep.subr.bf16.mxu1 %v7522_v51 }
  0x26   :  { %5322 = vmatpush3.bf16.msra.mxu0 %v7522_v51 }
  0x27   :  { %5338 = vmatpush3.bf16.msra.mxu1 %v7522_v51  ;;  %5323 = vmatprep.subr.bf16.mxu0 %v7522_v51 }
  0x28   :  { %5339 = vmatprep.subr.bf16.mxu1 %v7522_v51 }
  0x2a   :  { %5324 = vmatpush3.bf16.msra.mxu0 %v7522_v51 }
  0x2b   :  { %5340 = vmatpush3.bf16.msra.mxu1 %v7522_v51  ;;  %5325 = vmatprep.subr.bf16.mxu0 %v7522_v51 }
  0x2c   :  { %5341 = vmatprep.subr.bf16.mxu1 %v7522_v51 }
  0x2e   :  { %5326 = vmatpush3.bf16.msra.mxu0 %v7522_v51 }
  0x2f   :  { %5342 = vmatpush3.bf16.msra.mxu1 %v7522_v51  ;;  %5327 = vmatprep.subr.bf16.mxu0 %v7522_v51 }
  0x30   :  { %5343 = vmatprep.subr.bf16.mxu1 %v7522_v51 }
  0x32   :  { %5328 = vmatpush3.bf16.msra.mxu0 %v7522_v51 }
  0x33   :  { %5344 = vmatpush3.bf16.msra.mxu1 %v7522_v51  ;;  %5345 = vmatprep.subr.bf16.mxu0 %v7522_v51 }
  0x34   :  { %5361 = vmatprep.subr.bf16.mxu1 %v7522_v51 }
  0xe8   :  { %v5950_v52 = vpop.f32.mrb[0].mxu0 }
  0xe9   :  { %v5952_v53 = vpop.f32.mrb[0].mxu1  ;;  %v5954_v54 = vpop.f32.mrb[1].mxu0  ;;  %v293_v62 = vmul.f32 %v5950_v52, %v5950_v52 }
  0xea   :  { %v294_v55 = vmul.f32 %v5954_v54, %v5954_v54  ;;  %v5958_v56 = vpop.f32.mrb[1].mxu1  ;;  %v107_v57 = vpop.f32.mrb[2].mxu0  ;;  %216 = vmatprep.mubr.f32.mxu0 %v5954_v54  ;;  %v295_v63 = vmul.f32 %v5952_v53, %v5952_v53 }
  0xeb   :  { %v296_v58 = vmul.f32 %v5958_v56, %v5958_v56  ;;  %v148_v59 = vpop.f32.mrb[2].mxu1  ;;  %286 = vmatprep.mubr.f32.mxu1 %v5958_v56  ;;  %v108_v60 = vpop.f32.mrb[3].mxu0  ;;  %217 = vmatmul.mubr.f32.vlgmr.msra.gmra.mrb[4].mxu0 %v5950_v52 }
  0xec   :  { %v149_v61 = vpop.f32.mrb[3].mxu1  ;;  %287 = vmatmul.mubr.f32.vlgmr.msra.gmra.mrb[4].mxu1 %v5952_v53  ;;  %5346 = vmatpush3.bf16.msra.mxu0 %v7522_v51 }
  0xed   :  { %5362 = vmatpush3.bf16.msra.mxu1 %v7522_v51  ;;  %361 = vmatprep.mubr.f32.mxu0 %v294_v55 }
  0xee   :  { %431 = vmatprep.mubr.f32.mxu1 %v296_v58  ;;  %5347 = vmatprep.subr.bf16.mxu0 %v7522_v51 }
  0xef   :  { %5363 = vmatprep.subr.bf16.mxu1 %v7522_v51 }
  0xf0   :  { %5348 = vmatpush3.bf16.msra.mxu0 %v7522_v51 }
  0xf1   :  { %5364 = vmatpush3.bf16.msra.mxu1 %v7522_v51  ;;  %5349 = vmatprep.subr.bf16.mxu0 %v7522_v51 }
  0xf2   :  { %5365 = vmatprep.subr.bf16.mxu1 %v7522_v51 }
  0xf4   :  { %5350 = vmatpush3.bf16.msra.mxu0 %v7522_v51 }
  0xf5   :  { %5366 = vmatpush3.bf16.msra.mxu1 %v7522_v51  ;;  %5351 = vmatprep.subr.bf16.mxu0 %v7522_v51 }
  0xf6   :  { %5367 = vmatprep.subr.bf16.mxu1 %v7522_v51 }
  0xf8   :  { %5352 = vmatpush3.bf16.msra.mxu0 %v7522_v51 }
  0xf9   :  { %5368 = vmatpush3.bf16.msra.mxu1 %v7522_v51  ;;  %5353 = vmatprep.subr.bf16.mxu0 %v7522_v51 }
  0xfa   :  { %5369 = vmatprep.subr.bf16.mxu1 %v7522_v51 }
  0xfc   :  { %5354 = vmatpush3.bf16.msra.mxu0 %v7522_v51 }
  0xfd   :  { %5370 = vmatpush3.bf16.msra.mxu1 %v7522_v51  ;;  %5355 = vmatprep.subr.bf16.mxu0 %v7522_v51 }
  0xfe   :  { %5371 = vmatprep.subr.bf16.mxu1 %v7522_v51 }
 0x100   :  { %5356 = vmatpush3.bf16.msra.mxu0 %v7522_v51 }
 0x101   :  { %5372 = vmatpush3.bf16.msra.mxu1 %v7522_v51  ;;  %5357 = vmatprep.subr.bf16.mxu0 %v7522_v51 }
 0x102   :  { %5373 = vmatprep.subr.bf16.mxu1 %v7522_v51 }
 0x104   :  { %5358 = vmatpush3.bf16.msra.mxu0 %v7522_v51 }
 0x105   :  { %5374 = vmatpush3.bf16.msra.mxu1 %v7522_v51  ;;  %5359 = vmatprep.subr.bf16.mxu0 %v7522_v51 }
 0x106   :  { %5375 = vmatprep.subr.bf16.mxu1 %v7522_v51 }
 0x108   :  { %5360 = vmatpush3.bf16.msra.mxu0 %v7522_v51 }
 0x109   :  { %5376 = vmatpush3.bf16.msra.mxu1 %v7522_v51 }
 0x10b   :  { %362 = vmatmul.mubr.f32.vlgmr.msra.gmra.mrb[6].mxu0 %v293_v62 }
 0x10c   :  { %432 = vmatmul.mubr.f32.vlgmr.msra.gmra.mrb[6].mxu1 %v295_v63  ;;  %524 = vmatprep.mubr.bf16.mxu0 %v7520_v3 }
 0x10d   :  { %567 = vmatprep.mubr.bf16.mxu1 %v7520_v3 }
 0x1be   :  { %v4397_v0 = vpop.f32.mrb[4].mxu0 }
 0x1bf   :  { %v4432_v1 = vpop.f32.mrb[4].mxu1  ;;  %v4398_v2 = vpop.f32.mrb[5].mxu0 }
 0x1c0   :  { %v4399_v4 = vadd.f32 %v4398_v2, %v4397_v0  ;;  %v4433_v5 = vpop.f32.mrb[5].mxu1 }
 0x1c1   :  { %v4434_v6 = vadd.f32 %v4433_v5, %v4432_v1 }
 0x1c3   :  { %v289_v7 = vadd.f32 %v4434_v6, %v4399_v4 }
 0x1c5   :  { %v292_v13 = vmul.f32 0.001953125, %v289_v7 }
 0x1c7   :  { %v438_v16 = vmul.f32 %v292_v13, %v292_v13 }
 0x1de   :  { %v4467_v8 = vpop.f32.mrb[6].mxu0 }
 0x1df   :  { %v4502_v9 = vpop.f32.mrb[6].mxu1  ;;  %v4468_v10 = vpop.f32.mrb[7].mxu0 }
 0x1e0   :  { %v4469_v11 = vadd.f32 %v4468_v10, %v4467_v8  ;;  %v4503_v12 = vpop.f32.mrb[7].mxu1 }
 0x1e1   :  { %v4504_v14 = vadd.f32 %v4503_v12, %v4502_v9 }
 0x1e3   :  { %v434_v15 = vadd.f32 %v4504_v14, %v4469_v11 }
 0x1e5   :  { %v437_v17 = vmul.f32 0.001953125, %v434_v15 }
 0x1e7   :  { %v439_v18 = vsub.f32 %v437_v17, %v438_v16 }
 0x1e9   :  { %v440_v19 = vmax.f32 %v439_v18, 0.0 }
 0x1eb   :  { %v441_v20 = vadd.f32 1e-05, %v440_v19 }
 0x1ed   :  { %5721 = vrsqrt.f32 %v441_v20 }
 0x1f7   :  { %v5722_v23 = vpop.eup %5721 }
 0x1f8   :  { %v443_v24 = vmul.f32 %v5722_v23, %v151_v22 }
 0x1fa   :  { %v453_v25 = vmul.f32 %v443_v24, %v292_v13 }
 0x1fc   :  { %455 = vrot.lane.b32.xlu0 %v453_v25, %s5786_s26 }
 0x200   :  { %446 = vperm.xlu0 %5708, %v443_v24  }
 0x26e   :  { %v456_v26 = vpop.permute.xlu0 %455 }
 0x26f   :  { %v458_v27 = vsub.f32 %v151_v22, %v456_v26 }
 0x271   :  { %461 = vperm.xlu1 %5709, %v458_v27  }
 0x275   :  { %5710 = vset.pattern.permute.xlu1 %v7520_v3 }
 0x27f   :  { %v447_v28 = vpop.permute.xlu0 %446 }
 0x280   :  { %v449_v29 = vmul.f32 %v447_v28, %v5950_v52  ;;  %v450_v30 = vmul.f32 %v447_v28, %v5954_v54  ;;  %v451_v31 = vmul.f32 %v447_v28, %v5952_v53  ;;  %v452_v32 = vmul.f32 %v447_v28, %v5958_v56 }
 0x2f0   :  { %v462_v33 = vpop.permute.xlu1 %461 }
 0x2f1   :  { %v464_v34 = vadd.f32 %v462_v33, %v449_v29  ;;  %v465_v35 = vadd.f32 %v462_v33, %v450_v30  ;;  %v466_v36 = vadd.f32 %v462_v33, %v451_v31  ;;  %v467_v37 = vadd.f32 %v462_v33, %v452_v32 }
 0x2f3   :  { %v472_v40 = vpack.c.bf16 %v465_v35, %v465_v35  ;;  %v474_v41 = vpack.c.bf16 %v467_v37, %v467_v37  ;;  %v471_v42 = vpack.c.bf16 %v464_v34, %v464_v34  ;;  %v473_v43 = vpack.c.bf16 %v466_v36, %v466_v36 }
 0x2f5   :  { %4320 = vmatprep.subr.msk.bf16.mxu0 %vm479_vm1, %v472_v40  ;;  %4322 = vmatprep.subr.msk.bf16.mxu1 %vm479_vm1, %v474_v41  ;;  %v481_v44 = vsel %vm479_vm1, %v471_v42, 0  ;;  %v487_v45 = vsel %vm479_vm1, %v473_v43, 0  ;;  %v578_v42 = vld [vmem:[%s7515_s2 + $0xc0] sm:$0xff] }
 0x2f6   :  { %493 = vmatpush1.bf16.msra.mxu0 %v481_v44  ;;  %536 = vmatpush1.bf16.msra.mxu1 %v487_v45  ;;  %v579_v45 = vld [vmem:[%s7515_s2 + $0xc8] sm:$0xff] }
 0x2f7   :  { %5377 = vmatprep.subr.bf16.mxu0 %v7522_v51  ;;  %5393 = vmatprep.subr.bf16.mxu1 %v7522_v51 }
 0x2f9   :  { %4321 = vmatmul.mubr.msk.bf16.vlgmr.msra.gmra.mrb[8].mxu0 %vm475_vm2, %v470_v46  ;;  %4323 = vmatmul.mubr.msk.bf16.vlgmr.msra.gmra.mrb[8].mxu1 %vm475_vm2, %v470_v46 }
 0x2fa   :  { %5378 = vmatpush3.bf16.msra.mxu0 %v7522_v51  ;;  %5394 = vmatpush3.bf16.msra.mxu1 %v7522_v51 }
 0x2fb   :  { %5379 = vmatprep.subr.bf16.mxu0 %v7522_v51  ;;  %5395 = vmatprep.subr.bf16.mxu1 %v7522_v51 }
 0x2fe   :  { %5380 = vmatpush3.bf16.msra.mxu0 %v7522_v51  ;;  %5396 = vmatpush3.bf16.msra.mxu1 %v7522_v51 }
 0x2ff   :  { %5381 = vmatprep.subr.bf16.mxu0 %v7522_v51  ;;  %5397 = vmatprep.subr.bf16.mxu1 %v7522_v51 }
 0x302   :  { %5382 = vmatpush3.bf16.msra.mxu0 %v7522_v51  ;;  %5398 = vmatpush3.bf16.msra.mxu1 %v7522_v51 }
 0x303   :  { %5383 = vmatprep.subr.bf16.mxu0 %v7522_v51  ;;  %5399 = vmatprep.subr.bf16.mxu1 %v7522_v51 }
 0x306   :  { %5384 = vmatpush3.bf16.msra.mxu0 %v7522_v51  ;;  %5400 = vmatpush3.bf16.msra.mxu1 %v7522_v51 }
 0x307   :  { %5385 = vmatprep.subr.bf16.mxu0 %v7522_v51  ;;  %5401 = vmatprep.subr.bf16.mxu1 %v7522_v51 }
 0x30a   :  { %5386 = vmatpush3.bf16.msra.mxu0 %v7522_v51  ;;  %5402 = vmatpush3.bf16.msra.mxu1 %v7522_v51 }
 0x30b   :  { %5387 = vmatprep.subr.bf16.mxu0 %v7522_v51  ;;  %5403 = vmatprep.subr.bf16.mxu1 %v7522_v51 }
 0x30e   :  { %5388 = vmatpush3.bf16.msra.mxu0 %v7522_v51  ;;  %5404 = vmatpush3.bf16.msra.mxu1 %v7522_v51 }
 0x30f   :  { %5389 = vmatprep.subr.bf16.mxu0 %v7522_v51  ;;  %5405 = vmatprep.subr.bf16.mxu1 %v7522_v51 }
 0x312   :  { %5390 = vmatpush3.bf16.msra.mxu0 %v7522_v51  ;;  %5406 = vmatpush3.bf16.msra.mxu1 %v7522_v51 }
 0x313   :  { %5391 = vmatprep.subr.bf16.mxu0 %v7522_v51  ;;  %5407 = vmatprep.subr.bf16.mxu1 %v7522_v51 }
 0x316   :  { %5392 = vmatpush3.bf16.msra.mxu0 %v7522_v51  ;;  %5408 = vmatpush3.bf16.msra.mxu1 %v7522_v51 }
 0x317   :  { %5409 = vmatprep.subr.bf16.mxu0 %v7522_v51  ;;  %5425 = vmatprep.subr.bf16.mxu1 %v7522_v51 }
 0x3cc   :  { %v6058_v47 = vpop.f32.mrb[8].mxu0  ;;  %v6060_v48 = vpop.f32.mrb[8].mxu1 }
 0x3cd   :  { %v6062_v49 = vpop.f32.mrb[9].mxu0  ;;  %v6064_v50 = vpop.f32.mrb[9].mxu1  ;;  %v732_v58 = vmul.f32 %v6058_v47, %v6058_v47  ;;  %v734_v59 = vmul.f32 %v6060_v48, %v6060_v48 }
 0x3ce   :  { %v6066_v52 = vpop.f32.mrb[10].mxu0  ;;  %v6068_v53 = vpop.f32.mrb[10].mxu1  ;;  %644 = vmatprep.mubr.f32.mxu0 %v6062_v49  ;;  %719 = vmatprep.mubr.f32.mxu1 %v6064_v50  ;;  %v733_v56 = vmul.f32 %v6062_v49, %v6062_v49  ;;  %v735_v57 = vmul.f32 %v6064_v50, %v6064_v50 }
 0x3cf   :  { %v6072_v54 = vpop.f32.mrb[11].mxu0  ;;  %v6074_v55 = vpop.f32.mrb[11].mxu1  ;;  %645 = vmatmul.mubr.f32.vlgmr.msra.gmra.mrb[12].mxu0 %v6058_v47  ;;  %720 = vmatmul.mubr.f32.vlgmr.msra.gmra.mrb[12].mxu1 %v6060_v48  ;;  %v736_v62 = vmul.f32 %v6066_v52, %v6066_v52  ;;  %v738_v63 = vmul.f32 %v6068_v53, %v6068_v53 }
 0x3d0   :  { %5410 = vmatpush3.bf16.msra.mxu0 %v7522_v51  ;;  %5426 = vmatpush3.bf16.msra.mxu1 %v7522_v51  ;;  %v737_v60 = vmul.f32 %v6072_v54, %v6072_v54  ;;  %v739_v61 = vmul.f32 %v6074_v55, %v6074_v55 }
 0x3d1   :  { %649 = vmatprep.mubr.f32.mxu0 %v6072_v54  ;;  %724 = vmatprep.mubr.f32.mxu1 %v6074_v55 }
 0x3d2   :  { %5411 = vmatprep.subr.bf16.mxu0 %v7522_v51  ;;  %5427 = vmatprep.subr.bf16.mxu1 %v7522_v51 }
 0x3d3   :  { %650 = vmatmul.mubr.f32.gmra.mrb[14].mxu0 %v6066_v52  ;;  %725 = vmatmul.mubr.f32.gmra.mrb[14].mxu1 %v6068_v53 }
 0x3d4   :  { %5412 = vmatpush3.bf16.msra.mxu0 %v7522_v51  ;;  %5428 = vmatpush3.bf16.msra.mxu1 %v7522_v51 }
 0x3d5   :  { %804 = vmatprep.mubr.f32.mxu0 %v733_v56  ;;  %879 = vmatprep.mubr.f32.mxu1 %v735_v57 }
 0x3d6   :  { %5413 = vmatprep.subr.bf16.mxu0 %v7522_v51  ;;  %5429 = vmatprep.subr.bf16.mxu1 %v7522_v51 }
 0x3d8   :  { %5414 = vmatpush3.bf16.msra.mxu0 %v7522_v51  ;;  %5430 = vmatpush3.bf16.msra.mxu1 %v7522_v51 }
 0x3d9   :  { %5415 = vmatprep.subr.bf16.mxu0 %v7522_v51  ;;  %5431 = vmatprep.subr.bf16.mxu1 %v7522_v51 }
 0x3dc   :  { %5416 = vmatpush3.bf16.msra.mxu0 %v7522_v51  ;;  %5432 = vmatpush3.bf16.msra.mxu1 %v7522_v51 }
 0x3dd   :  { %5417 = vmatprep.subr.bf16.mxu0 %v7522_v51  ;;  %5433 = vmatprep.subr.bf16.mxu1 %v7522_v51 }
 0x3e0   :  { %5418 = vmatpush3.bf16.msra.mxu0 %v7522_v51  ;;  %5434 = vmatpush3.bf16.msra.mxu1 %v7522_v51 }
 0x3e1   :  { %5419 = vmatprep.subr.bf16.mxu0 %v7522_v51  ;;  %5435 = vmatprep.subr.bf16.mxu1 %v7522_v51 }
 0x3e4   :  { %5420 = vmatpush3.bf16.msra.mxu0 %v7522_v51  ;;  %5436 = vmatpush3.bf16.msra.mxu1 %v7522_v51 }
 0x3e5   :  { %5421 = vmatprep.subr.bf16.mxu0 %v7522_v51  ;;  %5437 = vmatprep.subr.bf16.mxu1 %v7522_v51 }
 0x3e8   :  { %5422 = vmatpush3.bf16.msra.mxu0 %v7522_v51  ;;  %5438 = vmatpush3.bf16.msra.mxu1 %v7522_v51 }
 0x3e9   :  { %5423 = vmatprep.subr.bf16.mxu0 %v7522_v51  ;;  %5439 = vmatprep.subr.bf16.mxu1 %v7522_v51 }
 0x3ec   :  { %5424 = vmatpush3.bf16.msra.mxu0 %v7522_v51  ;;  %5440 = vmatpush3.bf16.msra.mxu1 %v7522_v51 }
 0x3ef   :  { %805 = vmatmul.mubr.f32.vlgmr.msra.gmra.mrb[16].mxu0 %v732_v58  ;;  %880 = vmatmul.mubr.f32.vlgmr.msra.gmra.mrb[16].mxu1 %v734_v59 }
 0x3f0   :  { %809 = vmatprep.mubr.f32.mxu0 %v737_v60  ;;  %884 = vmatprep.mubr.f32.mxu1 %v739_v61 }
 0x3f3   :  { %810 = vmatmul.mubr.f32.gmra.mrb[18].mxu0 %v736_v62  ;;  %885 = vmatmul.mubr.f32.gmra.mrb[18].mxu1 %v738_v63 }
 0x3f4   :  { %1002 = vmatprep.mubr.bf16.mxu0 %v7520_v3  ;;  %1043 = vmatprep.mubr.bf16.mxu1 %v7520_v3 }
 0x4a2   :  { %v4537_v0 = vpop.f32.mrb[12].mxu0  ;;  %v4575_v1 = vpop.f32.mrb[12].mxu1 }
 0x4a3   :  { %v4538_v2 = vpop.f32.mrb[13].mxu0  ;;  %v4576_v4 = vpop.f32.mrb[13].mxu1 }
 0x4a4   :  { %v4539_v5 = vadd.f32 %v4538_v2, %v4537_v0  ;;  %v4577_v6 = vadd.f32 %v4576_v4, %v4575_v1 }
 0x4a6   :  { %v722_v7 = vadd.f32 %v4577_v6, %v4539_v5  ;;  %v4540_v8 = vpop.f32.mrb[14].mxu0  ;;  %v4578_v9 = vpop.f32.mrb[14].mxu1 }
 0x4a7   :  { %v4541_v10 = vpop.f32.mrb[15].mxu0  ;;  %v4579_v11 = vpop.f32.mrb[15].mxu1 }
 0x4a8   :  { %v4542_v12 = vadd.f32 %v4541_v10, %v4540_v8  ;;  %v4580_v13 = vadd.f32 %v4579_v11, %v4578_v9  ;;  %v730_v17 = vmul.f32 0.001953125, %v722_v7 }
 0x4aa   :  { %v727_v14 = vadd.f32 %v4580_v13, %v4542_v12  ;;  %v892_v26 = vmul.f32 %v730_v17, %v730_v17 }
 0x4ac   :  { %v731_v29 = vmul.f32 0.001953125, %v727_v14 }
 0x4ae   :  { %v893_v35 = vmul.f32 %v731_v29, %v731_v29 }
 0x4c2   :  { %v4613_v15 = vpop.f32.mrb[16].mxu0  ;;  %v4651_v16 = vpop.f32.mrb[16].mxu1 }
 0x4c3   :  { %v4614_v18 = vpop.f32.mrb[17].mxu0  ;;  %v4652_v19 = vpop.f32.mrb[17].mxu1 }
 0x4c4   :  { %v4615_v20 = vadd.f32 %v4614_v18, %v4613_v15  ;;  %v4653_v22 = vadd.f32 %v4652_v19, %v4651_v16 }
 0x4c6   :  { %v882_v23 = vadd.f32 %v4653_v22, %v4615_v20  ;;  %v4616_v24 = vpop.f32.mrb[18].mxu0  ;;  %v4654_v25 = vpop.f32.mrb[18].mxu1 }
 0x4c7   :  { %v4617_v27 = vpop.f32.mrb[19].mxu0  ;;  %v4655_v28 = vpop.f32.mrb[19].mxu1 }
 0x4c8   :  { %v890_v30 = vmul.f32 0.001953125, %v882_v23  ;;  %v4618_v31 = vadd.f32 %v4617_v27, %v4616_v24  ;;  %v4656_v32 = vadd.f32 %v4655_v28, %v4654_v25  ;;  %v1093_v27 = vld [vmem:[%s7515_s2 + $0x20] sm:$0xf] }
 0x4c9   :  { %v1094_v28 = vpack.c.bf16 %v1093_v27, %v1093_v27 }
 0x4ca   :  { %v894_v33 = vsub.f32 %v890_v30, %v892_v26  ;;  %v887_v34 = vadd.f32 %v4656_v32, %v4618_v31  ;;  %v1355_v31 = vld [vmem:[%s7515_s2 + $0x30] sm:$0xf] }
 0x4cb   :  { %v1356_v32 = vpack.c.bf16 %v1355_v31, %v1355_v31 }
 0x4cc   :  { %v896_v36 = vmax.f32 %v894_v33, 0.0  ;;  %v891_v37 = vmul.f32 0.001953125, %v887_v34  ;;  %v1486_v33 = vld [vmem:[%s7515_s2 + $0x38] sm:$0xf] }
 0x4cd   :  { %v1487_v34 = vpack.c.bf16 %v1486_v33, %v1486_v33 }
 0x4ce   :  { %v898_v38 = vadd.f32 1e-05, %v896_v36  ;;  %v895_v39 = vsub.f32 %v891_v37, %v893_v35  ;;  %v1577_v35 = vld [vmem:[%s7515_s2 + $0x40] sm:$0xf]  ;;  %v1708_v37 = vld [vmem:[%s7515_s2 + $0x48] sm:$0xf] }
 0x4cf   :  { %v1578_v36 = vpack.c.bf16 %v1577_v35, %v1577_v35 }
 0x4d0   :  { %5723 = vrsqrt.f32 %v898_v38  ;;  %v897_v40 = vmax.f32 %v895_v39, 0.0  ;;  %v1709_v38 = vpack.c.bf16 %v1708_v37, %v1708_v37  ;;  %v1839_v39 = vld [vmem:[%s7515_s2 + $0x50] sm:$0xf] }
 0x4d2   :  { %v899_v41 = vadd.f32 1e-05, %v897_v40  ;;  %v1840_v40 = vpack.c.bf16 %v1839_v39, %v1839_v39 }
 0x4d4   :  { %5725 = vrsqrt.f32 %v899_v41  ;;  %v1970_v41 = vld [vmem:[%s7515_s2 + $0x58] sm:$0xf] }
 0x4da   :  { %v5724_v43 = vpop.eup %5723 }
 0x4db   :  { %v902_v44 = vmul.f32 %v5724_v43, %v578_v42 }
 0x4dd   :  { %906 = vperm.xlu0 %5708, %v902_v44   ;;  %v922_v46 = vmul.f32 %v902_v44, %v730_v17 }
 0x4de   :  { %v5726_v56 = vpop.eup %5725 }
 0x4df   :  { %926 = vrot.lane.b32.xlu1 %v922_v46, %s5786_s26  ;;  %v903_v57 = vmul.f32 %v5726_v56, %v579_v45 }
 0x4e1   :  { %v923_v58 = vmul.f32 %v903_v57, %v731_v29  ;;  %5711 = vset.pattern.permute.xlu0 %v7518_v21  ;;  %v1224_v29 = vld [vmem:[%s7515_s2 + $0x28] sm:$0xf] }
 0x4e2   :  { %v1225_v30 = vpack.c.bf16 %v1224_v29, %v1224_v29 }
 0x4e3   :  { %928 = vrot.lane.b32.xlu1 %v923_v58, %s5786_s26 }
 0x4e7   :  { %911 = vperm.xlu1 %5710, %v903_v57  }
 0x4eb   :  { %5712 = vset.pattern.permute.xlu1 %v7518_v21 }
 0x551   :  { %v927_v59 = vpop.permute.xlu1 %926 }
 0x552   :  { %v932_v60 = vsub.f32 %v578_v42, %v927_v59  ;;  %v1971_v42 = vpack.c.bf16 %v1970_v41, %v1970_v41 }
 0x554   :  { %936 = vperm.xlu0 %5711, %v932_v60  }
 0x555   :  { %v929_v61 = vpop.permute.xlu1 %928 }
 0x556   :  { %v933_v62 = vsub.f32 %v579_v45, %v929_v61 }
 0x558   :  { %941 = vperm.xlu1 %5712, %v933_v62   ;;  %5713 = vset.pattern.permute.xlu0 %v7520_v3 }
 0x55c   :  { %v907_v63 = vpop.permute.xlu0 %906 }
 0x55d   :  { %v914_v0 = vmul.f32 %v907_v63, %v6058_v47  ;;  %v915_v1 = vmul.f32 %v907_v63, %v6062_v49  ;;  %v916_v2 = vmul.f32 %v907_v63, %v6060_v48  ;;  %v917_v4 = vmul.f32 %v907_v63, %v6064_v50 }
 0x566   :  { %v912_v5 = vpop.permute.xlu1 %911 }
 0x567   :  { %v918_v11 = vmul.f32 %v912_v5, %v6066_v52  ;;  %v919_v12 = vmul.f32 %v912_v5, %v6072_v54  ;;  %v920_v13 = vmul.f32 %v912_v5, %v6068_v53  ;;  %v921_v47 = vmul.f32 %v912_v5, %v6074_v55  ;;  %v964_v52 = vld [vmem:[%s7515_s2 + $0x18] sm:$0xf] }
 0x568   :  { %v965_v26 = vpack.c.bf16 %v964_v52, %v964_v52 }
 0x5d3   :  { %v937_v6 = vpop.permute.xlu0 %936 }
 0x5d4   :  { %v944_v7 = vadd.f32 %v937_v6, %v914_v0  ;;  %v945_v8 = vadd.f32 %v937_v6, %v915_v1  ;;  %v946_v9 = vadd.f32 %v937_v6, %v916_v2  ;;  %v947_v10 = vadd.f32 %v937_v6, %v917_v4 }
 0x5d6   :  { %v952_v50 = vmax.f32 %v944_v7, 0.0  ;;  %v953_v17 = vmax.f32 %v945_v8, 0.0  ;;  %v954_v18 = vmax.f32 %v946_v9, 0.0  ;;  %v955_v19 = vmax.f32 %v947_v10, 0.0 }
 0x5d7   :  { %v942_v14 = vpop.permute.xlu1 %941 }
 0x5d8   :  { %v948_v49 = vadd.f32 %v942_v14, %v918_v11  ;;  %v949_v15 = vadd.f32 %v942_v14, %v919_v12  ;;  %v950_v48 = vadd.f32 %v942_v14, %v920_v13  ;;  %v951_v16 = vadd.f32 %v942_v14, %v921_v47 }
 0x5da   :  { %v956_v20 = vmax.f32 %v948_v49, 0.0  ;;  %v957_v22 = vmax.f32 %v949_v15, 0.0  ;;  %v958_v23 = vmax.f32 %v950_v48, 0.0  ;;  %v959_v24 = vmax.f32 %v951_v16, 0.0 }
 0x5dc   :  { %v6152_v53 = vpack.c.bf16 %v956_v20, %v952_v50  ;;  %v6154_v54 = vpack.c.bf16 %v957_v22, %v953_v17  ;;  %v6156_v55 = vpack.c.bf16 %v958_v23, %v954_v18  ;;  %v6158_v25 = vpack.c.bf16 %v959_v24, %v955_v19 }
 0x5de   :  { %970 = vmatprep.subr.bf16.mxu0 %v6154_v54  ;;  %1011 = vmatprep.subr.bf16.mxu1 %v6158_v25 }
 0x5df   :  { %971 = vmatpush1.bf16.msra.mxu0 %v6152_v53  ;;  %1012 = vmatpush1.bf16.msra.mxu1 %v6156_v55 }
 0x5e0   :  { %1098 = vmatprep.subr.bf16.mxu0 %v6154_v54  ;;  %1139 = vmatprep.subr.bf16.mxu1 %v6158_v25 }
 0x5e2   :  { %4324 = vmatmul.mubr.msk.bf16.vlgmr.msra.gmra.mrb[20].mxu0 %vm966_vm3, %v965_v26  ;;  %4325 = vmatmul.mubr.msk.bf16.vlgmr.msra.gmra.mrb[20].mxu1 %vm966_vm3, %v965_v26 }
 0x5e3   :  { %1099 = vmatpush1.bf16.msra.mxu0 %v6152_v53  ;;  %1140 = vmatpush1.bf16.msra.mxu1 %v6156_v55 }
 0x5e4   :  { %1229 = vmatprep.subr.bf16.mxu0 %v6154_v54  ;;  %1270 = vmatprep.subr.bf16.mxu1 %v6158_v25 }
 0x5e5   :  { %1130 = vmatprep.mubr.bf16.mxu0 %v7520_v3  ;;  %1171 = vmatprep.mubr.bf16.mxu1 %v7520_v3 }
 0x5ea   :  { %4326 = vmatmul.mubr.msk.bf16.vlgmr.msra.gmra.mrb[24].mxu0 %vm966_vm3, %v1094_v28  ;;  %4327 = vmatmul.mubr.msk.bf16.vlgmr.msra.gmra.mrb[24].mxu1 %vm966_vm3, %v1094_v28 }
 0x5eb   :  { %1230 = vmatpush1.bf16.msra.mxu0 %v6152_v53  ;;  %1271 = vmatpush1.bf16.msra.mxu1 %v6156_v55 }
 0x5ec   :  { %1360 = vmatprep.subr.bf16.mxu0 %v6154_v54  ;;  %1401 = vmatprep.subr.bf16.mxu1 %v6158_v25 }
 0x5ed   :  { %1261 = vmatprep.mubr.bf16.mxu0 %v7520_v3  ;;  %1302 = vmatprep.mubr.bf16.mxu1 %v7520_v3 }
 0x5f2   :  { %4329 = vmatmul.mubr.msk.bf16.vlgmr.msra.gmra.mrb[28].mxu0 %vm966_vm3, %v1225_v30  ;;  %4330 = vmatmul.mubr.msk.bf16.vlgmr.msra.gmra.mrb[28].mxu1 %vm966_vm3, %v1225_v30 }
 0x5f3   :  { %1361 = vmatpush1.bf16.msra.mxu0 %v6152_v53  ;;  %1402 = vmatpush1.bf16.msra.mxu1 %v6156_v55 }
 0x5f4   :  { %1491 = vmatprep.subr.bf16.mxu0 %v6154_v54  ;;  %1532 = vmatprep.subr.bf16.mxu1 %v6158_v25 }
 0x5f5   :  { %1392 = vmatprep.mubr.bf16.mxu0 %v7520_v3  ;;  %1433 = vmatprep.mubr.bf16.mxu1 %v7520_v3 }
 0x5fa   :  { %4332 = vmatmul.mubr.msk.bf16.vlgmr.msra.gmra.mrb[32].mxu0 %vm966_vm3, %v1356_v32  ;;  %4333 = vmatmul.mubr.msk.bf16.vlgmr.msra.gmra.mrb[32].mxu1 %vm966_vm3, %v1356_v32 }
 0x5fb   :  { %1492 = vmatpush1.bf16.msra.mxu0 %v6152_v53  ;;  %1533 = vmatpush1.bf16.msra.mxu1 %v6156_v55 }
 0x5fc   :  { %1582 = vmatprep.subr.bf16.mxu0 %v6154_v54  ;;  %1623 = vmatprep.subr.bf16.mxu1 %v6158_v25 }
 0x5fd   :  { %1523 = vmatprep.mubr.bf16.mxu0 %v7520_v3  ;;  %1564 = vmatprep.mubr.bf16.mxu1 %v7520_v3 }
 0x602   :  { %4335 = vmatmul.mubr.msk.bf16.vlgmr.msra.gmra.mrb[36].mxu0 %vm966_vm3, %v1487_v34  ;;  %4336 = vmatmul.mubr.msk.bf16.vlgmr.msra.gmra.mrb[36].mxu1 %vm966_vm3, %v1487_v34 }
 0x603   :  { %1583 = vmatpush1.bf16.msra.mxu0 %v6152_v53  ;;  %1624 = vmatpush1.bf16.msra.mxu1 %v6156_v55 }
 0x604   :  { %1713 = vmatprep.subr.bf16.mxu0 %v6154_v54  ;;  %1754 = vmatprep.subr.bf16.mxu1 %v6158_v25 }
 0x605   :  { %1614 = vmatprep.mubr.bf16.mxu0 %v7520_v3  ;;  %1655 = vmatprep.mubr.bf16.mxu1 %v7520_v3 }
 0x60a   :  { %4337 = vmatmul.mubr.msk.bf16.vlgmr.msra.gmra.mrb[40].mxu0 %vm966_vm3, %v1578_v36  ;;  %4338 = vmatmul.mubr.msk.bf16.vlgmr.msra.gmra.mrb[40].mxu1 %vm966_vm3, %v1578_v36 }
 0x60b   :  { %1714 = vmatpush1.bf16.msra.mxu0 %v6152_v53  ;;  %1755 = vmatpush1.bf16.msra.mxu1 %v6156_v55 }
 0x60c   :  { %1844 = vmatprep.subr.bf16.mxu0 %v6154_v54  ;;  %1885 = vmatprep.subr.bf16.mxu1 %v6158_v25 }
 0x60d   :  { %1745 = vmatprep.mubr.bf16.mxu0 %v7520_v3  ;;  %1786 = vmatprep.mubr.bf16.mxu1 %v7520_v3 }
 0x612   :  { %4340 = vmatmul.mubr.msk.bf16.vlgmr.msra.gmra.mrb[44].mxu0 %vm966_vm3, %v1709_v38  ;;  %4341 = vmatmul.mubr.msk.bf16.vlgmr.msra.gmra.mrb[44].mxu1 %vm966_vm3, %v1709_v38 }
 0x613   :  { %1845 = vmatpush1.bf16.msra.mxu0 %v6152_v53  ;;  %1886 = vmatpush1.bf16.msra.mxu1 %v6156_v55 }
 0x614   :  { %1975 = vmatprep.subr.bf16.mxu0 %v6154_v54  ;;  %2016 = vmatprep.subr.bf16.mxu1 %v6158_v25 }
 0x615   :  { %1876 = vmatprep.mubr.bf16.mxu0 %v7520_v3  ;;  %1917 = vmatprep.mubr.bf16.mxu1 %v7520_v3 }
 0x61a   :  { %4343 = vmatmul.mubr.msk.bf16.vlgmr.msra.gmra.mrb[48].mxu0 %vm966_vm3, %v1840_v40  ;;  %4344 = vmatmul.mubr.msk.bf16.vlgmr.msra.gmra.mrb[48].mxu1 %vm966_vm3, %v1840_v40 }
 0x61b   :  { %1976 = vmatpush1.bf16.msra.mxu0 %v6152_v53  ;;  %2017 = vmatpush1.bf16.msra.mxu1 %v6156_v55 }
 0x61c   :  { %2007 = vmatprep.mubr.bf16.mxu0 %v7520_v3  ;;  %2048 = vmatprep.mubr.bf16.mxu1 %v7520_v3 }
 0x61d   :  { %5441 = vmatprep.subr.bf16.mxu0 %v7522_v51  ;;  %5457 = vmatprep.subr.bf16.mxu1 %v7522_v51 }
 0x622   :  { %4346 = vmatmul.mubr.msk.bf16.vlgmr.msra.gmra.mrb[52].mxu0 %vm966_vm3, %v1971_v42  ;;  %4347 = vmatmul.mubr.msk.bf16.vlgmr.msra.gmra.mrb[52].mxu1 %vm966_vm3, %v1971_v42 }
 0x623   :  { %5442 = vmatpush3.bf16.msra.mxu0 %v7522_v51  ;;  %5458 = vmatpush3.bf16.msra.mxu1 %v7522_v51 }
 0x624   :  { %5443 = vmatprep.subr.bf16.mxu0 %v7522_v51  ;;  %5459 = vmatprep.subr.bf16.mxu1 %v7522_v51 }
 0x627   :  { %5444 = vmatpush3.bf16.msra.mxu0 %v7522_v51  ;;  %5460 = vmatpush3.bf16.msra.mxu1 %v7522_v51 }
 0x628   :  { %5445 = vmatprep.subr.bf16.mxu0 %v7522_v51  ;;  %5461 = vmatprep.subr.bf16.mxu1 %v7522_v51 }
 0x62b   :  { %5446 = vmatpush3.bf16.msra.mxu0 %v7522_v51  ;;  %5462 = vmatpush3.bf16.msra.mxu1 %v7522_v51 }
 0x62c   :  { %5447 = vmatprep.subr.bf16.mxu0 %v7522_v51  ;;  %5463 = vmatprep.subr.bf16.mxu1 %v7522_v51 }
 0x62f   :  { %5448 = vmatpush3.bf16.msra.mxu0 %v7522_v51  ;;  %5464 = vmatpush3.bf16.msra.mxu1 %v7522_v51 }
 0x630   :  { %5449 = vmatprep.subr.bf16.mxu0 %v7522_v51  ;;  %5465 = vmatprep.subr.bf16.mxu1 %v7522_v51 }
 0x633   :  { %5450 = vmatpush3.bf16.msra.mxu0 %v7522_v51  ;;  %5466 = vmatpush3.bf16.msra.mxu1 %v7522_v51 }
 0x634   :  { %5451 = vmatprep.subr.bf16.mxu0 %v7522_v51  ;;  %5467 = vmatprep.subr.bf16.mxu1 %v7522_v51 }
 0x637   :  { %5452 = vmatpush3.bf16.msra.mxu0 %v7522_v51  ;;  %5468 = vmatpush3.bf16.msra.mxu1 %v7522_v51 }
 0x638   :  { %5453 = vmatprep.subr.bf16.mxu0 %v7522_v51  ;;  %5469 = vmatprep.subr.bf16.mxu1 %v7522_v51 }
 0x63b   :  { %5454 = vmatpush3.bf16.msra.mxu0 %v7522_v51  ;;  %5470 = vmatpush3.bf16.msra.mxu1 %v7522_v51 }
 0x63c   :  { %5455 = vmatprep.subr.bf16.mxu0 %v7522_v51  ;;  %5471 = vmatprep.subr.bf16.mxu1 %v7522_v51 }
 0x63f   :  { %5456 = vmatpush3.bf16.msra.mxu0 %v7522_v51  ;;  %5472 = vmatpush3.bf16.msra.mxu1 %v7522_v51 }
 0x640   :  { %5473 = vmatprep.subr.bf16.mxu0 %v7522_v51  ;;  %5489 = vmatprep.subr.bf16.mxu1 %v7522_v51 }
 0x6b5   :  { %v1004_v43 = vpop.f32.mrb[20].mxu0  ;;  %v1045_v44 = vpop.f32.mrb[20].mxu1 }
 0x6b6   :  { %1052 = vrot.lane.b32.xlu1 %v1004_v43, %s5787_s27  ;;  %v1006_v45 = vpop.f32.mrb[21].mxu0  ;;  %v1047_v46 = vpop.f32.mrb[21].mxu1 }
 0x6b7   :  { %1054 = vrot.lane.b32.xlu0 %v1006_v45, %s5787_s27  ;;  %v1008_v56 = vpop.f32.mrb[22].mxu0  ;;  %v1049_v57 = vpop.f32.mrb[22].mxu1 }
 0x6b8   :  { %v1009_v58 = vpop.f32.mrb[23].mxu0  ;;  %v1050_v59 = vpop.f32.mrb[23].mxu1 }
 0x6ba   :  { %1056 = vrot.lane.b32.xlu1 %v1045_v44, %s5787_s27 }
 0x6bb   :  { %1058 = vrot.lane.b32.xlu0 %v1047_v46, %s5787_s27 }
 0x6bd   :  { %v1132_v60 = vpop.f32.mrb[24].mxu0  ;;  %v1173_v61 = vpop.f32.mrb[24].mxu1 }
 0x6be   :  { %1180 = vrot.lane.b32.xlu1 %v1132_v60, %s5788_s28  ;;  %v1134_v62 = vpop.f32.mrb[25].mxu0  ;;  %v1175_v63 = vpop.f32.mrb[25].mxu1 }
 0x6bf   :  { %1182 = vrot.lane.b32.xlu0 %v1134_v62, %s5788_s28  ;;  %v1136_v0 = vpop.f32.mrb[26].mxu0  ;;  %v1177_v1 = vpop.f32.mrb[26].mxu1 }
 0x6c0   :  { %v1137_v2 = vpop.f32.mrb[27].mxu0  ;;  %v1178_v4 = vpop.f32.mrb[27].mxu1 }
 0x6c2   :  { %1184 = vrot.lane.b32.xlu1 %v1173_v61, %s5788_s28 }
 0x6c3   :  { %1186 = vrot.lane.b32.xlu0 %v1175_v63, %s5788_s28 }
 0x6c5   :  { %v1263_v5 = vpop.f32.mrb[28].mxu0  ;;  %v1304_v6 = vpop.f32.mrb[28].mxu1 }
 0x6c6   :  { %1311 = vrot.lane.b32.xlu1 %v1263_v5, %s5789_s29  ;;  %v1265_v7 = vpop.f32.mrb[29].mxu0  ;;  %v1306_v8 = vpop.f32.mrb[29].mxu1 }
 0x6c7   :  { %1313 = vrot.lane.b32.xlu0 %v1265_v7, %s5789_s29  ;;  %v1267_v9 = vpop.f32.mrb[30].mxu0  ;;  %v1308_v10 = vpop.f32.mrb[30].mxu1 }
 0x6c8   :  { %v1268_v11 = vpop.f32.mrb[31].mxu0  ;;  %v1309_v12 = vpop.f32.mrb[31].mxu1 }
 0x6c9   :  { %v1060_v12 = vlaneseq }
 0x6ca   :  { %1315 = vrot.lane.b32.xlu1 %v1304_v6, %s5789_s29 }
 0x6cb   :  { %1317 = vrot.lane.b32.xlu0 %v1306_v8, %s5789_s29 }
 0x6cd   :  { %v1394_v13 = vpop.f32.mrb[32].mxu0  ;;  %v1435_v47 = vpop.f32.mrb[32].mxu1 }
 0x6ce   :  { %1442 = vrot.lane.b32.xlu1 %v1394_v13, %s5786_s26  ;;  %v1396_v14 = vpop.f32.mrb[33].mxu0  ;;  %v1437_v49 = vpop.f32.mrb[33].mxu1 }
 0x6cf   :  { %1444 = vrot.lane.b32.xlu0 %v1396_v14, %s5786_s26  ;;  %v1398_v15 = vpop.f32.mrb[34].mxu0  ;;  %v1439_v48 = vpop.f32.mrb[34].mxu1 }
 0x6d0   :  { %v1399_v16 = vpop.f32.mrb[35].mxu0  ;;  %v1440_v50 = vpop.f32.mrb[35].mxu1 }
 0x6d1   :  { %v6333_v16 = vld [vmem:[%s7516_s1] ss:$8 sm:$0xf] }
 0x6d2   :  { %1446 = vrot.lane.b32.xlu1 %v1435_v47, %s5786_s26  ;;  %v1070_v47 = vshrl.u32 %v1060_v12, 7 }
 0x6d3   :  { %1448 = vrot.lane.b32.xlu0 %v1437_v49, %s5786_s26  ;;  %v6324_v49 = vand.u32 127, %v1060_v12 }
 0x6d4   :  { %v6326_v15 = vsub.s32 1, %v1070_v47  ;;  %v6328_v48 = vsub.s32 2, %v1070_v47  ;;  %v6335_v50 = vsub.s32 0, %v1070_v47 }
 0x6d5   :  { %v6292_v17 = vpop.f32.mrb[36].mxu0  ;;  %v6294_v18 = vpop.f32.mrb[36].mxu1  ;;  %vm1062_vm4 = vcmp.lt.s32.totalorder %v6324_v49, 17  ;;  %vm1188_vm5 = vcmp.lt.s32.totalorder %v6324_v49, 16  ;;  %vm1319_vm6 = vcmp.lt.s32.totalorder %v6324_v49, 15  ;;  %vm1450_vm7 = vcmp.lt.s32.totalorder %v6324_v49, 1 }
 0x6d6   :  { %v6296_v19 = vpop.f32.mrb[37].mxu0  ;;  %v6298_v20 = vpop.f32.mrb[37].mxu1  ;;  %vm1672_vm8 = vcmp.lt.s32.totalorder %v6324_v49, 127  ;;  %vm1803_vm9 = vcmp.lt.s32.totalorder %v6324_v49, 113  ;;  %vm1934_vm10 = vcmp.lt.s32.totalorder %v6324_v49, 112  ;;  %vm2065_vm11 = vcmp.lt.s32.totalorder %v6324_v49, 111 }
 0x6d7   :  { %v1529_v22 = vpop.f32.mrb[38].mxu0  ;;  %v1570_v23 = vpop.f32.mrb[38].mxu1 }
 0x6d8   :  { %v1530_v24 = vpop.f32.mrb[39].mxu0  ;;  %v1571_v52 = vpop.f32.mrb[39].mxu1  ;;  %v6337_v22 = vsub.s32 3, %v1070_v47 }
 0x6d9   :  { %v6344_v24 = vld [vmem:[%s7516_s1 + $0x1] ss:$8 sm:$0xf] }
 0x6dd   :  { %v1616_v53 = vpop.f32.mrb[40].mxu0  ;;  %v1657_v54 = vpop.f32.mrb[40].mxu1 }
 0x6de   :  { %1664 = vrot.lane.b32.xlu1 %v1616_v53, %s5790_s30  ;;  %v1618_v55 = vpop.f32.mrb[41].mxu0  ;;  %v1659_v25 = vpop.f32.mrb[41].mxu1  ;;  %v1076_v53 = vrot.slane %v6333_v16, %v6326_v15 }
 0x6df   :  { %1666 = vrot.lane.b32.xlu0 %v1618_v55, %s5790_s30  ;;  %v1620_v26 = vpop.f32.mrb[42].mxu0  ;;  %v1661_v27 = vpop.f32.mrb[42].mxu1  ;;  %v6356_v55 = vld [vmem:[%s7516_s1 + $0x2] ss:$8 sm:$0xf] }
 0x6e0   :  { %v1621_v28 = vpop.f32.mrb[43].mxu0  ;;  %v1662_v29 = vpop.f32.mrb[43].mxu1  ;;  %v1084_v26 = vrot.slane %v6333_v16, %v6337_v22  ;;  %v1203_v27 = vrot.slane %v6344_v24, %v6326_v15 }
 0x6e1   :  { %v6368_v28 = vld [vmem:[%s7516_s1 + $0x3] ss:$8 sm:$0xf] }
 0x6e2   :  { %1668 = vrot.lane.b32.xlu1 %v1657_v54, %s5790_s30  ;;  %v1080_v54 = vrot.slane %v6333_v16, %v6328_v48 }
 0x6e3   :  { %1670 = vrot.lane.b32.xlu0 %v1659_v25, %s5790_s30  ;;  %v1072_v25 = vrot.slane %v6333_v16, %v6335_v50 }
 0x6e5   :  { %v1747_v30 = vpop.f32.mrb[44].mxu0  ;;  %v1788_v31 = vpop.f32.mrb[44].mxu1 }
 0x6e6   :  { %1795 = vrot.lane.b32.xlu1 %v1747_v30, %s5791_s4  ;;  %v1749_v32 = vpop.f32.mrb[45].mxu0  ;;  %v1790_v33 = vpop.f32.mrb[45].mxu1  ;;  %v1207_v30 = vrot.slane %v6344_v24, %v6328_v48 }
 0x6e7   :  { %1797 = vrot.lane.b32.xlu0 %v1749_v32, %s5791_s4  ;;  %v1751_v34 = vpop.f32.mrb[46].mxu0  ;;  %v1792_v35 = vpop.f32.mrb[46].mxu1  ;;  %v1211_v32 = vrot.slane %v6344_v24, %v6337_v22 }
 0x6e8   :  { %v1752_v36 = vpop.f32.mrb[47].mxu0  ;;  %v1793_v37 = vpop.f32.mrb[47].mxu1  ;;  %v1334_v35 = vrot.slane %v6356_v55, %v6326_v15 }
 0x6e9   :  { %v1338_v36 = vrot.slane %v6356_v55, %v6328_v48  ;;  %v1330_v37 = vrot.slane %v6356_v55, %v6335_v50 }
 0x6ea   :  { %1799 = vrot.lane.b32.xlu1 %v1788_v31, %s5791_s4  ;;  %v1199_v31 = vrot.slane %v6344_v24, %v6335_v50 }
 0x6eb   :  { %1801 = vrot.lane.b32.xlu0 %v1790_v33, %s5791_s4  ;;  %v6382_v33 = vld [vmem:[%s7516_s1 + $0x4] ss:$8 sm:$0xf] }
 0x6ed   :  { %v1878_v38 = vpop.f32.mrb[48].mxu0  ;;  %v1919_v39 = vpop.f32.mrb[48].mxu1 }
 0x6ee   :  { %1926 = vrot.lane.b32.xlu1 %v1878_v38, %s5792_s5  ;;  %v1880_v40 = vpop.f32.mrb[49].mxu0  ;;  %v1921_v41 = vpop.f32.mrb[49].mxu1  ;;  %v1342_v38 = vrot.slane %v6356_v55, %v6337_v22 }
 0x6ef   :  { %1928 = vrot.lane.b32.xlu0 %v1880_v40, %s5792_s5  ;;  %v1882_v42 = vpop.f32.mrb[50].mxu0  ;;  %v1923_v43 = vpop.f32.mrb[50].mxu1  ;;  %v1465_v40 = vrot.slane %v6368_v28, %v6326_v15 }
 0x6f0   :  { %v1883_v44 = vpop.f32.mrb[51].mxu0  ;;  %v1924_v45 = vpop.f32.mrb[51].mxu1  ;;  %v1461_v42 = vrot.slane %v6368_v28, %v6335_v50 }
 0x6f1   :  { %v1473_v44 = vrot.slane %v6368_v28, %v6337_v22  ;;  %v1683_v45 = vrot.slane %v6382_v33, %v6335_v50 }
 0x6f2   :  { %1930 = vrot.lane.b32.xlu1 %v1919_v39, %s5792_s5  ;;  %v6397_v39 = vld [vmem:[%s7516_s1 + $0x5] ss:$8 sm:$0xf] }
 0x6f3   :  { %1932 = vrot.lane.b32.xlu0 %v1921_v41, %s5792_s5  ;;  %v1469_v41 = vrot.slane %v6368_v28, %v6328_v48  ;;  %v1818_v24 = vrot.slane %v6397_v39, %v6326_v15 }
 0x6f5   :  { %v2009_v46 = vpop.f32.mrb[52].mxu0  ;;  %v2050_v56 = vpop.f32.mrb[52].mxu1 }
 0x6f6   :  { %2057 = vrot.lane.b32.xlu1 %v2009_v46, %s5793_s6  ;;  %v2011_v57 = vpop.f32.mrb[53].mxu0  ;;  %v2052_v58 = vpop.f32.mrb[53].mxu1  ;;  %v1687_v46 = vrot.slane %v6382_v33, %v6326_v15 }
 0x6f7   :  { %2059 = vrot.lane.b32.xlu0 %v2011_v57, %s5793_s6  ;;  %v2013_v59 = vpop.f32.mrb[54].mxu0  ;;  %v2054_v60 = vpop.f32.mrb[54].mxu1  ;;  %v6420_v57 = vld [vmem:[%s7516_s1 + $0x6] ss:$8 sm:$0xf] }
 0x6f8   :  { %v2014_v61 = vpop.f32.mrb[55].mxu0  ;;  %v2055_v62 = vpop.f32.mrb[55].mxu1  ;;  %v1691_v59 = vrot.slane %v6382_v33, %v6328_v48  ;;  %v1695_v60 = vrot.slane %v6382_v33, %v6337_v22 }
 0x6f9   :  { %v1814_v62 = vrot.slane %v6397_v39, %v6335_v50 }
 0x6fa   :  { %2061 = vrot.lane.b32.xlu1 %v2050_v56, %s5793_s6 }
 0x6fb   :  { %2063 = vrot.lane.b32.xlu0 %v2052_v58, %s5793_s6 }
 0x728   :  { %v6300_v63 = vpop.permute.xlu1 %1052 }
 0x729   :  { %v1055_v0 = vpop.permute.xlu0 %1054 }
 0x72a   :  { %v1065_v43 = vsel %vm1062_vm4, %v6300_v63, %v1055_v0 }
 0x72b   :  { %v1090_v28 = vmul.f32 %v1076_v53, %v1065_v43 }
 0x72c   :  { %v6302_v1 = vpop.permute.xlu1 %1056 }
 0x72d   :  { %v6304_v2 = vpop.permute.xlu0 %1058  ;;  %v1064_v12 = vsel %vm1062_vm4, %v1055_v0, %v6302_v1 }
 0x72e   :  { %v1066_v3 = vsel %vm1062_vm4, %v6304_v2, %v6300_v63  ;;  %v1091_v55 = vmul.f32 %v1080_v54, %v1064_v12 }
 0x730   :  { %v6306_v4 = vpop.permute.xlu1 %1180 }
 0x731   :  { %v1183_v5 = vpop.permute.xlu0 %1182 }
 0x732   :  { %v1191_v58 = vsel %vm1188_vm5, %v6306_v4, %v1183_v5 }
 0x733   :  { %v1217_v51 = vmul.f32 %v1203_v27, %v1191_v58 }
 0x734   :  { %v6308_v6 = vpop.permute.xlu1 %1184 }
 0x735   :  { %v6310_v7 = vpop.permute.xlu0 %1186  ;;  %v1190_v47 = vsel %vm1188_vm5, %v1183_v5, %v6308_v6 }
 0x736   :  { %v1192_v53 = vsel %vm1188_vm5, %v6310_v7, %v6306_v4  ;;  %v1218_v5 = vmul.f32 %v1207_v30, %v1190_v47  ;;  %v1189_v63 = vsel %vm1188_vm5, %v6308_v6, %v6310_v7  ;;  %v1089_v7 = vmul.f32 %v1072_v25, %v1066_v3 }
 0x737   :  { %v1216_v58 = vmul.f32 %v1199_v31, %v1192_v53 }
 0x738   :  { %v6312_v8 = vpop.permute.xlu1 %1311 }
 0x739   :  { %v6314_v9 = vpop.permute.xlu0 %1313 }
 0x73a   :  { %v1322_v21 = vsel %vm1319_vm6, %v6312_v8, %v6314_v9 }
 0x73b   :  { %v1348_v54 = vmul.f32 %v1334_v35, %v1322_v21  ;;  %v1221_v21 = vadd.f32 %v1217_v51, %v1090_v28 }
 0x73c   :  { %v6316_v10 = vpop.permute.xlu1 %1315 }
 0x73d   :  { %v6318_v11 = vpop.permute.xlu0 %1317  ;;  %v1321_v43 = vsel %vm1319_vm6, %v6314_v9, %v6316_v10  ;;  %v1063_v9 = vsel %vm1062_vm4, %v6302_v1, %v6304_v2  ;;  %v1219_v1 = vmul.f32 %v1211_v32, %v1189_v63 }
 0x73e   :  { %v1323_v30 = vsel %vm1319_vm6, %v6318_v11, %v6312_v8  ;;  %v1349_v12 = vmul.f32 %v1338_v36, %v1321_v43  ;;  %v1320_v47 = vsel %vm1319_vm6, %v6316_v10, %v6318_v11  ;;  %v1092_v51 = vmul.f32 %v1084_v26, %v1063_v9 }
 0x73f   :  { %v1347_v3 = vmul.f32 %v1330_v37, %v1323_v30  ;;  %v1352_v11 = vadd.f32 %v1348_v54, %v1221_v21  ;;  %v1350_v32 = vmul.f32 %v1342_v38, %v1320_v47  ;;  %v1949_v36 = vrot.slane %v6420_v57, %v6326_v15 }
 0x740   :  { %v6320_v13 = vpop.permute.xlu1 %1442  ;;  %v1220_v37 = vadd.f32 %v1216_v58, %v1089_v7  ;;  %v1957_v38 = vrot.slane %v6420_v57, %v6337_v22 }
 0x741   :  { %v6322_v14 = vpop.permute.xlu0 %1444 }
 0x742   :  { %v1453_v27 = vsel %vm1450_vm7, %v6320_v13, %v6322_v14  ;;  %v1351_v28 = vadd.f32 %v1347_v3, %v1220_v37 }
 0x743   :  { %v1479_v2 = vmul.f32 %v1465_v40, %v1453_v27 }
 0x744   :  { %v6339_v23 = vpop.permute.xlu1 %1446 }
 0x745   :  { %v6346_v52 = vpop.permute.xlu0 %1448  ;;  %v1452_v6 = vsel %vm1450_vm7, %v6322_v14, %v6339_v23  ;;  %v1222_v14 = vadd.f32 %v1218_v5, %v1091_v55  ;;  %v1483_v55 = vadd.f32 %v1479_v2, %v1352_v11 }
 0x746   :  { %v1454_v8 = vsel %vm1450_vm7, %v6346_v52, %v6320_v13  ;;  %v1480_v25 = vmul.f32 %v1469_v41, %v1452_v6  ;;  %v1451_v31 = vsel %vm1450_vm7, %v6339_v23, %v6346_v52  ;;  %v6508_v13 = vld [vmem:[%s7516_s1 + $0x7] ss:$8 sm:$0xf]  ;;  %v1953_v23 = vrot.slane %v6420_v57, %v6328_v48 }
 0x747   :  { %v1353_v40 = vadd.f32 %v1349_v12, %v1222_v14  ;;  %v1478_v41 = vmul.f32 %v1461_v42, %v1454_v8  ;;  %v1223_v52 = vadd.f32 %v1219_v1, %v1092_v51  ;;  %v1481_v16 = vmul.f32 %v1473_v44, %v1451_v31 }
 0x748   :  { %v2076_v43 = vrot.slane %v6508_v13, %v6335_v50  ;;  %v2080_v44 = vrot.slane %v6508_v13, %v6326_v15  ;;  %v2084_v27 = vrot.slane %v6508_v13, %v6328_v48  ;;  %v2088_v6 = vrot.slane %v6508_v13, %v6337_v22 }
 0x749   :  { %v1484_v5 = vadd.f32 %v1480_v25, %v1353_v40  ;;  %v1354_v63 = vadd.f32 %v1350_v32, %v1223_v52  ;;  %v1482_v9 = vadd.f32 %v1478_v41, %v1351_v28  ;;  %v1574_v58 = vadd.f32 %v6296_v19, %v1483_v55 }
 0x74a   :  { %v7525_v25 = vrot.slane %v6397_v39, %v6337_v22  ;;  %v7526_v15 = vrot.slane %v6420_v57, %v6335_v50 }
 0x74b   :  { %v1485_v7 = vadd.f32 %v1481_v16, %v1354_v63  ;;  %v1575_v21 = vadd.f32 %v6294_v18, %v1484_v5 }
 0x750   :  { %v6370_v29 = vpop.permute.xlu1 %1664 }
 0x751   :  { %v6384_v34 = vpop.permute.xlu0 %1666 }
 0x752   :  { %v1675_v42 = vsel %vm1672_vm8, %v6370_v29, %v6384_v34 }
 0x754   :  { %v6415_v56 = vpop.permute.xlu1 %1668 }
 0x755   :  { %v6429_v61 = vpop.permute.xlu0 %1670  ;;  %v1674_v54 = vsel %vm1672_vm8, %v6384_v34, %v6415_v56 }
 0x756   :  { %v1673_v30 = vsel %vm1672_vm8, %v6415_v56, %v6429_v61  ;;  %v1676_v12 = vsel %vm1672_vm8, %v6429_v61, %v6370_v29  ;;  %v1700_v56 = vmul.f32 %v1683_v45, %v1675_v42  ;;  %v1701_v29 = vmul.f32 %v1687_v46, %v1674_v54 }
 0x757   :  { %v1702_v61 = vmul.f32 %v1691_v59, %v1673_v30  ;;  %v1703_v8 = vmul.f32 %v1695_v60, %v1676_v12 }
 0x758   :  { %v6464_v0 = vpop.permute.xlu1 %1795 }
 0x759   :  { %v1798_v4 = vpop.permute.xlu0 %1797  ;;  %v1706_v51 = vadd.f32 %v1702_v61, %v1575_v21 }
 0x75a   :  { %v1806_v34 = vsel %vm1803_vm9, %v6464_v0, %v1798_v4 }
 0x75b   :  { %v1831_v46 = vmul.f32 %v1814_v62, %v1806_v34  ;;  %v1576_v62 = vadd.f32 %v6298_v20, %v1485_v7  ;;  %v7528_v7 = vmov 0  }
 0x75c   :  { %v1800_v35 = vpop.permute.xlu1 %1799 }
 0x75d   :  { %v1802_v10 = vpop.permute.xlu0 %1801  ;;  %v1805_v1 = vsel %vm1803_vm9, %v1798_v4, %v1800_v35  ;;  %v1573_v4 = vadd.f32 %v6292_v17, %v1482_v9  ;;  %v1707_v13 = vadd.f32 %v1703_v8, %v1576_v62 }
 0x75e   :  { %v1804_v19 = vsel %vm1803_vm9, %v1800_v35, %v1802_v10  ;;  %v1807_v45 = vsel %vm1803_vm9, %v1802_v10, %v6464_v0  ;;  %v1832_v0 = vmul.f32 %v1818_v24, %v1805_v1  ;;  %v7524_v35 = vrot.slane %v6397_v39, %v6328_v48 }
 0x75f   :  { %v1704_v3 = vadd.f32 %v1700_v56, %v1573_v4  ;;  %v1834_v31 = vmul.f32 %v7525_v25, %v1807_v45  ;;  %v1705_v10 = vadd.f32 %v1701_v29, %v1574_v58 }
 0x760   :  { %v1927_v26 = vpop.permute.xlu1 %1926  ;;  %v1833_v14 = vmul.f32 %v7524_v35, %v1804_v19 }
 0x761   :  { %v1929_v53 = vpop.permute.xlu0 %1928  ;;  %v1835_v37 = vadd.f32 %v1831_v46, %v1704_v3  ;;  %v1836_v20 = vadd.f32 %v1832_v0, %v1705_v10  ;;  %v1838_v22 = vadd.f32 %v1834_v31, %v1707_v13 }
 0x762   :  { %v1937_v18 = vsel %vm1934_vm10, %v1927_v26, %v1929_v53  ;;  %v1837_v52 = vadd.f32 %v1833_v14, %v1706_v51 }
 0x763   :  { %v1962_v24 = vmul.f32 %v7526_v15, %v1937_v18 }
 0x764   :  { %v1931_v47 = vpop.permute.xlu1 %1930 }
 0x765   :  { %v1933_v2 = vpop.permute.xlu0 %1932  ;;  %v1936_v59 = vsel %vm1934_vm10, %v1929_v53, %v1931_v47  ;;  %v1966_v39 = vadd.f32 %v1962_v24, %v1835_v37 }
 0x766   :  { %v1935_v17 = vsel %vm1934_vm10, %v1931_v47, %v1933_v2  ;;  %v1938_v33 = vsel %vm1934_vm10, %v1933_v2, %v1927_v26  ;;  %v1963_v11 = vmul.f32 %v1949_v36, %v1936_v59 }
 0x767   :  { %v1964_v40 = vmul.f32 %v1953_v23, %v1935_v17  ;;  %v1965_v41 = vmul.f32 %v1957_v38, %v1938_v33  ;;  %v2101_v17 = vld [vmem:[%s7515_s2 + $0xd0] sm:$0xf] }
 0x768   :  { %v2058_v60 = vpop.permute.xlu1 %2057  ;;  %v1967_v26 = vadd.f32 %v1963_v11, %v1836_v20 }
 0x769   :  { %v2060_v48 = vpop.permute.xlu0 %2059  ;;  %v1968_v23 = vadd.f32 %v1964_v40, %v1837_v52  ;;  %v1969_v38 = vadd.f32 %v1965_v41, %v1838_v22  ;;  %v2418_v40 = vld [vmem:[%s7515_s2 + $0x60] sm:$0xff]  ;;  %v2419_v41 = vld [vmem:[%s7515_s2 + $0x68] sm:$0xff] }
 0x76a   :  { %v2068_v32 = vsel %vm2065_vm11, %v2058_v60, %v2060_v48 }
 0x76b   :  { %v2093_v16 = vmul.f32 %v2076_v43, %v2068_v32 }
 0x76c   :  { %v2062_v55 = vpop.permute.xlu1 %2061 }
 0x76d   :  { %v2067_v50 = vsel %vm2065_vm11, %v2060_v48, %v2062_v55  ;;  %v2064_v57 = vpop.permute.xlu0 %2063  ;;  %v6598_v9 = vadd.f32 %v2093_v16, %v1966_v39 }
 0x76e   :  { %v2094_v28 = vmul.f32 %v2080_v44, %v2067_v50  ;;  %v2066_v36 = vsel %vm2065_vm11, %v2062_v55, %v2064_v57  ;;  %v2069_v5 = vsel %vm2065_vm11, %v2064_v57, %v2058_v60  ;;  %v2420_v50 = vpack.c.bf16 %v2419_v41, %v2418_v40 }
 0x76f   :  { %v2095_v53 = vmul.f32 %v2084_v27, %v2066_v36  ;;  %v2096_v63 = vmul.f32 %v2088_v6, %v2069_v5  ;;  %v7527_v27 = vmov 1.0|1.0   ;;  %v2243_v30 = vmul.f32 %v6598_v9, %v6598_v9 }
 0x770   :  { %v6596_v42 = vadd.f32 %v2094_v28, %v1967_v26 }
 0x771   :  { %v6600_v43 = vadd.f32 %v2095_v53, %v1968_v23  ;;  %v6602_v54 = vadd.f32 %v2096_v63, %v1969_v38 }
 0x772   :  { %2166 = vmatprep.mubr.f32.mxu0 %v6596_v42  ;;  %v2244_v44 = vmul.f32 %v6596_v42, %v6596_v42 }
 0x773   :  { %2167 = vmatmul.mubr.f32.vlgmr.msra.gmra.mrb[56].mxu0 %v6598_v9  ;;  %2236 = vmatprep.mubr.f32.mxu1 %v6602_v54  ;;  %v2246_v49 = vmul.f32 %v6602_v54, %v6602_v54  ;;  %v2245_v6 = vmul.f32 %v6600_v43, %v6600_v43 }
 0x774   :  { %5474 = vmatpush3.bf16.msra.mxu0 %v7527_v27  ;;  %2237 = vmatmul.mubr.f32.vlgmr.msra.gmra.mrb[56].mxu1 %v6600_v43 }
 0x775   :  { %2311 = vmatprep.mubr.f32.mxu0 %v2244_v44  ;;  %5490 = vmatpush3.bf16.msra.mxu1 %v7527_v27 }
 0x776   :  { %2381 = vmatprep.mubr.f32.mxu1 %v2246_v49  ;;  %5475 = vmatprep.subr.bf16.mxu0 %v7527_v27 }
 0x777   :  { %5491 = vmatprep.subr.bf16.mxu1 %v7527_v27 }
 0x778   :  { %5476 = vmatpush3.bf16.msra.mxu0 %v7527_v27 }
 0x779   :  { %5492 = vmatpush3.bf16.msra.mxu1 %v7527_v27  ;;  %5477 = vmatprep.subr.bf16.mxu0 %v7527_v27 }
 0x77a   :  { %5493 = vmatprep.subr.bf16.mxu1 %v7527_v27 }
 0x77c   :  { %5478 = vmatpush3.bf16.msra.mxu0 %v7527_v27 }
 0x77d   :  { %5494 = vmatpush3.bf16.msra.mxu1 %v7527_v27  ;;  %5479 = vmatprep.subr.bf16.mxu0 %v7527_v27 }
 0x77e   :  { %5495 = vmatprep.subr.bf16.mxu1 %v7527_v27 }
 0x780   :  { %5480 = vmatpush3.bf16.msra.mxu0 %v7527_v27 }
 0x781   :  { %5496 = vmatpush3.bf16.msra.mxu1 %v7527_v27  ;;  %5481 = vmatprep.subr.bf16.mxu0 %v7527_v27 }
 0x782   :  { %5497 = vmatprep.subr.bf16.mxu1 %v7527_v27 }
 0x784   :  { %5482 = vmatpush3.bf16.msra.mxu0 %v7527_v27 }
 0x785   :  { %5498 = vmatpush3.bf16.msra.mxu1 %v7527_v27  ;;  %5483 = vmatprep.subr.bf16.mxu0 %v7527_v27 }
 0x786   :  { %5499 = vmatprep.subr.bf16.mxu1 %v7527_v27 }
 0x788   :  { %5484 = vmatpush3.bf16.msra.mxu0 %v7527_v27 }
 0x789   :  { %5500 = vmatpush3.bf16.msra.mxu1 %v7527_v27  ;;  %5485 = vmatprep.subr.bf16.mxu0 %v7527_v27 }
 0x78a   :  { %5501 = vmatprep.subr.bf16.mxu1 %v7527_v27 }
 0x78c   :  { %5486 = vmatpush3.bf16.msra.mxu0 %v7527_v27 }
 0x78d   :  { %5502 = vmatpush3.bf16.msra.mxu1 %v7527_v27  ;;  %5487 = vmatprep.subr.bf16.mxu0 %v7527_v27 }
 0x78e   :  { %5503 = vmatprep.subr.bf16.mxu1 %v7527_v27 }
 0x790   :  { %5488 = vmatpush3.bf16.msra.mxu0 %v7527_v27 }
 0x791   :  { %5504 = vmatpush3.bf16.msra.mxu1 %v7527_v27 }
 0x793   :  { %2312 = vmatmul.mubr.f32.vlgmr.msra.gmra.mrb[58].mxu0 %v2243_v30 }
 0x794   :  { %2382 = vmatmul.mubr.f32.vlgmr.msra.gmra.mrb[58].mxu1 %v2245_v6  ;;  %2472 = vmatprep.mubr.bf16.mxu0 %v7528_v7 }
 0x795   :  { %2515 = vmatprep.mubr.bf16.mxu1 %v7528_v7 }
 0x846   :  { %v4689_v58 = vpop.f32.mrb[56].mxu0 }
 0x847   :  { %v4690_v12 = vpop.f32.mrb[57].mxu0  ;;  %v4724_v34 = vpop.f32.mrb[56].mxu1 }
 0x848   :  { %v4691_v47 = vadd.f32 %v4690_v12, %v4689_v58  ;;  %v4725_v56 = vpop.f32.mrb[57].mxu1 }
 0x849   :  { %v4726_v21 = vadd.f32 %v4725_v56, %v4724_v34 }
 0x84b   :  { %v2239_v1 = vadd.f32 %v4726_v21, %v4691_v47 }
 0x84d   :  { %v2242_v18 = vmul.f32 0.001953125, %v2239_v1 }
 0x84f   :  { %v2388_v46 = vmul.f32 %v2242_v18, %v2242_v18 }
 0x866   :  { %v4759_v19 = vpop.f32.mrb[58].mxu0 }
 0x867   :  { %v4760_v2 = vpop.f32.mrb[59].mxu0  ;;  %v4794_v29 = vpop.f32.mrb[58].mxu1 }
 0x868   :  { %v4761_v61 = vadd.f32 %v4760_v2, %v4759_v19  ;;  %v4795_v45 = vpop.f32.mrb[59].mxu1 }
 0x869   :  { %v4796_v4 = vadd.f32 %v4795_v45, %v4794_v29 }
 0x86b   :  { %v2384_v8 = vadd.f32 %v4796_v4, %v4761_v61 }
 0x86d   :  { %v2387_v59 = vmul.f32 0.001953125, %v2384_v8 }
 0x86f   :  { %v2389_v0 = vsub.f32 %v2387_v59, %v2388_v46 }
 0x871   :  { %v2390_v35 = vmax.f32 %v2389_v0, 0.0 }
 0x873   :  { %v2391_v14 = vadd.f32 1e-05, %v2390_v35 }
 0x875   :  { %5727 = vrsqrt.f32 %v2391_v14 }
 0x87f   :  { %v5728_v33 = vpop.eup %5727 }
 0x880   :  { %v2393_v60 = vmul.f32 %v5728_v33, %v2101_v17 }
 0x882   :  { %2396 = vperm.xlu0 %5713, %v2393_v60   ;;  %v2403_v3 = vmul.f32 %v2393_v60, %v2242_v18 }
 0x884   :  { %2405 = vrot.lane.b32.xlu1 %v2403_v3, %s5786_s26 }
 0x8f6   :  { %v2406_v62 = vpop.permute.xlu1 %2405 }
 0x8f7   :  { %v2408_v25 = vsub.f32 %v2101_v17, %v2406_v62 }
 0x8f9   :  { %2411 = vperm.xlu1 %5712, %v2408_v25  }
 0x8fd   :  { %5714 = vset.pattern.permute.xlu1 %v7528_v7 }
 0x901   :  { %v2397_v31 = vpop.permute.xlu0 %2396 }
 0x902   :  { %v2399_v15 = vmul.f32 %v2397_v31, %v6598_v9  ;;  %v2400_v24 = vmul.f32 %v2397_v31, %v6596_v42  ;;  %v2401_v48 = vmul.f32 %v2397_v31, %v6600_v43  ;;  %v2402_v10 = vmul.f32 %v2397_v31, %v6602_v54 }
 0x978   :  { %v2412_v51 = vpop.permute.xlu1 %2411 }
 0x979   :  { %v2414_v11 = vadd.f32 %v2412_v51, %v2399_v15  ;;  %v2415_v32 = vadd.f32 %v2412_v51, %v2400_v24  ;;  %v2416_v13 = vadd.f32 %v2412_v51, %v2401_v48  ;;  %v2417_v37 = vadd.f32 %v2412_v51, %v2402_v10 }
 0x97b   :  { %v2422_v20 = vpack.c.bf16 %v2415_v32, %v2415_v32  ;;  %v2424_v52 = vpack.c.bf16 %v2417_v37, %v2417_v37  ;;  %v2421_v55 = vpack.c.bf16 %v2414_v11, %v2414_v11  ;;  %v2423_v22 = vpack.c.bf16 %v2416_v13, %v2416_v13 }
 0x97d   :  { %4349 = vmatprep.subr.msk.bf16.mxu0 %vm479_vm1, %v2422_v20  ;;  %4351 = vmatprep.subr.msk.bf16.mxu1 %vm479_vm1, %v2424_v52  ;;  %v2429_v39 = vsel %vm479_vm1, %v2421_v55, 0  ;;  %v2435_v16 = vsel %vm479_vm1, %v2423_v22, 0  ;;  %v2526_v52 = vld [vmem:[%s7515_s2 + $0xd8] sm:$0xff] }
 0x97e   :  { %2441 = vmatpush1.bf16.msra.mxu0 %v2429_v39  ;;  %2484 = vmatpush1.bf16.msra.mxu1 %v2435_v16  ;;  %v2527_v39 = vld [vmem:[%s7515_s2 + $0xe0] sm:$0xff] }
 0x97f   :  { %5505 = vmatprep.subr.bf16.mxu0 %v7527_v27  ;;  %5521 = vmatprep.subr.bf16.mxu1 %v7527_v27 }
 0x981   :  { %4350 = vmatmul.mubr.msk.bf16.vlgmr.msra.gmra.mrb[60].mxu0 %vm475_vm2, %v2420_v50  ;;  %4352 = vmatmul.mubr.msk.bf16.vlgmr.msra.gmra.mrb[60].mxu1 %vm475_vm2, %v2420_v50 }
 0x982   :  { %5506 = vmatpush3.bf16.msra.mxu0 %v7527_v27  ;;  %5522 = vmatpush3.bf16.msra.mxu1 %v7527_v27 }
 0x983   :  { %5507 = vmatprep.subr.bf16.mxu0 %v7527_v27  ;;  %5523 = vmatprep.subr.bf16.mxu1 %v7527_v27 }
 0x986   :  { %5508 = vmatpush3.bf16.msra.mxu0 %v7527_v27  ;;  %5524 = vmatpush3.bf16.msra.mxu1 %v7527_v27 }
 0x987   :  { %5509 = vmatprep.subr.bf16.mxu0 %v7527_v27  ;;  %5525 = vmatprep.subr.bf16.mxu1 %v7527_v27 }
 0x98a   :  { %5510 = vmatpush3.bf16.msra.mxu0 %v7527_v27  ;;  %5526 = vmatpush3.bf16.msra.mxu1 %v7527_v27 }
 0x98b   :  { %5511 = vmatprep.subr.bf16.mxu0 %v7527_v27  ;;  %5527 = vmatprep.subr.bf16.mxu1 %v7527_v27 }
 0x98e   :  { %5512 = vmatpush3.bf16.msra.mxu0 %v7527_v27  ;;  %5528 = vmatpush3.bf16.msra.mxu1 %v7527_v27 }
 0x98f   :  { %5513 = vmatprep.subr.bf16.mxu0 %v7527_v27  ;;  %5529 = vmatprep.subr.bf16.mxu1 %v7527_v27 }
 0x992   :  { %5514 = vmatpush3.bf16.msra.mxu0 %v7527_v27  ;;  %5530 = vmatpush3.bf16.msra.mxu1 %v7527_v27 }
 0x993   :  { %5515 = vmatprep.subr.bf16.mxu0 %v7527_v27  ;;  %5531 = vmatprep.subr.bf16.mxu1 %v7527_v27 }
 0x996   :  { %5516 = vmatpush3.bf16.msra.mxu0 %v7527_v27  ;;  %5532 = vmatpush3.bf16.msra.mxu1 %v7527_v27 }
 0x997   :  { %5517 = vmatprep.subr.bf16.mxu0 %v7527_v27  ;;  %5533 = vmatprep.subr.bf16.mxu1 %v7527_v27 }
 0x99a   :  { %5518 = vmatpush3.bf16.msra.mxu0 %v7527_v27  ;;  %5534 = vmatpush3.bf16.msra.mxu1 %v7527_v27 }
 0x99b   :  { %5519 = vmatprep.subr.bf16.mxu0 %v7527_v27  ;;  %5535 = vmatprep.subr.bf16.mxu1 %v7527_v27 }
 0x99e   :  { %5520 = vmatpush3.bf16.msra.mxu0 %v7527_v27  ;;  %5536 = vmatpush3.bf16.msra.mxu1 %v7527_v27 }
 0x99f   :  { %5537 = vmatprep.subr.bf16.mxu0 %v7527_v27  ;;  %5553 = vmatprep.subr.bf16.mxu1 %v7527_v27 }
 0xa54   :  { %v6703_v57 = vpop.f32.mrb[60].mxu0  ;;  %v6705_v26 = vpop.f32.mrb[60].mxu1 }
 0xa55   :  { %v6707_v28 = vpop.f32.mrb[61].mxu0  ;;  %v6709_v36 = vpop.f32.mrb[61].mxu1  ;;  %v2680_v9 = vmul.f32 %v6703_v57, %v6703_v57  ;;  %v2682_v43 = vmul.f32 %v6705_v26, %v6705_v26 }
 0xa56   :  { %v6711_v5 = vpop.f32.mrb[62].mxu0  ;;  %v6713_v23 = vpop.f32.mrb[62].mxu1  ;;  %2592 = vmatprep.mubr.f32.mxu0 %v6707_v28  ;;  %2667 = vmatprep.mubr.f32.mxu1 %v6709_v36  ;;  %v2681_v63 = vmul.f32 %v6707_v28, %v6707_v28  ;;  %v2683_v42 = vmul.f32 %v6709_v36, %v6709_v36 }
 0xa57   :  { %v6717_v38 = vpop.f32.mrb[63].mxu0  ;;  %v6719_v53 = vpop.f32.mrb[63].mxu1  ;;  %2593 = vmatmul.mubr.f32.vlgmr.msra.gmra.mrb[64].mxu0 %v6703_v57  ;;  %2668 = vmatmul.mubr.f32.vlgmr.msra.gmra.mrb[64].mxu1 %v6705_v26  ;;  %v2684_v49 = vmul.f32 %v6711_v5, %v6711_v5  ;;  %v2686_v30 = vmul.f32 %v6713_v23, %v6713_v23 }
 0xa58   :  { %5538 = vmatpush3.bf16.msra.mxu0 %v7527_v27  ;;  %5554 = vmatpush3.bf16.msra.mxu1 %v7527_v27  ;;  %v2685_v54 = vmul.f32 %v6717_v38, %v6717_v38  ;;  %v2687_v44 = vmul.f32 %v6719_v53, %v6719_v53 }
 0xa59   :  { %2597 = vmatprep.mubr.f32.mxu0 %v6717_v38  ;;  %2672 = vmatprep.mubr.f32.mxu1 %v6719_v53 }
 0xa5a   :  { %5539 = vmatprep.subr.bf16.mxu0 %v7527_v27  ;;  %5555 = vmatprep.subr.bf16.mxu1 %v7527_v27 }
 0xa5b   :  { %2598 = vmatmul.mubr.f32.gmra.mrb[66].mxu0 %v6711_v5  ;;  %2673 = vmatmul.mubr.f32.gmra.mrb[66].mxu1 %v6713_v23 }
 0xa5c   :  { %5540 = vmatpush3.bf16.msra.mxu0 %v7527_v27  ;;  %5556 = vmatpush3.bf16.msra.mxu1 %v7527_v27 }
 0xa5d   :  { %2752 = vmatprep.mubr.f32.mxu0 %v2681_v63  ;;  %2827 = vmatprep.mubr.f32.mxu1 %v2683_v42 }
 0xa5e   :  { %5541 = vmatprep.subr.bf16.mxu0 %v7527_v27  ;;  %5557 = vmatprep.subr.bf16.mxu1 %v7527_v27 }
 0xa60   :  { %5542 = vmatpush3.bf16.msra.mxu0 %v7527_v27  ;;  %5558 = vmatpush3.bf16.msra.mxu1 %v7527_v27 }
 0xa61   :  { %5543 = vmatprep.subr.bf16.mxu0 %v7527_v27  ;;  %5559 = vmatprep.subr.bf16.mxu1 %v7527_v27 }
 0xa64   :  { %5544 = vmatpush3.bf16.msra.mxu0 %v7527_v27  ;;  %5560 = vmatpush3.bf16.msra.mxu1 %v7527_v27 }
 0xa65   :  { %5545 = vmatprep.subr.bf16.mxu0 %v7527_v27  ;;  %5561 = vmatprep.subr.bf16.mxu1 %v7527_v27 }
 0xa68   :  { %5546 = vmatpush3.bf16.msra.mxu0 %v7527_v27  ;;  %5562 = vmatpush3.bf16.msra.mxu1 %v7527_v27 }
 0xa69   :  { %5547 = vmatprep.subr.bf16.mxu0 %v7527_v27  ;;  %5563 = vmatprep.subr.bf16.mxu1 %v7527_v27 }
 0xa6c   :  { %5548 = vmatpush3.bf16.msra.mxu0 %v7527_v27  ;;  %5564 = vmatpush3.bf16.msra.mxu1 %v7527_v27 }
 0xa6d   :  { %5549 = vmatprep.subr.bf16.mxu0 %v7527_v27  ;;  %5565 = vmatprep.subr.bf16.mxu1 %v7527_v27 }
 0xa70   :  { %5550 = vmatpush3.bf16.msra.mxu0 %v7527_v27  ;;  %5566 = vmatpush3.bf16.msra.mxu1 %v7527_v27 }
 0xa71   :  { %5551 = vmatprep.subr.bf16.mxu0 %v7527_v27  ;;  %5567 = vmatprep.subr.bf16.mxu1 %v7527_v27 }
 0xa74   :  { %5552 = vmatpush3.bf16.msra.mxu0 %v7527_v27  ;;  %5568 = vmatpush3.bf16.msra.mxu1 %v7527_v27 }
 0xa77   :  { %2753 = vmatmul.mubr.f32.vlgmr.msra.gmra.mrb[68].mxu0 %v2680_v9  ;;  %2828 = vmatmul.mubr.f32.vlgmr.msra.gmra.mrb[68].mxu1 %v2682_v43  ;;  %v7529_v9 = vmov 1  }
 0xa78   :  { %2757 = vmatprep.mubr.f32.mxu0 %v2685_v54  ;;  %2832 = vmatprep.mubr.f32.mxu1 %v2687_v44 }
 0xa7b   :  { %2758 = vmatmul.mubr.f32.gmra.mrb[70].mxu0 %v2684_v49  ;;  %2833 = vmatmul.mubr.f32.gmra.mrb[70].mxu1 %v2686_v30 }
 0xa7c   :  { %2949 = vmatprep.mubr.bf16.mxu0 %v7528_v7  ;;  %2990 = vmatprep.mubr.bf16.mxu1 %v7528_v7 }
 0xb2a   :  { %v4829_v6 = vpop.f32.mrb[64].mxu0  ;;  %v4867_v58 = vpop.f32.mrb[64].mxu1 }
 0xb2b   :  { %v4830_v12 = vpop.f32.mrb[65].mxu0  ;;  %v4868_v34 = vpop.f32.mrb[65].mxu1 }
 0xb2c   :  { %v4831_v47 = vadd.f32 %v4830_v12, %v4829_v6  ;;  %v4869_v56 = vadd.f32 %v4868_v34, %v4867_v58 }
 0xb2e   :  { %v2670_v21 = vadd.f32 %v4869_v56, %v4831_v47  ;;  %v4832_v1 = vpop.f32.mrb[66].mxu0  ;;  %v4870_v19 = vpop.f32.mrb[66].mxu1 }
 0xb2f   :  { %v4833_v2 = vpop.f32.mrb[67].mxu0  ;;  %v4871_v29 = vpop.f32.mrb[67].mxu1 }
 0xb30   :  { %v4834_v61 = vadd.f32 %v4833_v2, %v4832_v1  ;;  %v4872_v45 = vadd.f32 %v4871_v29, %v4870_v19  ;;  %v2678_v46 = vmul.f32 0.001953125, %v2670_v21 }
 0xb32   :  { %v2675_v18 = vadd.f32 %v4872_v45, %v4834_v61  ;;  %v2840_v3 = vmul.f32 %v2678_v46, %v2678_v46 }
 0xb34   :  { %v2679_v31 = vmul.f32 0.001953125, %v2675_v18 }
 0xb36   :  { %v2841_v11 = vmul.f32 %v2679_v31, %v2679_v31 }
 0xb4a   :  { %v4905_v4 = vpop.f32.mrb[68].mxu0  ;;  %v4943_v8 = vpop.f32.mrb[68].mxu1 }
 0xb4b   :  { %v4906_v59 = vpop.f32.mrb[69].mxu0  ;;  %v4944_v0 = vpop.f32.mrb[69].mxu1 }
 0xb4c   :  { %v4907_v35 = vadd.f32 %v4906_v59, %v4905_v4  ;;  %v4945_v14 = vadd.f32 %v4944_v0, %v4943_v8 }
 0xb4e   :  { %v2830_v17 = vadd.f32 %v4945_v14, %v4907_v35  ;;  %v4908_v33 = vpop.f32.mrb[70].mxu0  ;;  %v4946_v60 = vpop.f32.mrb[70].mxu1 }
 0xb4f   :  { %v4909_v62 = vpop.f32.mrb[71].mxu0  ;;  %v4947_v25 = vpop.f32.mrb[71].mxu1 }
 0xb50   :  { %v2838_v15 = vmul.f32 0.001953125, %v2830_v17  ;;  %v4910_v24 = vadd.f32 %v4909_v62, %v4908_v33  ;;  %v4948_v48 = vadd.f32 %v4947_v25, %v4946_v60 }
 0xb52   :  { %v2842_v10 = vsub.f32 %v2838_v15, %v2840_v3  ;;  %v2835_v51 = vadd.f32 %v4948_v48, %v4910_v24 }
 0xb54   :  { %v2844_v32 = vmax.f32 %v2842_v10, 0.0  ;;  %v2839_v13 = vmul.f32 0.001953125, %v2835_v51 }
 0xb56   :  { %v2846_v37 = vadd.f32 1e-05, %v2844_v32  ;;  %v2843_v40 = vsub.f32 %v2839_v13, %v2841_v11 }
 0xb58   :  { %5729 = vrsqrt.f32 %v2846_v37  ;;  %v2845_v41 = vmax.f32 %v2843_v40, 0.0 }
 0xb5a   :  { %v2847_v20 = vadd.f32 1e-05, %v2845_v41 }
 0xb5c   :  { %5731 = vrsqrt.f32 %v2847_v20 }
 0xb62   :  { %v5730_v55 = vpop.eup %5729 }
 0xb63   :  { %v2850_v22 = vmul.f32 %v5730_v55, %v2526_v52 }
 0xb65   :  { %v2870_v16 = vmul.f32 %v2850_v22, %v2678_v46 }
 0xb66   :  { %v5732_v50 = vpop.eup %5731 }
 0xb67   :  { %2874 = vrot.lane.b32.xlu1 %v2870_v16, %s5786_s26  ;;  %v2851_v63 = vmul.f32 %v5732_v50, %v2527_v39 }
 0xb69   :  { %v2871_v42 = vmul.f32 %v2851_v63, %v2679_v31 }
 0xb6b   :  { %2876 = vrot.lane.b32.xlu0 %v2871_v42, %s5786_s26  ;;  %2854 = vperm.xlu1 %5714, %v2850_v22  }
 0xb6f   :  { %2859 = vperm.xlu0 %5713, %v2851_v63   ;;  %5715 = vset.pattern.permute.xlu1 %v7529_v9 }
 0xb73   :  { %5716 = vset.pattern.permute.xlu0 %v7529_v9 }
 0xbd9   :  { %v2875_v43 = vpop.permute.xlu1 %2874 }
 0xbda   :  { %v2880_v54 = vsub.f32 %v2526_v52, %v2875_v43 }
 0xbdc   :  { %2884 = vperm.xlu1 %5715, %v2880_v54  }
 0xbdd   :  { %v2877_v44 = vpop.permute.xlu0 %2876 }
 0xbde   :  { %v2881_v49 = vsub.f32 %v2527_v39, %v2877_v44 }
 0xbe0   :  { %2889 = vperm.xlu0 %5716, %v2881_v49   ;;  %5717 = vset.pattern.permute.xlu1 %v7528_v7 }
 0xbea   :  { %v2855_v30 = vpop.permute.xlu1 %2854 }
 0xbeb   :  { %v2862_v6 = vmul.f32 %v2855_v30, %v6703_v57  ;;  %v2863_v58 = vmul.f32 %v2855_v30, %v6707_v28  ;;  %v2864_v12 = vmul.f32 %v2855_v30, %v6705_v26  ;;  %v2865_v34 = vmul.f32 %v2855_v30, %v6709_v36 }
 0xbee   :  { %v2860_v47 = vpop.permute.xlu0 %2859 }
 0xbef   :  { %v2866_v29 = vmul.f32 %v2860_v47, %v6711_v5  ;;  %v2867_v61 = vmul.f32 %v2860_v47, %v6717_v38  ;;  %v2868_v45 = vmul.f32 %v2860_v47, %v6713_v23  ;;  %v2869_v57 = vmul.f32 %v2860_v47, %v6719_v53  ;;  %v2908_v5 = vld [vmem:[%s7515_s2 + $0x70] sm:$0xf]  ;;  %v2999_v47 = vld [vmem:[%s7515_s2 + $0xe8] sm:$0xf] }
 0xbf0   :  { %v2909_v3 = vpack.c.bf16 %v2908_v5, %v2908_v5 }
 0xc5b   :  { %v2885_v56 = vpop.permute.xlu1 %2884 }
 0xc5c   :  { %v2892_v21 = vadd.f32 %v2885_v56, %v2862_v6  ;;  %v2893_v1 = vadd.f32 %v2885_v56, %v2863_v58  ;;  %v2894_v19 = vadd.f32 %v2885_v56, %v2864_v12  ;;  %v2895_v2 = vadd.f32 %v2885_v56, %v2865_v34 }
 0xc5e   :  { %v2900_v36 = vmax.f32 %v2892_v21, 0.0  ;;  %v2902_v46 = vmax.f32 %v2894_v19, 0.0  ;;  %v2901_v59 = vmax.f32 %v2893_v1, 0.0  ;;  %v2903_v0 = vmax.f32 %v2895_v2, 0.0 }
 0xc5f   :  { %v2890_v18 = vpop.permute.xlu0 %2889 }
 0xc60   :  { %v2896_v28 = vadd.f32 %v2890_v18, %v2866_v29  ;;  %v2897_v4 = vadd.f32 %v2890_v18, %v2867_v61  ;;  %v2898_v26 = vadd.f32 %v2890_v18, %v2868_v45  ;;  %v2899_v8 = vadd.f32 %v2890_v18, %v2869_v57 }
 0xc62   :  { %v2904_v35 = vmax.f32 %v2896_v28, 0.0  ;;  %v2906_v14 = vmax.f32 %v2898_v26, 0.0  ;;  %v2905_v17 = vmax.f32 %v2897_v4, 0.0  ;;  %v2907_v33 = vmax.f32 %v2899_v8, 0.0 }
 0xc64   :  { %v2911_v23 = vpack.c.bf16 %v2905_v17, %v2901_v59  ;;  %v2913_v38 = vpack.c.bf16 %v2907_v33, %v2903_v0  ;;  %v2910_v53 = vpack.c.bf16 %v2904_v35, %v2900_v36  ;;  %v2912_v60 = vpack.c.bf16 %v2906_v14, %v2902_v46  ;;  %v3316_v46 = vld [vmem:[%s7515_s2 + $0x78] sm:$0xff]  ;;  %v3317_v59 = vld [vmem:[%s7515_s2 + $0x80] sm:$0xff] }
 0xc66   :  { %2917 = vmatprep.subr.bf16.mxu0 %v2911_v23  ;;  %2958 = vmatprep.subr.bf16.mxu1 %v2913_v38  ;;  %v3324_v23 = vpack.c.bf16 %v3317_v59, %v3316_v46  ;;  %v3318_v38 = vld [vmem:[%s7515_s2 + $0x88] sm:$0xff] }
 0xc67   :  { %2918 = vmatpush1.bf16.msra.mxu0 %v2910_v53  ;;  %2959 = vmatpush1.bf16.msra.mxu1 %v2912_v60  ;;  %v3319_v53 = vld [vmem:[%s7515_s2 + $0x90] sm:$0xff] }
 0xc68   :  { %5569 = vmatprep.subr.bf16.mxu0 %v7527_v27  ;;  %5585 = vmatprep.subr.bf16.mxu1 %v7527_v27  ;;  %v3325_v60 = vpack.c.bf16 %v3319_v53, %v3318_v38 }
 0xc6a   :  { %4353 = vmatmul.mubr.msk.bf16.vlgmr.msra.gmra.mrb[72].mxu0 %vm966_vm3, %v2909_v3  ;;  %4354 = vmatmul.mubr.msk.bf16.vlgmr.msra.gmra.mrb[72].mxu1 %vm966_vm3, %v2909_v3  ;;  %v3320_v3 = vld [vmem:[%s7515_s2 + $0x98] sm:$0xff] }
 0xc6b   :  { %5570 = vmatpush3.bf16.msra.mxu0 %v7527_v27  ;;  %5586 = vmatpush3.bf16.msra.mxu1 %v7527_v27 }
 0xc6c   :  { %5571 = vmatprep.subr.bf16.mxu0 %v7527_v27  ;;  %5587 = vmatprep.subr.bf16.mxu1 %v7527_v27 }
 0xc6f   :  { %5572 = vmatpush3.bf16.msra.mxu0 %v7527_v27  ;;  %5588 = vmatpush3.bf16.msra.mxu1 %v7527_v27 }
 0xc70   :  { %5573 = vmatprep.subr.bf16.mxu0 %v7527_v27  ;;  %5589 = vmatprep.subr.bf16.mxu1 %v7527_v27 }
 0xc73   :  { %5574 = vmatpush3.bf16.msra.mxu0 %v7527_v27  ;;  %5590 = vmatpush3.bf16.msra.mxu1 %v7527_v27 }
 0xc74   :  { %5575 = vmatprep.subr.bf16.mxu0 %v7527_v27  ;;  %5591 = vmatprep.subr.bf16.mxu1 %v7527_v27 }
 0xc77   :  { %5576 = vmatpush3.bf16.msra.mxu0 %v7527_v27  ;;  %5592 = vmatpush3.bf16.msra.mxu1 %v7527_v27 }
 0xc78   :  { %5577 = vmatprep.subr.bf16.mxu0 %v7527_v27  ;;  %5593 = vmatprep.subr.bf16.mxu1 %v7527_v27 }
 0xc7b   :  { %5578 = vmatpush3.bf16.msra.mxu0 %v7527_v27  ;;  %5594 = vmatpush3.bf16.msra.mxu1 %v7527_v27 }
 0xc7c   :  { %5579 = vmatprep.subr.bf16.mxu0 %v7527_v27  ;;  %5595 = vmatprep.subr.bf16.mxu1 %v7527_v27 }
 0xc7f   :  { %5580 = vmatpush3.bf16.msra.mxu0 %v7527_v27  ;;  %5596 = vmatpush3.bf16.msra.mxu1 %v7527_v27 }
 0xc80   :  { %5581 = vmatprep.subr.bf16.mxu0 %v7527_v27  ;;  %5597 = vmatprep.subr.bf16.mxu1 %v7527_v27 }
 0xc83   :  { %5582 = vmatpush3.bf16.msra.mxu0 %v7527_v27  ;;  %5598 = vmatpush3.bf16.msra.mxu1 %v7527_v27 }
 0xc84   :  { %5583 = vmatprep.subr.bf16.mxu0 %v7527_v27  ;;  %5599 = vmatprep.subr.bf16.mxu1 %v7527_v27 }
 0xc87   :  { %5584 = vmatpush3.bf16.msra.mxu0 %v7527_v27  ;;  %5600 = vmatpush3.bf16.msra.mxu1 %v7527_v27 }
 0xc88   :  { %5601 = vmatprep.subr.bf16.mxu0 %v7527_v27  ;;  %5617 = vmatprep.subr.bf16.mxu1 %v7527_v27 }
 0xd3d   :  { %v6833_v62 = vpop.f32.mrb[72].mxu0  ;;  %v6835_v25 = vpop.f32.mrb[72].mxu1 }
 0xd3e   :  { %v6837_v31 = vpop.f32.mrb[73].mxu0  ;;  %v6839_v15 = vpop.f32.mrb[73].mxu1  ;;  %v3141_v13 = vmul.f32 %v6833_v62, %v6833_v62  ;;  %v3143_v37 = vmul.f32 %v6835_v25, %v6835_v25 }
 0xd3f   :  { %v3142_v24 = vmul.f32 %v6837_v31, %v6837_v31  ;;  %v3144_v48 = vmul.f32 %v6839_v15, %v6839_v15  ;;  %3064 = vmatprep.mubr.f32.mxu0 %v6837_v31  ;;  %3134 = vmatprep.mubr.f32.mxu1 %v6839_v15  ;;  %v2955_v10 = vpop.f32.mrb[74].mxu0  ;;  %v2996_v51 = vpop.f32.mrb[74].mxu1 }
 0xd40   :  { %3065 = vmatmul.mubr.f32.vlgmr.msra.gmra.mrb[76].mxu0 %v6833_v62  ;;  %3135 = vmatmul.mubr.f32.vlgmr.msra.gmra.mrb[76].mxu1 %v6835_v25  ;;  %v2956_v11 = vpop.f32.mrb[75].mxu0  ;;  %v2997_v32 = vpop.f32.mrb[75].mxu1 }
 0xd41   :  { %5602 = vmatpush3.bf16.msra.mxu0 %v7527_v27  ;;  %5618 = vmatpush3.bf16.msra.mxu1 %v7527_v27 }
 0xd42   :  { %5603 = vmatprep.subr.bf16.mxu0 %v7527_v27  ;;  %5619 = vmatprep.subr.bf16.mxu1 %v7527_v27 }
 0xd43   :  { %3209 = vmatprep.mubr.f32.mxu0 %v3142_v24  ;;  %3279 = vmatprep.mubr.f32.mxu1 %v3144_v48 }
 0xd45   :  { %5604 = vmatpush3.bf16.msra.mxu0 %v7527_v27  ;;  %5620 = vmatpush3.bf16.msra.mxu1 %v7527_v27 }
 0xd46   :  { %5605 = vmatprep.subr.bf16.mxu0 %v7527_v27  ;;  %5621 = vmatprep.subr.bf16.mxu1 %v7527_v27 }
 0xd49   :  { %5606 = vmatpush3.bf16.msra.mxu0 %v7527_v27  ;;  %5622 = vmatpush3.bf16.msra.mxu1 %v7527_v27 }
 0xd4a   :  { %5607 = vmatprep.subr.bf16.mxu0 %v7527_v27  ;;  %5623 = vmatprep.subr.bf16.mxu1 %v7527_v27 }
 0xd4d   :  { %5608 = vmatpush3.bf16.msra.mxu0 %v7527_v27  ;;  %5624 = vmatpush3.bf16.msra.mxu1 %v7527_v27 }
 0xd4e   :  { %5609 = vmatprep.subr.bf16.mxu0 %v7527_v27  ;;  %5625 = vmatprep.subr.bf16.mxu1 %v7527_v27 }
 0xd51   :  { %5610 = vmatpush3.bf16.msra.mxu0 %v7527_v27  ;;  %5626 = vmatpush3.bf16.msra.mxu1 %v7527_v27 }
 0xd52   :  { %5611 = vmatprep.subr.bf16.mxu0 %v7527_v27  ;;  %5627 = vmatprep.subr.bf16.mxu1 %v7527_v27 }
 0xd55   :  { %5612 = vmatpush3.bf16.msra.mxu0 %v7527_v27  ;;  %5628 = vmatpush3.bf16.msra.mxu1 %v7527_v27 }
 0xd56   :  { %5613 = vmatprep.subr.bf16.mxu0 %v7527_v27  ;;  %5629 = vmatprep.subr.bf16.mxu1 %v7527_v27 }
 0xd59   :  { %5614 = vmatpush3.bf16.msra.mxu0 %v7527_v27  ;;  %5630 = vmatpush3.bf16.msra.mxu1 %v7527_v27 }
 0xd5a   :  { %5615 = vmatprep.subr.bf16.mxu0 %v7527_v27  ;;  %5631 = vmatprep.subr.bf16.mxu1 %v7527_v27 }
 0xd5d   :  { %5616 = vmatpush3.bf16.msra.mxu0 %v7527_v27  ;;  %5632 = vmatpush3.bf16.msra.mxu1 %v7527_v27 }
 0xd60   :  { %3210 = vmatmul.mubr.f32.vlgmr.msra.gmra.mrb[78].mxu0 %v3141_v13  ;;  %3280 = vmatmul.mubr.f32.vlgmr.msra.gmra.mrb[78].mxu1 %v3143_v37 }
 0xd61   :  { %3388 = vmatprep.mubr.bf16.mxu0 %v7528_v7  ;;  %3461 = vmatprep.mubr.bf16.mxu1 %v7528_v7 }
 0xe13   :  { %v4981_v40 = vpop.f32.mrb[76].mxu0  ;;  %v5016_v41 = vpop.f32.mrb[76].mxu1 }
 0xe14   :  { %v4982_v20 = vpop.f32.mrb[77].mxu0  ;;  %v5017_v52 = vpop.f32.mrb[77].mxu1 }
 0xe15   :  { %v4983_v55 = vadd.f32 %v4982_v20, %v4981_v40  ;;  %v5018_v22 = vadd.f32 %v5017_v52, %v5016_v41 }
 0xe17   :  { %v3137_v39 = vadd.f32 %v5018_v22, %v4983_v55 }
 0xe19   :  { %v3140_v43 = vmul.f32 0.001953125, %v3137_v39 }
 0xe1b   :  { %v3286_v30 = vmul.f32 %v3140_v43, %v3140_v43 }
 0xe33   :  { %v5051_v16 = vpop.f32.mrb[78].mxu0  ;;  %v5086_v50 = vpop.f32.mrb[78].mxu1 }
 0xe34   :  { %v5052_v63 = vpop.f32.mrb[79].mxu0  ;;  %v5087_v42 = vpop.f32.mrb[79].mxu1 }
 0xe35   :  { %v5053_v54 = vadd.f32 %v5052_v63, %v5051_v16  ;;  %v5088_v44 = vadd.f32 %v5087_v42, %v5086_v50 }
 0xe37   :  { %v3282_v49 = vadd.f32 %v5088_v44, %v5053_v54 }
 0xe39   :  { %v3285_v6 = vmul.f32 0.001953125, %v3282_v49 }
 0xe3b   :  { %v3287_v58 = vsub.f32 %v3285_v6, %v3286_v30 }
 0xe3d   :  { %v3288_v12 = vmax.f32 %v3287_v58, 0.0 }
 0xe3f   :  { %v3289_v34 = vadd.f32 1e-05, %v3288_v12 }
 0xe41   :  { %5733 = vrsqrt.f32 %v3289_v34 }
 0xe4b   :  { %v5734_v56 = vpop.eup %5733 }
 0xe4c   :  { %v3291_v21 = vmul.f32 %v5734_v56, %v2999_v47 }
 0xe4e   :  { %v3301_v1 = vmul.f32 %v3291_v21, %v3140_v43 }
 0xe50   :  { %3303 = vrot.lane.b32.xlu1 %v3301_v1, %s5786_s26 }
 0xe54   :  { %3294 = vperm.xlu1 %5717, %v3291_v21  }
 0xec2   :  { %v3304_v19 = vpop.permute.xlu1 %3303 }
 0xec3   :  { %v3306_v2 = vsub.f32 %v2999_v47, %v3304_v19 }
 0xec5   :  { %3309 = vperm.xlu0 %5716, %v3306_v2  }
 0xec9   :  { %5718 = vset.pattern.permute.xlu0 %v7528_v7 }
 0xed3   :  { %v3295_v29 = vpop.permute.xlu1 %3294 }
 0xed4   :  { %v3297_v61 = vmul.f32 %v3295_v29, %v6833_v62  ;;  %v3298_v45 = vmul.f32 %v3295_v29, %v6837_v31  ;;  %v3299_v57 = vmul.f32 %v3295_v29, %v6835_v25  ;;  %v3300_v18 = vmul.f32 %v3295_v29, %v6839_v15  ;;  %v3321_v62 = vld [vmem:[%s7515_s2 + $0xa0] sm:$0xff]  ;;  %v3322_v31 = vld [vmem:[%s7515_s2 + $0xa8] sm:$0xff]  ;;  %v3323_v15 = vld [vmem:[%s7515_s2 + $0xb0] sm:$0xff] }
 0xed5   :  { %v3326_v25 = vpack.c.bf16 %v3321_v62, %v3320_v3  ;;  %v3327_v24 = vpack.c.bf16 %v3323_v15, %v3322_v31 }
 0xf44   :  { %v3310_v28 = vpop.permute.xlu0 %3309 }
 0xf45   :  { %v3312_v4 = vadd.f32 %v3310_v28, %v3297_v61  ;;  %v3313_v26 = vadd.f32 %v3310_v28, %v3298_v45  ;;  %v3314_v8 = vadd.f32 %v3310_v28, %v3299_v57  ;;  %v3315_v36 = vadd.f32 %v3310_v28, %v3300_v18 }
 0xf47   :  { %v3329_v0 = vpack.c.bf16 %v3313_v26, %v3313_v26  ;;  %v3331_v35 = vpack.c.bf16 %v3315_v36, %v3315_v36  ;;  %v3328_v14 = vpack.c.bf16 %v3312_v4, %v3312_v4  ;;  %v3330_v17 = vpack.c.bf16 %v3314_v8, %v3314_v8 }
 0xf49   :  { %4355 = vmatprep.subr.msk.bf16.mxu0 %vm479_vm1, %v3329_v0  ;;  %4360 = vmatprep.subr.msk.bf16.mxu1 %vm479_vm1, %v3331_v35  ;;  %v3345_v33 = vsel %vm479_vm1, %v3328_v14, 0  ;;  %v3351_v5 = vsel %vm479_vm1, %v3330_v17, 0 }
 0xf4a   :  { %3357 = vmatpush1.bf16.msra.mxu0 %v3345_v33  ;;  %3430 = vmatpush1.bf16.msra.mxu1 %v3351_v5 }
 0xf4b   :  { %5633 = vmatprep.subr.bf16.mxu0 %v7527_v27  ;;  %5649 = vmatprep.subr.bf16.mxu1 %v7527_v27 }
 0xf4d   :  { %4356 = vmatmul.mubr.msk.bf16.vlgmr.msra.gmra.mrb[80].mxu0 %vm475_vm2, %v3324_v23  ;;  %4361 = vmatmul.mubr.msk.bf16.vlgmr.msra.gmra.mrb[80].mxu1 %vm475_vm2, %v3324_v23 }
 0xf4e   :  { %3398 = vmatprep.mubr.bf16.mxu0 %v7528_v7  ;;  %3471 = vmatprep.mubr.bf16.mxu1 %v7528_v7 }
 0xf4f   :  { %5634 = vmatpush3.bf16.msra.mxu0 %v7527_v27  ;;  %5650 = vmatpush3.bf16.msra.mxu1 %v7527_v27 }
 0xf50   :  { %5635 = vmatprep.subr.bf16.mxu0 %v7527_v27  ;;  %5651 = vmatprep.subr.bf16.mxu1 %v7527_v27 }
 0xf53   :  { %5636 = vmatpush3.bf16.msra.mxu0 %v7527_v27  ;;  %5652 = vmatpush3.bf16.msra.mxu1 %v7527_v27 }
 0xf54   :  { %5637 = vmatprep.subr.bf16.mxu0 %v7527_v27  ;;  %5653 = vmatprep.subr.bf16.mxu1 %v7527_v27 }
 0xf55   :  { %4357 = vmatmul.mubr.msk.bf16.gmra.mrb[84].mxu0 %vm475_vm2, %v3325_v60  ;;  %4362 = vmatmul.mubr.msk.bf16.gmra.mrb[84].mxu1 %vm475_vm2, %v3325_v60 }
 0xf56   :  { %3408 = vmatprep.mubr.bf16.mxu0 %v7528_v7  ;;  %3481 = vmatprep.mubr.bf16.mxu1 %v7528_v7 }
 0xf57   :  { %5638 = vmatpush3.bf16.msra.mxu0 %v7527_v27  ;;  %5654 = vmatpush3.bf16.msra.mxu1 %v7527_v27 }
 0xf58   :  { %5639 = vmatprep.subr.bf16.mxu0 %v7527_v27  ;;  %5655 = vmatprep.subr.bf16.mxu1 %v7527_v27 }
 0xf5b   :  { %5640 = vmatpush3.bf16.msra.mxu0 %v7527_v27  ;;  %5656 = vmatpush3.bf16.msra.mxu1 %v7527_v27 }
 0xf5c   :  { %5641 = vmatprep.subr.bf16.mxu0 %v7527_v27  ;;  %5657 = vmatprep.subr.bf16.mxu1 %v7527_v27 }
 0xf5d   :  { %4358 = vmatmul.mubr.msk.bf16.gmra.mrb[88].mxu0 %vm475_vm2, %v3326_v25  ;;  %4363 = vmatmul.mubr.msk.bf16.gmra.mrb[88].mxu1 %vm475_vm2, %v3326_v25 }
 0xf5e   :  { %3418 = vmatprep.mubr.bf16.mxu0 %v7528_v7  ;;  %3491 = vmatprep.mubr.bf16.mxu1 %v7528_v7 }
 0xf5f   :  { %5642 = vmatpush3.bf16.msra.mxu0 %v7527_v27  ;;  %5658 = vmatpush3.bf16.msra.mxu1 %v7527_v27 }
 0xf60   :  { %5643 = vmatprep.subr.bf16.mxu0 %v7527_v27  ;;  %5659 = vmatprep.subr.bf16.mxu1 %v7527_v27 }
 0xf63   :  { %5644 = vmatpush3.bf16.msra.mxu0 %v7527_v27  ;;  %5660 = vmatpush3.bf16.msra.mxu1 %v7527_v27 }
 0xf64   :  { %5645 = vmatprep.subr.bf16.mxu0 %v7527_v27  ;;  %5661 = vmatprep.subr.bf16.mxu1 %v7527_v27 }
 0xf65   :  { %4359 = vmatmul.mubr.msk.bf16.gmra.mrb[92].mxu0 %vm475_vm2, %v3327_v24  ;;  %4364 = vmatmul.mubr.msk.bf16.gmra.mrb[92].mxu1 %vm475_vm2, %v3327_v24 }
 0xf67   :  { %5646 = vmatpush3.bf16.msra.mxu0 %v7527_v27  ;;  %5662 = vmatpush3.bf16.msra.mxu1 %v7527_v27 }
 0xf68   :  { %5647 = vmatprep.subr.bf16.mxu0 %v7527_v27  ;;  %5663 = vmatprep.subr.bf16.mxu1 %v7527_v27 }
 0xf6b   :  { %5648 = vmatpush3.bf16.msra.mxu0 %v7527_v27  ;;  %5664 = vmatpush3.bf16.msra.mxu1 %v7527_v27 }
 0xf6c   :  { %5665 = vmatprep.subr.bf16.mxu0 %v7527_v27  ;;  %5681 = vmatprep.subr.bf16.mxu1 %v7527_v27 }
0x1020   :  { %v6970_v7 = vpop.f32.mrb[80].mxu0  ;;  %v6972_v48 = vpop.f32.mrb[80].mxu1 }
0x1021   :  { %v6974_v10 = vpop.f32.mrb[81].mxu0  ;;  %v6976_v51 = vpop.f32.mrb[81].mxu1  ;;  %v3728_v29 = vmul.f32 %v6970_v7, %v6970_v7  ;;  %v3730_v61 = vmul.f32 %v6972_v48, %v6972_v48 }
0x1022   :  { %3574 = vmatprep.mubr.f32.mxu0 %v6974_v10  ;;  %3679 = vmatprep.mubr.f32.mxu1 %v6976_v51  ;;  %v6980_v11 = vpop.f32.mrb[82].mxu0  ;;  %v6982_v32 = vpop.f32.mrb[82].mxu1  ;;  %v3729_v19 = vmul.f32 %v6974_v10, %v6974_v10  ;;  %v3731_v2 = vmul.f32 %v6976_v51, %v6976_v51 }
0x1023   :  { %3575 = vmatmul.mubr.f32.vlgmr.msra.gmra.mrb[96].mxu0 %v6970_v7  ;;  %3680 = vmatmul.mubr.f32.vlgmr.msra.gmra.mrb[96].mxu1 %v6972_v48  ;;  %v6986_v13 = vpop.f32.mrb[83].mxu0  ;;  %v6988_v37 = vpop.f32.mrb[83].mxu1  ;;  %v3732_v18 = vmul.f32 %v6980_v11, %v6980_v11 }
0x1024   :  { %5666 = vmatpush3.bf16.msra.mxu0 %v7527_v27  ;;  %5682 = vmatpush3.bf16.msra.mxu1 %v7527_v27  ;;  %v3733_v45 = vmul.f32 %v6986_v13, %v6986_v13  ;;  %v3735_v57 = vmul.f32 %v6988_v37, %v6988_v37 }
0x1025   :  { %3579 = vmatprep.mubr.f32.mxu0 %v6986_v13  ;;  %3684 = vmatprep.mubr.f32.mxu1 %v6988_v37 }
0x1026   :  { %5667 = vmatprep.subr.bf16.mxu0 %v7527_v27  ;;  %5683 = vmatprep.subr.bf16.mxu1 %v7527_v27 }
0x1027   :  { %3580 = vmatmul.mubr.f32.gmra.mrb[98].mxu0 %v6980_v11  ;;  %3685 = vmatmul.mubr.f32.gmra.mrb[98].mxu1 %v6982_v32 }
0x1028   :  { %v6998_v40 = vpop.f32.mrb[84].mxu0  ;;  %v7000_v41 = vpop.f32.mrb[84].mxu1  ;;  %5668 = vmatpush3.bf16.msra.mxu0 %v7527_v27  ;;  %5684 = vmatpush3.bf16.msra.mxu1 %v7527_v27 }
0x1029   :  { %v7004_v20 = vpop.f32.mrb[85].mxu0  ;;  %v7006_v52 = vpop.f32.mrb[85].mxu1  ;;  %5669 = vmatprep.subr.bf16.mxu0 %v7527_v27  ;;  %5685 = vmatprep.subr.bf16.mxu1 %v7527_v27  ;;  %v3736_v26 = vmul.f32 %v6998_v40, %v6998_v40  ;;  %v3738_v8 = vmul.f32 %v7000_v41, %v7000_v41 }
0x102a   :  { %3584 = vmatprep.mubr.f32.mxu0 %v7004_v20  ;;  %3689 = vmatprep.mubr.f32.mxu1 %v7006_v52  ;;  %v7012_v55 = vpop.f32.mrb[86].mxu0  ;;  %v7014_v22 = vpop.f32.mrb[86].mxu1  ;;  %v3737_v28 = vmul.f32 %v7004_v20, %v7004_v20  ;;  %v3739_v4 = vmul.f32 %v7006_v52, %v7006_v52 }
0x102b   :  { %3585 = vmatmul.mubr.f32.gmra.mrb[100].mxu0 %v6998_v40  ;;  %3690 = vmatmul.mubr.f32.gmra.mrb[100].mxu1 %v7000_v41  ;;  %v7018_v39 = vpop.f32.mrb[87].mxu0  ;;  %v7020_v16 = vpop.f32.mrb[87].mxu1  ;;  %v3740_v59 = vmul.f32 %v7012_v55, %v7012_v55  ;;  %v3742_v0 = vmul.f32 %v7014_v22, %v7014_v22 }
0x102c   :  { %5670 = vmatpush3.bf16.msra.mxu0 %v7527_v27  ;;  %5686 = vmatpush3.bf16.msra.mxu1 %v7527_v27  ;;  %v3741_v36 = vmul.f32 %v7018_v39, %v7018_v39  ;;  %v3743_v46 = vmul.f32 %v7020_v16, %v7020_v16 }
0x102d   :  { %3589 = vmatprep.mubr.f32.mxu0 %v7018_v39  ;;  %3694 = vmatprep.mubr.f32.mxu1 %v7020_v16 }
0x102e   :  { %5671 = vmatprep.subr.bf16.mxu0 %v7527_v27  ;;  %5687 = vmatprep.subr.bf16.mxu1 %v7527_v27 }
0x102f   :  { %3590 = vmatmul.mubr.f32.gmra.mrb[102].mxu0 %v7012_v55  ;;  %3695 = vmatmul.mubr.f32.gmra.mrb[102].mxu1 %v7014_v22 }
0x1030   :  { %v7030_v50 = vpop.f32.mrb[88].mxu0  ;;  %v7032_v63 = vpop.f32.mrb[88].mxu1  ;;  %5672 = vmatpush3.bf16.msra.mxu0 %v7527_v27  ;;  %5688 = vmatpush3.bf16.msra.mxu1 %v7527_v27 }
0x1031   :  { %v7036_v42 = vpop.f32.mrb[89].mxu0  ;;  %v7038_v43 = vpop.f32.mrb[89].mxu1  ;;  %5673 = vmatprep.subr.bf16.mxu0 %v7527_v27  ;;  %5689 = vmatprep.subr.bf16.mxu1 %v7527_v27  ;;  %v3744_v17 = vmul.f32 %v7030_v50, %v7030_v50  ;;  %v3746_v33 = vmul.f32 %v7032_v63, %v7032_v63 }
0x1032   :  { %3594 = vmatprep.mubr.f32.mxu0 %v7036_v42  ;;  %3699 = vmatprep.mubr.f32.mxu1 %v7038_v43  ;;  %v7044_v54 = vpop.f32.mrb[90].mxu0  ;;  %v7046_v44 = vpop.f32.mrb[90].mxu1  ;;  %v3745_v35 = vmul.f32 %v7036_v42, %v7036_v42  ;;  %v3747_v14 = vmul.f32 %v7038_v43, %v7038_v43 }
0x1033   :  { %3595 = vmatmul.mubr.f32.gmra.mrb[104].mxu0 %v7030_v50  ;;  %3700 = vmatmul.mubr.f32.gmra.mrb[104].mxu1 %v7032_v63  ;;  %v7050_v49 = vpop.f32.mrb[91].mxu0  ;;  %v7052_v30 = vpop.f32.mrb[91].mxu1  ;;  %v3748_v38 = vmul.f32 %v7044_v54, %v7044_v54  ;;  %v3750_v53 = vmul.f32 %v7046_v44, %v7046_v44 }
0x1034   :  { %5674 = vmatpush3.bf16.msra.mxu0 %v7527_v27  ;;  %5690 = vmatpush3.bf16.msra.mxu1 %v7527_v27  ;;  %v3749_v5 = vmul.f32 %v7050_v49, %v7050_v49  ;;  %v3751_v23 = vmul.f32 %v7052_v30, %v7052_v30 }
0x1035   :  { %3599 = vmatprep.mubr.f32.mxu0 %v7050_v49  ;;  %3704 = vmatprep.mubr.f32.mxu1 %v7052_v30 }
0x1036   :  { %5675 = vmatprep.subr.bf16.mxu0 %v7527_v27  ;;  %5691 = vmatprep.subr.bf16.mxu1 %v7527_v27 }
0x1037   :  { %3600 = vmatmul.mubr.f32.gmra.mrb[106].mxu0 %v7044_v54  ;;  %3705 = vmatmul.mubr.f32.gmra.mrb[106].mxu1 %v7046_v44 }
0x1038   :  { %v7062_v6 = vpop.f32.mrb[92].mxu0  ;;  %v7064_v58 = vpop.f32.mrb[92].mxu1  ;;  %5676 = vmatpush3.bf16.msra.mxu0 %v7527_v27  ;;  %5692 = vmatpush3.bf16.msra.mxu1 %v7527_v27 }
0x1039   :  { %v7068_v12 = vpop.f32.mrb[93].mxu0  ;;  %v7070_v34 = vpop.f32.mrb[93].mxu1  ;;  %5677 = vmatprep.subr.bf16.mxu0 %v7527_v27  ;;  %5693 = vmatprep.subr.bf16.mxu1 %v7527_v27  ;;  %v3752_v62 = vmul.f32 %v7062_v6, %v7062_v6  ;;  %v3754_v25 = vmul.f32 %v7064_v58, %v7064_v58 }
0x103a   :  { %3604 = vmatprep.mubr.f32.mxu0 %v7068_v12  ;;  %3709 = vmatprep.mubr.f32.mxu1 %v7070_v34  ;;  %v7076_v47 = vpop.f32.mrb[94].mxu0  ;;  %v7078_v56 = vpop.f32.mrb[94].mxu1  ;;  %v3753_v60 = vmul.f32 %v7068_v12, %v7068_v12  ;;  %v3755_v3 = vmul.f32 %v7070_v34, %v7070_v34 }
0x103b   :  { %3605 = vmatmul.mubr.f32.gmra.mrb[108].mxu0 %v7062_v6  ;;  %3710 = vmatmul.mubr.f32.gmra.mrb[108].mxu1 %v7064_v58  ;;  %v7082_v21 = vpop.f32.mrb[95].mxu0  ;;  %v7084_v1 = vpop.f32.mrb[95].mxu1  ;;  %v3756_v24 = vmul.f32 %v7076_v47, %v7076_v47 }
0x103c   :  { %5678 = vmatpush3.bf16.msra.mxu0 %v7527_v27  ;;  %5694 = vmatpush3.bf16.msra.mxu1 %v7527_v27  ;;  %v3757_v31 = vmul.f32 %v7082_v21, %v7082_v21  ;;  %v3759_v15 = vmul.f32 %v7084_v1, %v7084_v1 }
0x103d   :  { %3609 = vmatprep.mubr.f32.mxu0 %v7082_v21  ;;  %3714 = vmatprep.mubr.f32.mxu1 %v7084_v1 }
0x103e   :  { %5679 = vmatprep.subr.bf16.mxu0 %v7527_v27  ;;  %5695 = vmatprep.subr.bf16.mxu1 %v7527_v27 }
0x103f   :  { %3610 = vmatmul.mubr.f32.gmra.mrb[110].mxu0 %v7076_v47  ;;  %3715 = vmatmul.mubr.f32.gmra.mrb[110].mxu1 %v7078_v56 }
0x1040   :  { %5680 = vmatpush3.bf16.msra.mxu0 %v7527_v27  ;;  %3824 = vmatprep.mubr.f32.mxu0 %v3729_v19  ;;  %v3758_v19 = vmul.f32 %v7078_v56, %v7078_v56 }
0x1041   :  { %5696 = vmatpush3.bf16.msra.mxu1 %v7527_v27  ;;  %3929 = vmatprep.mubr.f32.mxu1 %v3731_v2  ;;  %v3734_v27 = vmul.f32 %v6982_v32, %v6982_v32 }
0x1043   :  { %3825 = vmatmul.mubr.f32.vlgmr.msra.gmra.mrb[112].mxu0 %v3728_v29 }
0x1044   :  { %3930 = vmatmul.mubr.f32.vlgmr.msra.gmra.mrb[112].mxu1 %v3730_v61  ;;  %3829 = vmatprep.mubr.f32.mxu0 %v3733_v45 }
0x1045   :  { %3934 = vmatprep.mubr.f32.mxu1 %v3735_v57 }
0x1047   :  { %3830 = vmatmul.mubr.f32.gmra.mrb[114].mxu0 %v3732_v18 }
0x1048   :  { %3935 = vmatmul.mubr.f32.gmra.mrb[114].mxu1 %v3734_v27  ;;  %3834 = vmatprep.mubr.f32.mxu0 %v3737_v28 }
0x1049   :  { %3939 = vmatprep.mubr.f32.mxu1 %v3739_v4 }
0x104b   :  { %3835 = vmatmul.mubr.f32.gmra.mrb[116].mxu0 %v3736_v26 }
0x104c   :  { %3940 = vmatmul.mubr.f32.gmra.mrb[116].mxu1 %v3738_v8  ;;  %3839 = vmatprep.mubr.f32.mxu0 %v3741_v36 }
0x104d   :  { %3944 = vmatprep.mubr.f32.mxu1 %v3743_v46 }
0x104f   :  { %3840 = vmatmul.mubr.f32.gmra.mrb[118].mxu0 %v3740_v59 }
0x1050   :  { %3945 = vmatmul.mubr.f32.gmra.mrb[118].mxu1 %v3742_v0  ;;  %3844 = vmatprep.mubr.f32.mxu0 %v3745_v35 }
0x1051   :  { %3949 = vmatprep.mubr.f32.mxu1 %v3747_v14 }
0x1053   :  { %3845 = vmatmul.mubr.f32.gmra.mrb[120].mxu0 %v3744_v17 }
0x1054   :  { %3950 = vmatmul.mubr.f32.gmra.mrb[120].mxu1 %v3746_v33  ;;  %3849 = vmatprep.mubr.f32.mxu0 %v3749_v5 }
0x1055   :  { %3954 = vmatprep.mubr.f32.mxu1 %v3751_v23 }
0x1057   :  { %3850 = vmatmul.mubr.f32.gmra.mrb[122].mxu0 %v3748_v38 }
0x1058   :  { %3955 = vmatmul.mubr.f32.gmra.mrb[122].mxu1 %v3750_v53  ;;  %3854 = vmatprep.mubr.f32.mxu0 %v3753_v60 }
0x1059   :  { %3959 = vmatprep.mubr.f32.mxu1 %v3755_v3 }
0x105b   :  { %3855 = vmatmul.mubr.f32.gmra.mrb[124].mxu0 %v3752_v62 }
0x105c   :  { %3960 = vmatmul.mubr.f32.gmra.mrb[124].mxu1 %v3754_v25  ;;  %3859 = vmatprep.mubr.f32.mxu0 %v3757_v31 }
0x105d   :  { %3964 = vmatprep.mubr.f32.mxu1 %v3759_v15 }
0x105f   :  { %3860 = vmatmul.mubr.f32.gmra.mrb[126].mxu0 %v3756_v24 }
0x1060   :  { %3965 = vmatmul.mubr.f32.gmra.mrb[126].mxu1 %v3758_v19 }
0x10f6   :  { %v5121_v2 = vpop.f32.mrb[96].mxu0  ;;  %v5177_v29 = vpop.f32.mrb[96].mxu1 }
0x10f7   :  { %v5122_v61 = vpop.f32.mrb[97].mxu0  ;;  %v5178_v45 = vpop.f32.mrb[97].mxu1 }
0x10f8   :  { %v5123_v57 = vadd.f32 %v5122_v61, %v5121_v2  ;;  %v5179_v18 = vadd.f32 %v5178_v45, %v5177_v29 }
0x10fa   :  { %v3682_v27 = vadd.f32 %v5179_v18, %v5123_v57  ;;  %v5124_v28 = vpop.f32.mrb[98].mxu0  ;;  %v5180_v4 = vpop.f32.mrb[98].mxu1 }
0x10fb   :  { %v5125_v26 = vpop.f32.mrb[99].mxu0  ;;  %v5181_v8 = vpop.f32.mrb[99].mxu1 }
0x10fc   :  { %v5126_v36 = vadd.f32 %v5125_v26, %v5124_v28  ;;  %v5182_v46 = vadd.f32 %v5181_v8, %v5180_v4 }
0x10fe   :  { %v3687_v59 = vadd.f32 %v5182_v46, %v5126_v36  ;;  %v5127_v0 = vpop.f32.mrb[100].mxu0  ;;  %v5183_v35 = vpop.f32.mrb[100].mxu1 }
0x10ff   :  { %v5128_v14 = vpop.f32.mrb[101].mxu0  ;;  %v5184_v17 = vpop.f32.mrb[101].mxu1 }
0x1100   :  { %v5129_v33 = vadd.f32 %v5128_v14, %v5127_v0  ;;  %v5185_v5 = vadd.f32 %v5184_v17, %v5183_v35 }
0x1102   :  { %v3692_v23 = vadd.f32 %v5185_v5, %v5129_v33  ;;  %v5130_v38 = vpop.f32.mrb[102].mxu0  ;;  %v5186_v53 = vpop.f32.mrb[102].mxu1 }
0x1103   :  { %v5131_v60 = vpop.f32.mrb[103].mxu0  ;;  %v5187_v3 = vpop.f32.mrb[103].mxu1 }
0x1104   :  { %v5132_v62 = vadd.f32 %v5131_v60, %v5130_v38  ;;  %v5188_v25 = vadd.f32 %v5187_v3, %v5186_v53 }
0x1106   :  { %v7160_v31 = vadd.f32 %v5188_v25, %v5132_v62  ;;  %v5133_v15 = vpop.f32.mrb[104].mxu0  ;;  %v5189_v24 = vpop.f32.mrb[104].mxu1 }
0x1107   :  { %v5134_v19 = vpop.f32.mrb[105].mxu0  ;;  %v5190_v2 = vpop.f32.mrb[105].mxu1 }
0x1108   :  { %v5135_v29 = vadd.f32 %v5134_v19, %v5133_v15  ;;  %v5191_v61 = vadd.f32 %v5190_v2, %v5189_v24 }
0x110a   :  { %v7162_v45 = vadd.f32 %v5191_v61, %v5135_v29  ;;  %v5136_v57 = vpop.f32.mrb[106].mxu0  ;;  %v5192_v18 = vpop.f32.mrb[106].mxu1 }
0x110b   :  { %v5137_v28 = vpop.f32.mrb[107].mxu0  ;;  %v5193_v4 = vpop.f32.mrb[107].mxu1 }
0x110c   :  { %v5138_v26 = vadd.f32 %v5137_v28, %v5136_v57  ;;  %v5194_v8 = vadd.f32 %v5193_v4, %v5192_v18  ;;  %v7170_v57 = vmul.f32 0.001953125, %v3682_v27 }
0x110e   :  { %v7164_v36 = vadd.f32 %v5194_v8, %v5138_v26  ;;  %v5139_v46 = vpop.f32.mrb[108].mxu0  ;;  %v5195_v0 = vpop.f32.mrb[108].mxu1 }
0x110f   :  { %v5140_v35 = vpop.f32.mrb[109].mxu0  ;;  %v5196_v14 = vpop.f32.mrb[109].mxu1 }
0x1110   :  { %v5141_v17 = vadd.f32 %v5140_v35, %v5139_v46  ;;  %v5197_v33 = vadd.f32 %v5196_v14, %v5195_v0  ;;  %v3978_v35 = vmul.f32 %v7170_v57, %v7170_v57  ;;  %v7174_v14 = vmul.f32 0.001953125, %v3687_v59 }
0x1112   :  { %v7166_v5 = vadd.f32 %v5197_v33, %v5141_v17  ;;  %v5142_v38 = vpop.f32.mrb[110].mxu0  ;;  %v5198_v53 = vpop.f32.mrb[110].mxu1 }
0x1113   :  { %v5143_v60 = vpop.f32.mrb[111].mxu0  ;;  %v5199_v3 = vpop.f32.mrb[111].mxu1 }
0x1114   :  { %v5144_v62 = vadd.f32 %v5143_v60, %v5142_v38  ;;  %v5200_v25 = vadd.f32 %v5199_v3, %v5198_v53 }
0x1116   :  { %v7168_v15 = vadd.f32 %v5200_v25, %v5144_v62  ;;  %v5233_v24 = vpop.f32.mrb[112].mxu0  ;;  %v7176_v62 = vmul.f32 0.001953125, %v3692_v23  ;;  %v7183_v23 = vmul.f32 0.001953125, %v7160_v31 }
0x1117   :  { %v5289_v19 = vpop.f32.mrb[112].mxu1  ;;  %v5234_v2 = vpop.f32.mrb[113].mxu0 }
0x1118   :  { %v5235_v29 = vadd.f32 %v5234_v2, %v5233_v24  ;;  %v5290_v61 = vpop.f32.mrb[113].mxu1 }
0x1119   :  { %v5291_v18 = vadd.f32 %v5290_v61, %v5289_v19  ;;  %v3979_v19 = vmul.f32 %v7174_v14, %v7174_v14 }
0x111a   :  { %v5236_v28 = vpop.f32.mrb[114].mxu0 }
0x111b   :  { %v3932_v4 = vadd.f32 %v5291_v18, %v5235_v29  ;;  %v5292_v26 = vpop.f32.mrb[114].mxu1  ;;  %v5237_v8 = vpop.f32.mrb[115].mxu0 }
0x111c   :  { %v5238_v46 = vadd.f32 %v5237_v8, %v5236_v28  ;;  %v5293_v0 = vpop.f32.mrb[115].mxu1 }
0x111d   :  { %v3970_v17 = vmul.f32 0.001953125, %v3932_v4  ;;  %v5294_v33 = vadd.f32 %v5293_v0, %v5292_v26 }
0x111e   :  { %v5239_v38 = vpop.f32.mrb[116].mxu0 }
0x111f   :  { %v3986_v53 = vsub.f32 %v3970_v17, %v3978_v35  ;;  %v3937_v60 = vadd.f32 %v5294_v33, %v5238_v46  ;;  %v5295_v3 = vpop.f32.mrb[116].mxu1  ;;  %v5240_v27 = vpop.f32.mrb[117].mxu0  ;;  %v3980_v46 = vmul.f32 %v7176_v62, %v7176_v62 }
0x1120   :  { %v5241_v25 = vadd.f32 %v5240_v27, %v5239_v38  ;;  %v5296_v24 = vpop.f32.mrb[117].mxu1 }
0x1121   :  { %v3994_v2 = vmax.f32 %v3986_v53, 0.0  ;;  %v3971_v29 = vmul.f32 0.001953125, %v3937_v60  ;;  %v5297_v61 = vadd.f32 %v5296_v24, %v5295_v3 }
0x1122   :  { %v5242_v18 = vpop.f32.mrb[118].mxu0 }
0x1123   :  { %v4002_v59 = vadd.f32 1e-05, %v3994_v2  ;;  %v3987_v28 = vsub.f32 %v3971_v29, %v3979_v19  ;;  %v3942_v4 = vadd.f32 %v5297_v61, %v5241_v25  ;;  %v5298_v26 = vpop.f32.mrb[118].mxu1  ;;  %v5243_v8 = vpop.f32.mrb[119].mxu0  ;;  %v3981_v19 = vmul.f32 %v7183_v23, %v7183_v23 }
0x1124   :  { %v5244_v0 = vadd.f32 %v5243_v8, %v5242_v18  ;;  %v5299_v35 = vpop.f32.mrb[119].mxu1  ;;  %v7188_v2 = vmul.f32 0.001953125, %v7162_v45 }
0x1125   :  { %5735 = vrsqrt.f32 %v4002_v59  ;;  %v3995_v17 = vmax.f32 %v3987_v28, 0.0  ;;  %v3972_v33 = vmul.f32 0.001953125, %v3942_v4  ;;  %v5300_v38 = vadd.f32 %v5299_v35, %v5298_v26 }
0x1126   :  { %v5245_v53 = vpop.f32.mrb[120].mxu0  ;;  %v3982_v35 = vmul.f32 %v7188_v2, %v7188_v2 }
0x1127   :  { %v4003_v60 = vadd.f32 1e-05, %v3995_v17  ;;  %v3988_v3 = vsub.f32 %v3972_v33, %v3980_v46  ;;  %v3947_v27 = vadd.f32 %v5300_v38, %v5244_v0  ;;  %v5301_v24 = vpop.f32.mrb[120].mxu1  ;;  %v5246_v25 = vpop.f32.mrb[121].mxu0  ;;  %v7193_v17 = vmul.f32 0.001953125, %v7164_v36 }
0x1128   :  { %v5247_v31 = vadd.f32 %v5246_v25, %v5245_v53  ;;  %v5302_v29 = vpop.f32.mrb[121].mxu1 }
0x1129   :  { %5737 = vrsqrt.f32 %v4003_v60  ;;  %v3996_v61 = vmax.f32 %v3988_v3, 0.0  ;;  %v3973_v18 = vmul.f32 0.001953125, %v3947_v27  ;;  %v5303_v59 = vadd.f32 %v5302_v29, %v5301_v24  ;;  %v7198_v3 = vld [vmem:[%s7515_s2 + $0xf0] sm:$0xff] }
0x112a   :  { %v5248_v28 = vpop.f32.mrb[122].mxu0  ;;  %v3983_v36 = vmul.f32 %v7193_v17, %v7193_v17 }
0x112b   :  { %v4004_v4 = vadd.f32 1e-05, %v3996_v61  ;;  %v3989_v26 = vsub.f32 %v3973_v18, %v3981_v19  ;;  %v3952_v8 = vadd.f32 %v5303_v59, %v5247_v31  ;;  %v5304_v46 = vpop.f32.mrb[122].mxu1  ;;  %v5249_v0 = vpop.f32.mrb[123].mxu0  ;;  %v7203_v18 = vmul.f32 0.001953125, %v7166_v5 }
0x112c   :  { %v5250_v45 = vadd.f32 %v5249_v0, %v5248_v28  ;;  %v5305_v33 = vpop.f32.mrb[123].mxu1  ;;  %v7211_v0 = vld [vmem:[%s7515_s2 + $0xf8] sm:$0xff] }
0x112d   :  { %5739 = vrsqrt.f32 %v4004_v4  ;;  %v3997_v38 = vmax.f32 %v3989_v26, 0.0  ;;  %v3974_v53 = vmul.f32 0.001953125, %v3952_v8  ;;  %v5306_v60 = vadd.f32 %v5305_v33, %v5304_v46 }
0x112e   :  { %v5251_v27 = vpop.f32.mrb[124].mxu0 }
0x112f   :  { %v5736_v24 = vpop.eup %5735  ;;  %v4005_v25 = vadd.f32 1e-05, %v3997_v38  ;;  %v3990_v19 = vsub.f32 %v3974_v53, %v3982_v35  ;;  %v3957_v31 = vadd.f32 %v5306_v60, %v5250_v45  ;;  %v5307_v29 = vpop.f32.mrb[124].mxu1 }
0x1130   :  { %v5252_v61 = vpop.f32.mrb[125].mxu0  ;;  %v5308_v28 = vpop.f32.mrb[125].mxu1  ;;  %v7206_v4 = vmul.f32 %v5736_v24, %v7198_v3  ;;  %v3984_v24 = vmul.f32 %v7203_v18, %v7203_v18 }
0x1131   :  { %v5253_v59 = vadd.f32 %v5252_v61, %v5251_v27  ;;  %5741 = vrsqrt.f32 %v4005_v25  ;;  %v3998_v26 = vmax.f32 %v3990_v19, 0.0  ;;  %v3975_v8 = vmul.f32 0.001953125, %v3957_v31 }
0x1132   :  { %v5309_v46 = vadd.f32 %v5308_v28, %v5307_v29  ;;  %v5254_v35 = vpop.f32.mrb[126].mxu0  ;;  %v4098_v45 = vmul.f32 %v7206_v4, %v7170_v57  ;;  %v3727_v25 = vmul.f32 0.001953125, %v7168_v15 }
0x1133   :  { %v5738_v5 = vpop.eup %5737  ;;  %v4006_v33 = vadd.f32 1e-05, %v3998_v26  ;;  %v3991_v38 = vsub.f32 %v3975_v8, %v3983_v36  ;;  %v5310_v60 = vpop.f32.mrb[126].mxu1  ;;  %v7223_v36 = vld [vmem:[%s7515_s2 + $0x100] sm:$0xff] }
0x1134   :  { %v3962_v53 = vadd.f32 %v5309_v46, %v5253_v59  ;;  %v5255_v27 = vpop.f32.mrb[127].mxu0  ;;  %v5311_v31 = vpop.f32.mrb[127].mxu1  ;;  %4114 = vrot.lane.b32.xlu1 %v4098_v45, %s5786_s26  ;;  %v4019_v29 = vmul.f32 %v5738_v5, %v7211_v0  ;;  %v3985_v45 = vmul.f32 %v3727_v25, %v3727_v25 }
0x1135   :  { %v5256_v19 = vadd.f32 %v5255_v27, %v5254_v35  ;;  %5743 = vrsqrt.f32 %v4006_v33  ;;  %v3999_v61 = vmax.f32 %v3991_v38, 0.0  ;;  %v5312_v28 = vadd.f32 %v5311_v31, %v5310_v60  ;;  %v3505_v38 = vld [vmem:[%s7515_s2 + $0x108] sm:$0xff]  ;;  %v3506_v31 = vld [vmem:[%s7515_s2 + $0x110] sm:$0xff] }
0x1136   :  { %v3976_v57 = vmul.f32 0.001953125, %v3962_v53  ;;  %v4099_v59 = vmul.f32 %v4019_v29, %v7174_v14 }
0x1137   :  { %v5740_v26 = vpop.eup %5739  ;;  %v4007_v8 = vadd.f32 1e-05, %v3999_v61  ;;  %v3967_v46 = vadd.f32 %v5312_v28, %v5256_v19 }
0x1138   :  { %v3992_v15 = vsub.f32 %v3976_v57, %v3984_v24  ;;  %4116 = vrot.lane.b32.xlu0 %v4099_v59, %s5786_s26  ;;  %v4020_v35 = vmul.f32 %v5740_v26, %v7223_v36 }
0x1139   :  { %5745 = vrsqrt.f32 %v4007_v8  ;;  %v3977_v33 = vmul.f32 0.001953125, %v3967_v46 }
0x113a   :  { %v4000_v5 = vmax.f32 %v3992_v15, 0.0  ;;  %v4100_v53 = vmul.f32 %v4020_v35, %v7176_v62  ;;  %v3507_v62 = vld [vmem:[%s7515_s2 + $0x118] sm:$0xff] }
0x113b   :  { %v5742_v60 = vpop.eup %5741  ;;  %v3993_v27 = vsub.f32 %v3977_v33, %v3985_v45  ;;  %v3509_v33 = vld [vmem:[%s7515_s2 + $0x128] sm:$0xff] }
0x113c   :  { %v4008_v14 = vadd.f32 1e-05, %v4000_v5  ;;  %4118 = vrot.lane.b32.xlu1 %v4100_v53, %s5786_s26  ;;  %v4021_v24 = vmul.f32 %v5742_v60, %v3505_v38 }
0x113d   :  { %v4001_v19 = vmax.f32 %v3993_v27, 0.0 }
0x113e   :  { %5747 = vrsqrt.f32 %v4008_v14  ;;  %v4101_v61 = vmul.f32 %v4021_v24, %v7183_v23  ;;  %v3508_v23 = vld [vmem:[%s7515_s2 + $0x120] sm:$0xff] }
0x113f   :  { %v5744_v57 = vpop.eup %5743  ;;  %v4009_v28 = vadd.f32 1e-05, %v4001_v19 }
0x1140   :  { %4120 = vrot.lane.b32.xlu0 %v4101_v61, %s5786_s26  ;;  %v4022_v59 = vmul.f32 %v5744_v57, %v3506_v31 }
0x1141   :  { %5749 = vrsqrt.f32 %v4009_v28 }
0x1142   :  { %v4102_v26 = vmul.f32 %v4022_v59, %v7188_v2 }
0x1143   :  { %v5746_v8 = vpop.eup %5745 }
0x1144   :  { %4122 = vrot.lane.b32.xlu1 %v4102_v26, %s5786_s26  ;;  %v4023_v15 = vmul.f32 %v5746_v8, %v3507_v62 }
0x1146   :  { %v4103_v46 = vmul.f32 %v4023_v15, %v7193_v17 }
0x1148   :  { %v5748_v45 = vpop.eup %5747  ;;  %4124 = vrot.lane.b32.xlu0 %v4103_v46, %s5786_s26 }
0x1149   :  { %v4024_v5 = vmul.f32 %v5748_v45, %v3508_v23 }
0x114b   :  { %v4104_v2 = vmul.f32 %v4024_v5, %v7203_v18  ;;  %v5750_v53 = vpop.eup %5749 }
0x114c   :  { %v4025_v60 = vmul.f32 %v5750_v53, %v3509_v33 }
0x114d   :  { %4126 = vrot.lane.b32.xlu1 %v4104_v2, %s5786_s26 }
0x114e   :  { %v4105_v14 = vmul.f32 %v4025_v60, %v3727_v25 }
0x1150   :  { %4128 = vrot.lane.b32.xlu0 %v4105_v14, %s5786_s26 }
0x1151   :  { %4028 = vperm.xlu1 %5717, %v7206_v4  }
0x1154   :  { %4033 = vperm.xlu0 %5718, %v4019_v29  }
0x1155   :  { %4038 = vperm.xlu1 %5717, %v4020_v35  }
0x1158   :  { %4048 = vperm.xlu0 %5718, %v4022_v59  }
0x1159   :  { %4043 = vperm.xlu1 %5717, %v4021_v24  }
0x115c   :  { %4058 = vperm.xlu0 %5718, %v4024_v5  }
0x115d   :  { %4053 = vperm.xlu1 %5717, %v4023_v15  }
0x1160   :  { %5719 = vset.pattern.permute.xlu0 %v7529_v9 }
0x1161   :  { %4063 = vperm.xlu1 %5717, %v4025_v60  }
0x1165   :  { %5720 = vset.pattern.permute.xlu1 %v7529_v9 }
0x11a6   :  { %v4115_v17 = vpop.permute.xlu1 %4114 }
0x11a7   :  { %v4138_v18 = vsub.f32 %v7198_v3, %v4115_v17 }
0x11a9   :  { %4148 = vperm.xlu0 %5719, %v4138_v18   ;;  %v5751_v18 = vld [vmem:[%s7514_s0] sm:$0xff] }
0x11aa   :  { %v4117_v25 = vpop.permute.xlu0 %4116 }
0x11ab   :  { %v4139_v27 = vsub.f32 %v7211_v0, %v4117_v25 }
0x11ad   :  { %4153 = vperm.xlu1 %5720, %v4139_v27   ;;  %v5754_v27 = vld [vmem:[%s7514_s0 + $0x18] sm:$0xff] }
0x11ae   :  { %v4119_v4 = vpop.permute.xlu1 %4118 }
0x11af   :  { %v4140_v29 = vsub.f32 %v7223_v36, %v4119_v4 }
0x11b1   :  { %4158 = vperm.xlu1 %5720, %v4140_v29  }
0x11b2   :  { %v4121_v35 = vpop.permute.xlu0 %4120 }
0x11b3   :  { %v4141_v24 = vsub.f32 %v3505_v38, %v4121_v35 }
0x11b5   :  { %4163 = vperm.xlu0 %5719, %v4141_v24  }
0x11b6   :  { %v4123_v19 = vpop.permute.xlu1 %4122 }
0x11b7   :  { %v4142_v61 = vsub.f32 %v3506_v31, %v4123_v19 }
0x11b9   :  { %4168 = vperm.xlu1 %5720, %v4142_v61  }
0x11ba   :  { %v4125_v57 = vpop.permute.xlu0 %4124 }
0x11bb   :  { %v4143_v9 = vsub.f32 %v3507_v62, %v4125_v57 }
0x11bd   :  { %4173 = vperm.xlu0 %5719, %v4143_v9  }
0x11bf   :  { %v4127_v28 = vpop.permute.xlu1 %4126 }
0x11c0   :  { %v4144_v3 = vsub.f32 %v3508_v23, %v4127_v28 }
0x11c2   :  { %4178 = vperm.xlu1 %5720, %v4144_v3   ;;  %v4129_v59 = vpop.permute.xlu0 %4128 }
0x11c3   :  { %v4145_v26 = vsub.f32 %v3509_v33, %v4129_v59 }
0x11c5   :  { %4183 = vperm.xlu0 %5719, %v4145_v26  }
0x11d0   :  { %v4029_v0 = vpop.permute.xlu1 %4028 }
0x11d1   :  { %v4066_v62 = vmul.f32 %v4029_v0, %v6970_v7  ;;  %v4067_v45 = vmul.f32 %v4029_v0, %v6974_v10  ;;  %v4068_v23 = vmul.f32 %v4029_v0, %v6972_v48  ;;  %v4069_v5 = vmul.f32 %v4029_v0, %v6976_v51  ;;  %v5752_v7 = vld [vmem:[%s7514_s0 + $0x8] sm:$0xff]  ;;  %v5753_v48 = vld [vmem:[%s7514_s0 + $0x10] sm:$0xff] }
0x11d3   :  { %v4034_v15 = vpop.permute.xlu0 %4033 }
0x11d4   :  { %v4039_v8 = vpop.permute.xlu1 %4038  ;;  %v4070_v29 = vmul.f32 %v4034_v15, %v6980_v11  ;;  %v4071_v35 = vmul.f32 %v4034_v15, %v6986_v13  ;;  %v4072_v24 = vmul.f32 %v4034_v15, %v6982_v32  ;;  %v4073_v19 = vmul.f32 %v4034_v15, %v6988_v37  ;;  %v5755_v32 = vld [vmem:[%s7514_s0 + $0x20] sm:$0xff] }
0x11d5   :  { %v4076_v11 = vmul.f32 %v4039_v8, %v7000_v41  ;;  %v4077_v13 = vmul.f32 %v4039_v8, %v7006_v52 }
0x11d7   :  { %v7262_v46 = vpop.permute.xlu0 %4048 }
0x11d8   :  { %v7260_v36 = vpop.permute.xlu1 %4043 }
0x11db   :  { %v7266_v31 = vpop.permute.xlu0 %4058 }
0x11dc   :  { %v7264_v38 = vpop.permute.xlu1 %4053 }
0x11e0   :  { %v7272_v33 = vpop.permute.xlu1 %4063 }
0x1228   :  { %v4149_v2 = vpop.permute.xlu0 %4148 }
0x1229   :  { %v4186_v53 = vadd.f32 %v4149_v2, %v4066_v62  ;;  %v4187_v60 = vadd.f32 %v4149_v2, %v4067_v45  ;;  %v4188_v14 = vadd.f32 %v4149_v2, %v4068_v23  ;;  %v4189_v17 = vadd.f32 %v4149_v2, %v4069_v5 }
0x122a   :  { %v4074_v45 = vmul.f32 %v4039_v8, %v6998_v40  ;;  %v4075_v23 = vmul.f32 %v4039_v8, %v7004_v20  ;;  %v5756_v40 = vld [vmem:[%s7514_s0 + $0x28] sm:$0xff]  ;;  %v5757_v20 = vld [vmem:[%s7514_s0 + $0x30] sm:$0xff]  ;;  %v5758_v8 = vld [vmem:[%s7514_s0 + $0x38] sm:$0xff] }
0x122b   :  { %v4218_v25 = vadd.f32 %v5751_v18, %v4186_v53  ;;  %v4219_v10 = vadd.f32 %v5752_v7, %v4187_v60  ;;  %v4220_v51 = vadd.f32 %v5753_v48, %v4188_v14  ;;  %v4221_v4 = vadd.f32 %v5754_v27, %v4189_v17 }
0x122c   :  { %v4154_v61 = vpop.permute.xlu1 %4153 }
0x122d   :  { %v4250_v57 = vmax.f32 %v4218_v25, 0.0  ;;  %v4251_v9 = vmax.f32 %v4219_v10, 0.0  ;;  %v4252_v28 = vmax.f32 %v4220_v51, 0.0  ;;  %v4253_v3 = vmax.f32 %v4221_v4, 0.0  ;;  %v5759_v10 = vld [vmem:[%s7514_s0 + $0x40] sm:$0xff]  ;;  %v5760_v51 = vld [vmem:[%s7514_s0 + $0x48] sm:$0xff] }
0x122e   :  { %v4190_v59 = vadd.f32 %v4154_v61, %v4070_v29  ;;  %v4191_v26 = vadd.f32 %v4154_v61, %v4071_v35  ;;  %v4192_v0 = vadd.f32 %v4154_v61, %v4072_v24  ;;  %v4193_v62 = vadd.f32 %v4154_v61, %v4073_v19  ;;  %v5761_v4 = vld [vmem:[%s7514_s0 + $0x50] sm:$0xff]  ;;  %v5762_v35 = vld [vmem:[%s7514_s0 + $0x58] sm:$0xff] }
0x122f   :  { %4282 = vst [vmem:[%s7517_s3] sm:$0xff] %v4250_v57  ;;  %4283 = vst [vmem:[%s7517_s3 + $0x8] sm:$0xff] %v4251_v9  ;;  %v4078_v19 = vmul.f32 %v7260_v36, %v7012_v55  ;;  %v4079_v61 = vmul.f32 %v7260_v36, %v7018_v39  ;;  %v4080_v57 = vmul.f32 %v7260_v36, %v7014_v22 }
0x1230   :  { %4284 = vst [vmem:[%s7517_s3 + $0x10] sm:$0xff] %v4252_v28  ;;  %4285 = vst [vmem:[%s7517_s3 + $0x18] sm:$0xff] %v4253_v3  ;;  %v4222_v37 = vadd.f32 %v5755_v32, %v4190_v59  ;;  %v4223_v41 = vadd.f32 %v5756_v40, %v4191_v26  ;;  %v4224_v52 = vadd.f32 %v5757_v20, %v4192_v0  ;;  %v4159_v5 = vpop.permute.xlu1 %4158 }
0x1231   :  { %v4225_v15 = vadd.f32 %v5758_v8, %v4193_v62  ;;  %v4194_v2 = vadd.f32 %v4159_v5, %v4074_v45  ;;  %v4195_v53 = vadd.f32 %v4159_v5, %v4075_v23  ;;  %v4196_v60 = vadd.f32 %v4159_v5, %v4076_v11 }
0x1232   :  { %v4197_v14 = vadd.f32 %v4159_v5, %v4077_v13  ;;  %v4254_v17 = vmax.f32 %v4222_v37, 0.0  ;;  %v4255_v18 = vmax.f32 %v4223_v41, 0.0  ;;  %v4256_v25 = vmax.f32 %v4224_v52, 0.0  ;;  %v5766_v13 = vld [vmem:[%s7514_s0 + $0x78] sm:$0xff] }
0x1233   :  { %v4257_v7 = vmax.f32 %v4225_v15, 0.0  ;;  %v4226_v48 = vadd.f32 %v5759_v10, %v4194_v2  ;;  %v4227_v27 = vadd.f32 %v5760_v51, %v4195_v53  ;;  %v4228_v29 = vadd.f32 %v5761_v4, %v4196_v60  ;;  %v5767_v53 = vld [vmem:[%s7514_s0 + $0x80] sm:$0xff] }
0x1234   :  { %v4229_v24 = vadd.f32 %v5762_v35, %v4197_v14  ;;  %v4081_v9 = vmul.f32 %v7260_v36, %v7020_v16  ;;  %4286 = vst [vmem:[%s7517_s3 + $0x20] sm:$0xff] %v4254_v17  ;;  %4287 = vst [vmem:[%s7517_s3 + $0x28] sm:$0xff] %v4255_v18  ;;  %v4164_v55 = vpop.permute.xlu0 %4163  ;;  %v4082_v0 = vmul.f32 %v7262_v46, %v7030_v50  ;;  %v5763_v50 = vld [vmem:[%s7514_s0 + $0x60] sm:$0xff]  ;;  %v5768_v14 = vld [vmem:[%s7514_s0 + $0x88] sm:$0xff] }
0x1235   :  { %4288 = vst [vmem:[%s7517_s3 + $0x30] sm:$0xff] %v4256_v25  ;;  %4289 = vst [vmem:[%s7517_s3 + $0x38] sm:$0xff] %v4257_v7  ;;  %v4258_v22 = vmax.f32 %v4226_v48, 0.0  ;;  %v4259_v39 = vmax.f32 %v4227_v27, 0.0  ;;  %v4260_v16 = vmax.f32 %v4228_v29, 0.0  ;;  %v4198_v28 = vadd.f32 %v4164_v55, %v4078_v19  ;;  %v5769_v18 = vld [vmem:[%s7514_s0 + $0x90] sm:$0xff] }
0x1236   :  { %v4261_v36 = vmax.f32 %v4229_v24, 0.0  ;;  %v4199_v3 = vadd.f32 %v4164_v55, %v4079_v61  ;;  %v4200_v59 = vadd.f32 %v4164_v55, %v4080_v57  ;;  %v4201_v26 = vadd.f32 %v4164_v55, %v4081_v9  ;;  %v5770_v7 = vld [vmem:[%s7514_s0 + $0x98] sm:$0xff] }
0x1237   :  { %v4083_v62 = vmul.f32 %v7262_v46, %v7036_v42  ;;  %v4084_v45 = vmul.f32 %v7262_v46, %v7032_v63  ;;  %v4085_v23 = vmul.f32 %v7262_v46, %v7038_v43  ;;  %4290 = vst [vmem:[%s7517_s3 + $0x40] sm:$0xff] %v4258_v22  ;;  %4291 = vst [vmem:[%s7517_s3 + $0x48] sm:$0xff] %v4259_v39  ;;  %v5764_v42 = vld [vmem:[%s7514_s0 + $0x68] sm:$0xff]  ;;  %v5765_v46 = vld [vmem:[%s7514_s0 + $0x70] sm:$0xff] }
0x1238   :  { %4292 = vst [vmem:[%s7517_s3 + $0x50] sm:$0xff] %v4260_v16  ;;  %4293 = vst [vmem:[%s7517_s3 + $0x58] sm:$0xff] %v4261_v36  ;;  %v4230_v63 = vadd.f32 %v5763_v50, %v4198_v28  ;;  %v4231_v43 = vadd.f32 %v5764_v42, %v4199_v3  ;;  %v4232_v11 = vadd.f32 %v5765_v46, %v4200_v59  ;;  %v4169_v37 = vpop.permute.xlu1 %4168  ;;  %v5771_v22 = vld [vmem:[%s7514_s0 + $0xa0] sm:$0xff]  ;;  %v5772_v16 = vld [vmem:[%s7514_s0 + $0xa8] sm:$0xff] }
0x1239   :  { %v4233_v32 = vadd.f32 %v5766_v13, %v4201_v26  ;;  %v4202_v40 = vadd.f32 %v4169_v37, %v4082_v0  ;;  %v4203_v41 = vadd.f32 %v4169_v37, %v4083_v62  ;;  %v4204_v20 = vadd.f32 %v4169_v37, %v4084_v45  ;;  %v5775_v50 = vld [vmem:[%s7514_s0 + $0xc0] sm:$0xff]  ;;  %v5776_v42 = vld [vmem:[%s7514_s0 + $0xc8] sm:$0xff]  ;;  %v5777_v46 = vld [vmem:[%s7514_s0 + $0xd0] sm:$0xff] }
0x123a   :  { %v4205_v52 = vadd.f32 %v4169_v37, %v4085_v23  ;;  %v4262_v8 = vmax.f32 %v4230_v63, 0.0  ;;  %v4263_v15 = vmax.f32 %v4231_v43, 0.0  ;;  %v4264_v5 = vmax.f32 %v4232_v11, 0.0  ;;  %v5778_v13 = vld [vmem:[%s7514_s0 + $0xd8] sm:$0xff] }
0x123b   :  { %v4265_v2 = vmax.f32 %v4233_v32, 0.0  ;;  %v4234_v60 = vadd.f32 %v5767_v53, %v4202_v40  ;;  %v4235_v17 = vadd.f32 %v5768_v14, %v4203_v41  ;;  %v4236_v25 = vadd.f32 %v5769_v18, %v4204_v20 }
0x123c   :  { %v4237_v10 = vadd.f32 %v5770_v7, %v4205_v52  ;;  %v4086_v48 = vmul.f32 %v7264_v38, %v7044_v54  ;;  %v4087_v51 = vmul.f32 %v7264_v38, %v7050_v49  ;;  %v4088_v27 = vmul.f32 %v7264_v38, %v7046_v44  ;;  %4294 = vst [vmem:[%s7517_s3 + $0x60] sm:$0xff] %v4262_v8  ;;  %v4174_v54 = vpop.permute.xlu0 %4173 }
0x123d   :  { %v4089_v4 = vmul.f32 %v7264_v38, %v7052_v30  ;;  %4295 = vst [vmem:[%s7517_s3 + $0x68] sm:$0xff] %v4263_v15  ;;  %4296 = vst [vmem:[%s7517_s3 + $0x70] sm:$0xff] %v4264_v5  ;;  %v4266_v44 = vmax.f32 %v4234_v60, 0.0  ;;  %v4267_v49 = vmax.f32 %v4235_v17, 0.0  ;;  %v4268_v30 = vmax.f32 %v4236_v25, 0.0  ;;  %v5782_v25 = vld [vmem:[%s7514_s0 + $0xf8] sm:$0xff] }
0x123e   :  { %4297 = vst [vmem:[%s7517_s3 + $0x78] sm:$0xff] %v4265_v2  ;;  %v4269_v38 = vmax.f32 %v4237_v10, 0.0  ;;  %v4206_v29 = vadd.f32 %v4174_v54, %v4086_v48  ;;  %v4207_v35 = vadd.f32 %v4174_v54, %v4087_v51  ;;  %v4208_v24 = vadd.f32 %v4174_v54, %v4088_v27 }
0x123f   :  { %v4209_v19 = vadd.f32 %v4174_v54, %v4089_v4  ;;  %4298 = vst [vmem:[%s7517_s3 + $0x80] sm:$0xff] %v4266_v44  ;;  %4299 = vst [vmem:[%s7517_s3 + $0x88] sm:$0xff] %v4267_v49  ;;  %v4090_v61 = vmul.f32 %v7266_v31, %v7062_v6  ;;  %v4091_v57 = vmul.f32 %v7266_v31, %v7068_v12  ;;  %v5773_v6 = vld [vmem:[%s7514_s0 + $0xb0] sm:$0xff] }
0x1240   :  { %4300 = vst [vmem:[%s7517_s3 + $0x90] sm:$0xff] %v4268_v30  ;;  %4301 = vst [vmem:[%s7517_s3 + $0x98] sm:$0xff] %v4269_v38  ;;  %v4092_v9 = vmul.f32 %v7266_v31, %v7064_v58  ;;  %v4093_v55 = vmul.f32 %v7266_v31, %v7070_v34  ;;  %v4238_v39 = vadd.f32 %v5771_v22, %v4206_v29  ;;  %v5774_v58 = vld [vmem:[%s7514_s0 + $0xb8] sm:$0xff] }
0x1241   :  { %v4239_v36 = vadd.f32 %v5772_v16, %v4207_v35  ;;  %v4240_v12 = vadd.f32 %v5773_v6, %v4208_v24  ;;  %v4241_v34 = vadd.f32 %v5774_v58, %v4209_v19  ;;  %v4179_v31 = vpop.permute.xlu1 %4178  ;;  %v4094_v40 = vmul.f32 %v7272_v33, %v7076_v47  ;;  %v5779_v47 = vld [vmem:[%s7514_s0 + $0xe0] sm:$0xff] }
0x1242   :  { %v4210_v28 = vadd.f32 %v4179_v31, %v4090_v61  ;;  %v4211_v3 = vadd.f32 %v4179_v31, %v4091_v57  ;;  %v4212_v59 = vadd.f32 %v4179_v31, %v4092_v9  ;;  %v4213_v26 = vadd.f32 %v4179_v31, %v4093_v55 }
0x1243   :  { %v4270_v0 = vmax.f32 %v4238_v39, 0.0  ;;  %v4271_v62 = vmax.f32 %v4239_v36, 0.0  ;;  %v4272_v45 = vmax.f32 %v4240_v12, 0.0  ;;  %v4273_v23 = vmax.f32 %v4241_v34, 0.0 }
0x1244   :  { %v4242_v63 = vadd.f32 %v5775_v50, %v4210_v28  ;;  %v4243_v43 = vadd.f32 %v5776_v42, %v4211_v3  ;;  %v4244_v11 = vadd.f32 %v5777_v46, %v4212_v59  ;;  %v4245_v32 = vadd.f32 %v5778_v13, %v4213_v26  ;;  %v4184_v37 = vpop.permute.xlu0 %4183 }
0x1245   :  { %4302 = vst [vmem:[%s7517_s3 + $0xa0] sm:$0xff] %v4270_v0  ;;  %4303 = vst [vmem:[%s7517_s3 + $0xa8] sm:$0xff] %v4271_v62  ;;  %v4095_v41 = vmul.f32 %v7272_v33, %v7082_v21  ;;  %v4096_v20 = vmul.f32 %v7272_v33, %v7078_v56  ;;  %v4097_v52 = vmul.f32 %v7272_v33, %v7084_v1  ;;  %v5780_v21 = vld [vmem:[%s7514_s0 + $0xe8] sm:$0xff]  ;;  %v5781_v33 = vld [vmem:[%s7514_s0 + $0xf0] sm:$0xff] }
0x1246   :  { %4304 = vst [vmem:[%s7517_s3 + $0xb0] sm:$0xff] %v4272_v45  ;;  %4305 = vst [vmem:[%s7517_s3 + $0xb8] sm:$0xff] %v4273_v23  ;;  %v4274_v8 = vmax.f32 %v4242_v63, 0.0  ;;  %v4275_v15 = vmax.f32 %v4243_v43, 0.0  ;;  %v4276_v5 = vmax.f32 %v4244_v11, 0.0  ;;  %v4277_v2 = vmax.f32 %v4245_v32, 0.0 }
0x1247   :  { %v4214_v53 = vadd.f32 %v4184_v37, %v4094_v40  ;;  %v4215_v60 = vadd.f32 %v4184_v37, %v4095_v41  ;;  %v4216_v14 = vadd.f32 %v4184_v37, %v4096_v20  ;;  %v4217_v17 = vadd.f32 %v4184_v37, %v4097_v52 }
0x1248   :  { %4306 = vst [vmem:[%s7517_s3 + $0xc0] sm:$0xff] %v4274_v8  ;;  %4307 = vst [vmem:[%s7517_s3 + $0xc8] sm:$0xff] %v4275_v15 }
0x1249   :  { %4308 = vst [vmem:[%s7517_s3 + $0xd0] sm:$0xff] %v4276_v5  ;;  %4309 = vst [vmem:[%s7517_s3 + $0xd8] sm:$0xff] %v4277_v2  ;;  %v4246_v56 = vadd.f32 %v5779_v47, %v4214_v53  ;;  %v4247_v1 = vadd.f32 %v5780_v21, %v4215_v60  ;;  %v4248_v18 = vadd.f32 %v5781_v33, %v4216_v14 }
0x124a   :  { %v4249_v7 = vadd.f32 %v5782_v25, %v4217_v17 }
0x124b   :  { %v4278_v10 = vmax.f32 %v4246_v56, 0.0  ;;  %v4279_v48 = vmax.f32 %v4247_v1, 0.0  ;;  %v4280_v51 = vmax.f32 %v4248_v18, 0.0 }
0x124c   :  { %v4281_v27 = vmax.f32 %v4249_v7, 0.0 }
0x124d   :  { %4310 = vst [vmem:[%s7517_s3 + $0xe0] sm:$0xff] %v4278_v10  ;;  %4311 = vst [vmem:[%s7517_s3 + $0xe8] sm:$0xff] %v4279_v48 }
0x124e   :  { %4312 = vst [vmem:[%s7517_s3 + $0xf0] sm:$0xff] %v4280_v51  ;;  %4313 = vst [vmem:[%s7517_s3 + $0xf8] sm:$0xff] %v4281_v27 }

</bundles_post_ra>
